<compile_context>
chip_gen: v7x
topology: tpu7x:2x2x1
jax: 0.10.0
libtpu: 0.0.40
codegen_flags: <defaults>
</compile_context>

<pallas_src>
import functools

import numpy as np
import jax
import jax.numpy as jnp
from jax import lax
from jax.experimental import pallas as pl
from jax.experimental.pallas import tpu as pltpu

# ---------------- configuration ----------------
U = 32                       # multiplicity of irreps_in1
IN1_DIM = 4 * U              # 128  (s1 + 3 vector components, 32 channels each)
IN2_DIM = 4                  # 4    (s2 + v2x + v2y + v2z)
OUT_DIM = 11 * U             # 352  (11 output slabs of 32 channels)
W_NUMEL = 5 * U              # 160  (5 paths x 32 channels)
N_TERMS = 3                  # max products contributing to one output column (dot)
TERM_W = 384                 # 352 padded up to 3 full vregs (lane aligned)

INV_SQRT3 = float(1.0 / np.sqrt(3.0))
INV_SQRT2 = float(1.0 / np.sqrt(2.0))

SEGS_IN1 = [(U, 1), (U, 3)]
SEGS_OUT = [(U, 1), (U, 3), (U, 3), (U, 1), (U, 3)]

# Output slab table: (weight path, component norm, [(x1 comp, x2 comp, sign), ...])
# x1 comps: 0=s1, 1=v1x, 2=v1y, 3=v1z ; x2 comps: 0=s2, 1=v2x, 2=v2y, 3=v2z
_SLABS = [
    (0, 1.0,       [(0, 0, +1.0)]),                               # 0e x 0e -> 0e
    (1, 1.0,       [(0, 1, +1.0)]),                               # 0e x 1o -> 1o (x)
    (1, 1.0,       [(0, 2, +1.0)]),                               # (y)
    (1, 1.0,       [(0, 3, +1.0)]),                               # (z)
    (2, 1.0,       [(1, 0, +1.0)]),                               # 1o x 0e -> 1o (x)
    (2, 1.0,       [(2, 0, +1.0)]),                               # (y)
    (2, 1.0,       [(3, 0, +1.0)]),                               # (z)
    (3, INV_SQRT3, [(1, 1, +1.0), (2, 2, +1.0), (3, 3, +1.0)]),   # 1o x 1o -> 0e (dot)
    (4, INV_SQRT2, [(2, 3, +1.0), (3, 2, -1.0)]),                 # 1o x 1o -> 1e (cross x)
    (4, INV_SQRT2, [(3, 1, +1.0), (1, 3, -1.0)]),                 # (cross y)
    (4, INV_SQRT2, [(1, 2, +1.0), (2, 1, -1.0)]),                 # (cross z)
]


# ---------------- layout helpers (column maps of the fused permutations) --------
def _in1_col(layout, comp, u):
    """Column of x1 holding component `comp` (0=s1,1..3=v1) of channel u."""
    if comp == 0:
        return u                                   # scalars: same in both layouts
    if layout == "ir_mul":
        return U + (comp - 1) * U + u
    return U + 3 * u + (comp - 1)                  # mul_ir (e3nn)


def _out_col(layout, slab, u):
    """Output column of slab `slab` (0..10), channel u."""
    if layout == "ir_mul":
        return 32 * slab + u
    # mul_ir: segment boundaries are identical, only within-segment order differs.
    if slab == 0:
        return u
    if slab <= 3:
        return 32 + 3 * u + (slab - 1)             # o1 (1o)
    if slab <= 6:
        return 128 + 3 * u + (slab - 4)            # o2 (1o)
    if slab == 7:
        return 224 + u                             # o3 (0e)
    return 256 + 3 * u + (slab - 8)                # o4 (1e)


@functools.lru_cache(maxsize=None)
def _build_constants(layout):
    """Constant gather matrices (layout + coefficients fused, weights NOT yet)."""
    a = np.zeros((N_TERMS, IN1_DIM, TERM_W), np.float32)      # x1 gather (0/1)
    bsel = np.zeros((N_TERMS, IN2_DIM, TERM_W), np.float32)   # x2 gather * sign * norm
    widx = np.zeros((TERM_W,), np.int32)                      # weight index per column
    for k, (path, norm, terms) in enumerate(_SLABS):
        for u in range(U):
            c = _out_col(layout, k, u)
            widx[c] = path * U + u
            for m, (a_comp, b_comp, sign) in enumerate(terms):
                a[m, _in1_col(layout, a_comp, u), c] = 1.0
                bsel[m, b_comp, c] = sign * norm
    return a, bsel, widx


# ---------------- layout transposes (test helpers, mirror TransposeIrrepsLayout) -
def mul_ir_to_ir_mul(x, segs):
    B = x.shape[0]
    parts, off = [], 0
    for mul, d in segs:
        seg = x[:, off:off + mul * d].reshape(B, mul, d)
        parts.append(jnp.transpose(seg, (0, 2, 1)).reshape(B, mul * d))
        off += mul * d
    return jnp.concatenate(parts, axis=1)


def ir_mul_to_mul_ir(x, segs):
    B = x.shape[0]
    parts, off = [], 0
    for mul, d in segs:
        seg = x[:, off:off + mul * d].reshape(B, d, mul)
        parts.append(jnp.transpose(seg, (0, 2, 1)).reshape(B, mul * d))
        off += mul * d
    return jnp.concatenate(parts, axis=1)


# ---------------- Pallas kernel ----------------
def _cwtp_kernel(a_ref, b_ref, x1_ref, x2_ref, o_ref, *, mm_dtype, mm_precision):
    # a_ref: (3, 128, 384)  constant x1 gather (layout fused)
    # b_ref: (3,   4, 384)  weight * sign * norm, x2 gather (layout fused)
    # x1_ref: (bt, 128), x2_ref: (bt, 4), o_ref: (bt, 352)
    x1 = x1_ref[...].astype(mm_dtype)
    x2 = x2_ref[...].astype(mm_dtype)
    acc = None
    for m in range(N_TERMS):                      # unrolled at trace time
        xa = jnp.dot(x1, a_ref[m], preferred_element_type=jnp.float32,
                     precision=mm_precision)      # (bt, 384) gathered/permuted x1
        xb = jnp.dot(x2, b_ref[m], preferred_element_type=jnp.float32,
                     precision=mm_precision)      # (bt, 384) broadcast x2 * weights
        t = xa * xb
        acc = t if acc is None else acc + t
    # single lane-dense store (first 352 of the 384 padded lanes are valid)
    o_ref[...] = acc[:, :OUT_DIM].astype(o_ref.dtype)


# ---------------- generation-aware tiling ----------------
def _tpu_budget():
    kind = ""
    try:
        kind = jax.devices()[0].device_kind.lower()
    except Exception:
        pass
    phys_vmem = (64 << 20) if "v7" in kind else (128 << 20)
    try:
        info_fn = getattr(pltpu, "get_tpu_info", None)
        if info_fn is not None:
            phys_vmem = int(getattr(info_fn(), "vmem_capacity_bytes", phys_vmem))
    except Exception:
        pass
    vmem_limit = min(int(phys_vmem * 0.7), 100 << 20)
    num_tc = 2 if "v7" in kind else 1             # v7x has 2 TensorCores per chip
    return vmem_limit, num_tc


def _pick_batch_tile(batch, requested, io_item, mm_item, vmem_limit, num_tc):
    min_tile = 16 if io_item == 2 else 8
    # double-buffered pipeline blocks (x2's 4 lanes pad to 128, out pads to 384)
    blocks = 2 * (IN1_DIM + 128 + TERM_W) * io_item
    temps = 4 * TERM_W * 4                        # in-kernel f32 temporaries
    per_row = blocks + temps
    const_bytes = 2 * N_TERMS * (IN1_DIM + 8) * TERM_W * mm_item
    budget = max(vmem_limit // 2 - const_bytes, 1 << 20)
    bt = min(budget // per_row, int(requested), 2048)
    if num_tc > 1 and batch >= 4 * min_tile:
        # keep >= 2 grid steps per TensorCore so both cores pipeline
        bt = min(bt, -(-batch // (2 * num_tc)))
    bt = max(min_tile, (bt // min_tile) * min_tile)
    bt = min(bt, -(-batch // min_tile) * min_tile)   # don't exceed padded batch
    return max(bt, min_tile)


# ---------------- wrapper ----------------
def channel_wise_tensor_product(weight, x1, x2, *, layout="mul_ir", batch_tile=1024):
    """Channel-wise tensor product forward pass.

    weight: (1, 160) shared weights (f32).
    x1: (B, 128), x2: (B, 4) in `layout` ("mul_ir" = e3nn default, or "ir_mul").
    Returns (B, 352) in the same `layout` (layout permutation fused in-kernel).
    """
    if layout not in ("mul_ir", "ir_mul"):
        raise ValueError(f"unknown layout {layout!r}")
    B = x1.shape[0]
    io_dtype = x1.dtype
    io_item = np.dtype(io_dtype).itemsize
    mm_dtype = jnp.bfloat16 if io_dtype == jnp.bfloat16 else jnp.float32
    mm_item = np.dtype(mm_dtype).itemsize
    mm_precision = (lax.Precision.DEFAULT if mm_dtype == jnp.bfloat16
                    else lax.Precision.HIGHEST)

    a_np, bsel_np, widx_np = _build_constants(layout)
    # fold the shared weights into the (tiny) x2-side matrices: (3, 4, 384)
    w_row = weight.reshape(-1)[jnp.asarray(widx_np)].astype(jnp.float32)
    amat = jnp.asarray(a_np, dtype=mm_dtype)
    bmat = (jnp.asarray(bsel_np) * w_row[None, None, :]).astype(mm_dtype)

    vmem_limit, num_tc = _tpu_budget()
    bt = _pick_batch_tile(B, batch_tile, io_item, mm_item, vmem_limit, num_tc)
    grid = (pl.cdiv(B, bt),)

    kernel = functools.partial(_cwtp_kernel, mm_dtype=mm_dtype,
                               mm_precision=mm_precision)

    return pl.pallas_call(
        kernel,
        out_shape=jax.ShapeDtypeStruct((B, OUT_DIM), io_dtype),
        grid=grid,
        in_specs=[
            # constants: constant block index -> fetched once, never re-DMAed
            pl.BlockSpec((N_TERMS, IN1_DIM, TERM_W), lambda i: (0, 0, 0)),
            pl.BlockSpec((N_TERMS, IN2_DIM, TERM_W), lambda i: (0, 0, 0)),
            pl.BlockSpec((bt, IN1_DIM), lambda i: (i, 0)),
            pl.BlockSpec((bt, IN2_DIM), lambda i: (i, 0)),
        ],
        out_specs=pl.BlockSpec((bt, OUT_DIM), lambda i: (i, 0)),
        compiler_params=pltpu.CompilerParams(
            dimension_semantics=("parallel",),
            vmem_limit_bytes=int(vmem_limit)),
        cost_estimate=pl.CostEstimate(
            flops=int(2 * N_TERMS * (IN1_DIM + IN2_DIM) * OUT_DIM * B),
            transcendentals=0,
            bytes_accessed=int((IN1_DIM + IN2_DIM + OUT_DIM) * B * io_item
                               + (a_np.size + bsel_np.size) * mm_item)),
    )(amat, bmat, x1, x2)


# ---------------- pure-JAX reference (mul_ir layout end to end, f32 math) --------
def reference(weight, x1, x2):
    B = x1.shape[0]
    s1 = x1[:, :U]
    v1 = x1[:, U:].reshape(B, U, 3)
    s2 = x2[:, :1]
    v2 = x2[:, 1:4]
    w = weight[0]
    w0, w1, w2, w3, w4 = (w[p * U:(p + 1) * U] for p in range(5))
    o0 = w0[None] * s1 * s2
    o1 = w1[None, :, None] * s1[:, :, None] * v2[:, None, :]
    o2 = w2[None, :, None] * v1 * s2[:, :, None]
    o3 = w3[None] * jnp.einsum('buk,bk->bu', v1, v2) * INV_SQRT3
    o4 = w4[None, :, None] * jnp.cross(v1, v2[:, None, :]) * INV_SQRT2
    return jnp.concatenate(
        [o0, o1.reshape(B, -1), o2.reshape(B, -1), o3, o4.reshape(B, -1)], axis=1)


# TODO(synk): optional indices_1/indices_2/indices_out gather/scatter arguments and
# non-shared (per-batch) weights of forward() are not implemented in this kernel.

if __name__ == "__main__":
    key = jax.random.PRNGKey(0)
    k_w, k_x1, k_x2 = jax.random.split(key, 3)

    B = 16
    weight = jax.random.normal(k_w, (1, W_NUMEL), dtype=jnp.float32)   # internal weights
    x1 = jax.random.normal(k_x1, (B, IN1_DIM), dtype=jnp.float32)
    x2 = jax.random.normal(k_x2, (B, IN2_DIM), dtype=jnp.float32)

    ref = reference(weight, x1, x2)

    # 1) default e3nn / mul_ir public layout (matches torch module default layout)
    out = channel_wise_tensor_product(weight, x1, x2, layout="mul_ir")
    out = jax.block_until_ready(out)
    assert out.shape == (B, OUT_DIM), out.shape
    np.testing.assert_allclose(np.asarray(out), np.asarray(ref), rtol=1e-5, atol=1e-5)

    # 2) ir_mul persistent layout (== ChannelWiseTensorProduct(layout=cue.ir_mul))
    x1_ir = mul_ir_to_ir_mul(x1, SEGS_IN1)
    out_ir = channel_wise_tensor_product(weight, x1_ir, x2, layout="ir_mul")
    out_ir = jax.block_until_ready(out_ir)
    np.testing.assert_allclose(np.asarray(ir_mul_to_mul_ir(out_ir, SEGS_OUT)),
                               np.asarray(ref), rtol=1e-5, atol=1e-5)

    # 3) bf16 I/O (HBM-bandwidth optimization; matmuls run in bf16, accumulate f32)
    Bb = 32
    x1b = jax.random.normal(k_x1, (Bb, IN1_DIM), dtype=jnp.float32)
    x2b = jax.random.normal(k_x2, (Bb, IN2_DIM), dtype=jnp.float32)
    out_bf = channel_wise_tensor_product(weight, x1b.astype(jnp.bfloat16),
                                         x2b.astype(jnp.bfloat16), layout="mul_ir")
    out_bf = jax.block_until_ready(out_bf)
    ref_bf = reference(weight,
                       x1b.astype(jnp.bfloat16).astype(jnp.float32),
                       x2b.astype(jnp.bfloat16).astype(jnp.float32))
    np.testing.assert_allclose(np.asarray(out_bf).astype(np.float32),
                               np.asarray(ref_bf), rtol=2e-2, atol=2e-2)

    print("KERNEL_OK")
</pallas_src>

<mosaic_0001>
module attributes {stable_mosaic.version = 11 : i64} {
  func.func @_cwtp_kernel(%arg0: i32, %arg1: memref<3x128x384xf32, #tpu.memory_space<vmem>>, %arg2: memref<3x4x384xf32, #tpu.memory_space<vmem>>, %arg3: memref<16x128xf32, #tpu.memory_space<vmem>>, %arg4: memref<16x4xf32, #tpu.memory_space<vmem>>, %arg5: memref<16x352xf32, #tpu.memory_space<vmem>>) attributes {dimension_semantics = [#tpu.dimension_semantics<parallel>], iteration_bounds = array<i64: 1>, scalar_prefetch = 0 : i64, scratch_operands = 0 : i64, tpu.core_type = #tpu.core_type<tc>, window_params = [{pipeline_mode = #tpu.pipeline_mode<synchronous>, transform_indices = @transform_0, window_bounds = array<i64: 3, 128, 384>}, {pipeline_mode = #tpu.pipeline_mode<synchronous>, transform_indices = @transform_1, window_bounds = array<i64: 3, 4, 384>}, {transform_indices = @transform_2, window_bounds = array<i64: 16, 128>}, {transform_indices = @transform_3, window_bounds = array<i64: 16, 4>}, {transform_indices = @transform_4, window_bounds = array<i64: 16, 352>}]} {
    %c0 = arith.constant 0 : index
    %c0_0 = arith.constant 0 : index
    %0 = vector.load %arg3[%c0, %c0_0] : memref<16x128xf32, #tpu.memory_space<vmem>>, vector<16x128xf32>
    %c0_1 = arith.constant 0 : index
    %c0_2 = arith.constant 0 : index
    %1 = vector.load %arg4[%c0_1, %c0_2] : memref<16x4xf32, #tpu.memory_space<vmem>>, vector<16x4xf32>
    %c0_3 = arith.constant 0 : index
    %c0_4 = arith.constant 0 : index
    %c0_5 = arith.constant 0 : index
    %2 = vector.load %arg1[%c0_3, %c0_4, %c0_5] : memref<3x128x384xf32, #tpu.memory_space<vmem>>, vector<1x128x384xf32>
    %3 = vector.shape_cast %2 : vector<1x128x384xf32> to vector<128x384xf32>
    %cst = arith.constant dense<0.000000e+00> : vector<16x384xf32>
    %4 = tpu.matmul %0, %3, %cst {dimension_numbers = #tpu.dot_dimension_numbers<[1], [0], [0], [1], [0, 0, 1, 1], [], []>, precision = #tpu.contract_precision<fp32>} : vector<16x128xf32>, vector<128x384xf32>, vector<16x384xf32> -> vector<16x384xf32>
    %c0_6 = arith.constant 0 : index
    %c0_7 = arith.constant 0 : index
    %c0_8 = arith.constant 0 : index
    %5 = vector.load %arg2[%c0_6, %c0_7, %c0_8] : memref<3x4x384xf32, #tpu.memory_space<vmem>>, vector<1x4x384xf32>
    %6 = vector.shape_cast %5 : vector<1x4x384xf32> to vector<4x384xf32>
    %cst_9 = arith.constant dense<0.000000e+00> : vector<16x384xf32>
    %7 = tpu.matmul %1, %6, %cst_9 {dimension_numbers = #tpu.dot_dimension_numbers<[1], [0], [0], [1], [0, 0, 1, 1], [], []>, precision = #tpu.contract_precision<fp32>} : vector<16x4xf32>, vector<4x384xf32>, vector<16x384xf32> -> vector<16x384xf32>
    %8 = arith.mulf %4, %7 : vector<16x384xf32>
    %c1 = arith.constant 1 : index
    %c0_10 = arith.constant 0 : index
    %c0_11 = arith.constant 0 : index
    %9 = vector.load %arg1[%c1, %c0_10, %c0_11] : memref<3x128x384xf32, #tpu.memory_space<vmem>>, vector<1x128x384xf32>
    %10 = vector.shape_cast %9 : vector<1x128x384xf32> to vector<128x384xf32>
    %cst_12 = arith.constant dense<0.000000e+00> : vector<16x384xf32>
    %11 = tpu.matmul %0, %10, %cst_12 {dimension_numbers = #tpu.dot_dimension_numbers<[1], [0], [0], [1], [0, 0, 1, 1], [], []>, precision = #tpu.contract_precision<fp32>} : vector<16x128xf32>, vector<128x384xf32>, vector<16x384xf32> -> vector<16x384xf32>
    %c1_13 = arith.constant 1 : index
    %c0_14 = arith.constant 0 : index
    %c0_15 = arith.constant 0 : index
    %12 = vector.load %arg2[%c1_13, %c0_14, %c0_15] : memref<3x4x384xf32, #tpu.memory_space<vmem>>, vector<1x4x384xf32>
    %13 = vector.shape_cast %12 : vector<1x4x384xf32> to vector<4x384xf32>
    %cst_16 = arith.constant dense<0.000000e+00> : vector<16x384xf32>
    %14 = tpu.matmul %1, %13, %cst_16 {dimension_numbers = #tpu.dot_dimension_numbers<[1], [0], [0], [1], [0, 0, 1, 1], [], []>, precision = #tpu.contract_precision<fp32>} : vector<16x4xf32>, vector<4x384xf32>, vector<16x384xf32> -> vector<16x384xf32>
    %15 = arith.mulf %11, %14 : vector<16x384xf32>
    %16 = arith.addf %8, %15 : vector<16x384xf32>
    %c2 = arith.constant 2 : index
    %c0_17 = arith.constant 0 : index
    %c0_18 = arith.constant 0 : index
    %17 = vector.load %arg1[%c2, %c0_17, %c0_18] : memref<3x128x384xf32, #tpu.memory_space<vmem>>, vector<1x128x384xf32>
    %18 = vector.shape_cast %17 : vector<1x128x384xf32> to vector<128x384xf32>
    %cst_19 = arith.constant dense<0.000000e+00> : vector<16x384xf32>
    %19 = tpu.matmul %0, %18, %cst_19 {dimension_numbers = #tpu.dot_dimension_numbers<[1], [0], [0], [1], [0, 0, 1, 1], [], []>, precision = #tpu.contract_precision<fp32>} : vector<16x128xf32>, vector<128x384xf32>, vector<16x384xf32> -> vector<16x384xf32>
    %c2_20 = arith.constant 2 : index
    %c0_21 = arith.constant 0 : index
    %c0_22 = arith.constant 0 : index
    %20 = vector.load %arg2[%c2_20, %c0_21, %c0_22] : memref<3x4x384xf32, #tpu.memory_space<vmem>>, vector<1x4x384xf32>
    %21 = vector.shape_cast %20 : vector<1x4x384xf32> to vector<4x384xf32>
    %cst_23 = arith.constant dense<0.000000e+00> : vector<16x384xf32>
    %22 = tpu.matmul %1, %21, %cst_23 {dimension_numbers = #tpu.dot_dimension_numbers<[1], [0], [0], [1], [0, 0, 1, 1], [], []>, precision = #tpu.contract_precision<fp32>} : vector<16x4xf32>, vector<4x384xf32>, vector<16x384xf32> -> vector<16x384xf32>
    %23 = arith.mulf %19, %22 : vector<16x384xf32>
    %24 = arith.addf %16, %23 : vector<16x384xf32>
    %25 = vector.extract_strided_slice %24 {offsets = [0, 0], sizes = [16, 352], strides = [1, 1]} : vector<16x384xf32> to vector<16x352xf32>
    %c0_24 = arith.constant 0 : index
    %c0_25 = arith.constant 0 : index
    %26 = vector.load %arg5[%c0_24, %c0_25] : memref<16x352xf32, #tpu.memory_space<vmem>>, vector<16x352xf32>
    tpu.vector_store %arg5[%c0_24, %c0_25], %25 {strides = array<i32>} : memref<16x352xf32, #tpu.memory_space<vmem>>, vector<16x352xf32>,
    return
  }
  func.func @transform_0(%arg0: i32) -> (i32, i32, i32) {
    %c0_i32 = arith.constant 0 : i32
    %c0_i32_0 = arith.constant 0 : i32
    %c0_i32_1 = arith.constant 0 : i32
    %c0_i32_2 = arith.constant 0 : i32
    return %c0_i32, %c0_i32_0, %c0_i32_1 : i32, i32, i32
  }
  func.func @transform_1(%arg0: i32) -> (i32, i32, i32) {
    %c0_i32 = arith.constant 0 : i32
    %c0_i32_0 = arith.constant 0 : i32
    %c0_i32_1 = arith.constant 0 : i32
    %c0_i32_2 = arith.constant 0 : i32
    return %c0_i32, %c0_i32_0, %c0_i32_1 : i32, i32, i32
  }
  func.func @transform_2(%arg0: i32) -> (i32, i32) {
    %c0_i32 = arith.constant 0 : i32
    %c0_i32_0 = arith.constant 0 : i32
    return %arg0, %c0_i32 : i32, i32
  }
  func.func @transform_3(%arg0: i32) -> (i32, i32) {
    %c0_i32 = arith.constant 0 : i32
    %c0_i32_0 = arith.constant 0 : i32
    return %arg0, %c0_i32 : i32, i32
  }
  func.func @transform_4(%arg0: i32) -> (i32, i32) {
    %c0_i32 = arith.constant 0 : i32
    %c0_i32_0 = arith.constant 0 : i32
    return %arg0, %c0_i32 : i32, i32
  }
}

</mosaic_0001>

<bundles_post_ra>
// kernel: tpu_custom_call.1
= control target key start
LH: loop header
LB: loop body
LE: loop exit
PB: predicated region body
PF: predicated region fallthrough
CT: control target
= control target key end

     0   :  { %9 = vsyncpa [#allocation3], 0  ;;  %s13461_s0 = inlined_call_operand.hbm [shape: f32[3,128,384], index: 0, kind: input, shape index: {}]   ;;  %s13462_s1 = inlined_call_operand.hbm [shape: f32[3,4,384], index: 1, kind: input, shape index: {}]   ;;  %s13463_s2 = inlined_call_operand.hbm [shape: f32[16,128], index: 2, kind: input, shape index: {}]   ;;  %s13464_s3 = inlined_call_operand.hbm [shape: f32[16,4], index: 3, kind: input, shape index: {}]   ;;  %s13465_s4 = inlined_call_operand.hbm [shape: f32[16,352], index: 4, kind: output, shape index: {}]  }
   0x1   :  { %10 = vsyncpa [#allocation6], 0 }
   0x2   :  { %11 = vsyncpa [#allocation9], 0 }
   0x3   :  { %12 = vsyncpa [#allocation4], 0  ;;  %s10658_s15 = smov [#allocation5]   ;;  %s10540_s19 = scalar_lea.hbm %s13462_s1, 576 }
   0x4   :  { %s30_s16 = sshll.u32 %s10658_s15, 4  ;;  %p10541_p0 = scmp.ne.s32.totalorder %s13462_s1, %s10540_s19  ;;  %s31_s16 = int_to_ptr.vmem [resolvable:$true] %s30_s16 }
   0x5   :  { %p10544_p1 = scmp.lt.u32.totalorder %s10540_s19, %s13462_s1 }
   0x7   :  { %p10546_p2 = pnand %p10544_p1, %p10541_p0 }
   0x9   :  { %10549 = shalt.err (!%p10546_p2)
}
   0xa   :  { %s10550_s24 = scalar_lea.vmem %s31_s16, 576  ;;  %p10555_p4 = scmp.lt.s32.totalorder %s31_s16, %s31_s16 }
   0xb   :  { %p10551_p3 = scmp.ne.s32.totalorder %s31_s16, %s10550_s24  ;;  %p10556_p5 = scmp.lt.s32.totalorder %s10550_s24, %s10550_s24 }
   0xd   :  { %p10557_p6 = por %p10556_p5, %p10555_p4 }
   0xf   :  { %p10558_p7 = pnand %p10557_p6, %p10551_p3 }
  0x11   :  { %10561 = shalt.err (!%p10558_p7)
}
  0x12   :  { %s10659_s25 = smov 192   ;;  %s10660_s26 = smov 12  }
  0x13   :  { %36 = dma.hbm_to_vmem [thread:$0]  %s13462_s1, 576, %s31_s16, [#allocation6], %s10659_s25, %s10659_s25, %s10660_s26  }
  0x14   :  { %s10661_s29 = smov [#allocation2]   ;;  %s10562_s7 = scalar_lea.hbm %s13461_s0, 18432 }
  0x15   :  { %s18_s30 = sshll.u32 %s10661_s29, 4  ;;  %p10563_p8 = scmp.ne.s32.totalorder %s13461_s0, %s10562_s7  ;;  %s19_s30 = int_to_ptr.vmem [resolvable:$true] %s18_s30 }
  0x16   :  { %p10566_p9 = scmp.lt.u32.totalorder %s10562_s7, %s13461_s0 }
  0x18   :  { %p10568_p10 = pnand %p10566_p9, %p10563_p8 }
  0x1a   :  { %10571 = shalt.err (!%p10568_p10)
}
  0x1b   :  { %s10572_s12 = scalar_lea.vmem %s19_s30, 18432  ;;  %p10577_p12 = scmp.lt.s32.totalorder %s19_s30, %s19_s30 }
  0x1c   :  { %p10573_p11 = scmp.ne.s32.totalorder %s19_s30, %s10572_s12  ;;  %p10578_p13 = scmp.lt.s32.totalorder %s10572_s12, %s10572_s12 }
  0x1e   :  { %p10579_p0 = por %p10578_p13, %p10577_p12 }
  0x20   :  { %p10580_p1 = pnand %p10579_p0, %p10573_p11 }
  0x22   :  { %10583 = shalt.err (!%p10580_p1)
}
  0x23   :  { %s10662_s1 = smov 384   ;;  %s10663_s13 = smov 24  }
  0x24   :  { %24 = dma.hbm_to_vmem [thread:$0]  %s13461_s0, 18432, %s19_s30, [#allocation3], %s10662_s1, %s10662_s1, %s10663_s13  }
  0x25   :  { %s10664_s16 = smov [#allocation7]   ;;  %s10584_s20 = scalar_lea.hbm %s13463_s2, 256 }
  0x26   :  { %s42_s17 = sshll.u32 %s10664_s16, 4  ;;  %p10585_p2 = scmp.ne.s32.totalorder %s13463_s2, %s10584_s20  ;;  %s43_s17 = int_to_ptr.vmem [resolvable:$true] %s42_s17 }
  0x27   :  { %p10588_p3 = scmp.lt.u32.totalorder %s10584_s20, %s13463_s2 }
  0x29   :  { %p10590_p4 = pnand %p10588_p3, %p10585_p2 }
  0x2b   :  { %10593 = shalt.err (!%p10590_p4)
}
  0x2c   :  { %s10594_s25 = scalar_lea.vmem %s43_s17, 256  ;;  %p10599_p6 = scmp.lt.s32.totalorder %s43_s17, %s43_s17 }
  0x2d   :  { %p10595_p5 = scmp.ne.s32.totalorder %s43_s17, %s10594_s25  ;;  %p10600_p7 = scmp.lt.s32.totalorder %s10594_s25, %s10594_s25 }
  0x2f   :  { %p10601_p8 = por %p10600_p7, %p10599_p6 }
  0x31   :  { %p10602_p9 = pnand %p10601_p8, %p10595_p5 }
  0x33   :  { %10605 = shalt.err (!%p10602_p9)
}
  0x34   :  { %s10665_s0 = smov 128   ;;  %s10666_s26 = smov 8  }
  0x35   :  { %48 = dma.hbm_to_vmem [thread:$0]  %s13463_s2, 256, %s43_s17, [#allocation6], %s10665_s0, %s10665_s0, %s10666_s26  }
  0x36   :  { %s10667_s29 = smov [#allocation8]   ;;  %s10606_s7 = scalar_lea.hbm %s13464_s3, 256 }
  0x37   :  { %s54_s30 = sshll.u32 %s10667_s29, 4  ;;  %p10607_p10 = scmp.ne.s32.totalorder %s13464_s3, %s10606_s7  ;;  %s55_s30 = int_to_ptr.vmem [resolvable:$true] %s54_s30 }
  0x38   :  { %p10610_p11 = scmp.lt.u32.totalorder %s10606_s7, %s13464_s3 }
  0x3a   :  { %p10612_p12 = pnand %p10610_p11, %p10607_p10 }
  0x3c   :  { %10615 = shalt.err (!%p10612_p12)
}
  0x3d   :  { %s10616_s12 = scalar_lea.vmem %s55_s30, 256  ;;  %p10621_p0 = scmp.lt.s32.totalorder %s55_s30, %s55_s30 }
  0x3e   :  { %p10617_p13 = scmp.ne.s32.totalorder %s55_s30, %s10616_s12  ;;  %p10622_p1 = scmp.lt.s32.totalorder %s10616_s12, %s10616_s12 }
  0x40   :  { %p10623_p2 = por %p10622_p1, %p10621_p0 }
  0x42   :  { %p10624_p3 = pnand %p10623_p2, %p10617_p13 }
  0x44   :  { %10627 = shalt.err (!%p10624_p3)
}
  0x45   :  { %60 = dma.hbm_to_vmem [thread:$0]  %s13464_s3, 256, %s55_s30, [#allocation9], %s10665_s0, %s10665_s0, %s10666_s26  }
  0x46   :  { %10650 = dma.done.wait [#allocation3], 18432  }
  0x47   :  { %10651 = vsyncadd [#allocation3], 4294948864 }
  0x48   :  { %10652 = dma.done.wait [#allocation6], 832  }
  0x49   :  { %10653 = vsyncadd [#allocation6], 4294966464 }
  0x4a   :  { %10654 = dma.done.wait [#allocation9], 256  }
  0x4b   :  { %10655 = vsyncadd [#allocation9], 4294967040  ;;  %v13470_v0 = vmov 0.0   ;;  %v78_v1 = vld [vmem:[#allocation2 + $0x8] sm:$0xff]  ;;  %v81_v2 = vld [vmem:[#allocation2 + $0x20] sm:$0xff]  ;;  %vm1725_vm0 = vcmask 1043456  }
  0x4c   :  { %221 = vmatprep.mubr.f32.mxu0 %v13470_v0  ;;  %v10747_v3 = vld [vmem:[#allocation2 + $0x10] sm:$0xff]  ;;  %v125_v4 = vand.u32 4294901760, %v78_v1  ;;  %v129_v5 = vand.u32 4294901760, %v81_v2  ;;  %v10749_v6 = vld [vmem:[#allocation2 + $0x28] sm:$0xff]  ;;  %v77_v8 = vld [vmem:[#allocation2] sm:$0xff]  ;;  %vm1718_vm1 = vcmask 31744  }
  0x4d   :  { %v13475_v7 = vand.u32 4294901760, %v10747_v3  ;;  %v80_v9 = vld [vmem:[#allocation2 + $0x18] sm:$0xff]  ;;  %v13474_v10 = vand.u32 4294901760, %v10749_v6  ;;  %v127_v11 = vand.u32 4294901760, %v77_v8  ;;  %v87_v14 = vld [vmem:[#allocation2 + $0x50] sm:$0xff]  ;;  %v10753_v15 = vld [vmem:[#allocation2 + $0x40] sm:$0xff] }
  0x4e   :  { %v131_v12 = vand.u32 4294901760, %v80_v9  ;;  %v84_v13 = vld [vmem:[#allocation2 + $0x38] sm:$0xff]  ;;  %v10755_v16 = vpack.c.bf16 %v129_v5, %v125_v4  ;;  %v10757_v17 = vsub.f32 %v78_v1, %v125_v4  ;;  %v10759_v18 = vsub.f32 %v81_v2, %v129_v5  ;;  %v83_v21 = vld [vmem:[#allocation2 + $0x30] sm:$0xff]  ;;  %v86_v22 = vld [vmem:[#allocation2 + $0x48] sm:$0xff]  ;;  %s10669_s3 = smov [#allocation10]  }
  0x4f   :  { %v133_v19 = vand.u32 4294901760, %v84_v13  ;;  %v10761_v20 = vld [vmem:[#allocation2 + $0x58] sm:$0xff]  ;;  %v10767_v23 = vpack.c.bf16 %v13474_v10, %v13475_v7  ;;  %v10771_v25 = vsub.f32 %v77_v8, %v127_v11  ;;  %v90_v27 = vld [vmem:[#allocation2 + $0x68] sm:$0xff]  ;;  %v93_v28 = vld [vmem:[#allocation2 + $0x80] sm:$0xff]  ;;  %v137_v30 = vand.u32 4294901760, %v87_v14  ;;  %s8081_s15 = sshll.u32 %s10669_s3, 4  ;;  %s8082_s15 = int_to_ptr.vmem [resolvable:$true] %s8081_s15 }
  0x50   :  { %13841 = vst [vmem:[#allocation15_spill] sm:$0xff] %v10755_v16  ;;  %13842 = vst [vmem:[#allocation16_spill] sm:$0xff] %v10759_v18  ;;  %v10769_v24 = vpack.c.bf16 %v131_v12, %v127_v11  ;;  %v10773_v26 = vsub.f32 %v80_v9, %v131_v12  ;;  %v10775_v29 = vld [vmem:[#allocation2 + $0x70] sm:$0xff]  ;;  %9194 = vmatprep.subr.bf16.mxu0 %v10755_v16  ;;  %v13473_v32 = vand.u32 4294901760, %v10753_v15  ;;  %v13472_v33 = vand.u32 4294901760, %v10761_v20  ;;  %v10782_v34 = vld [vmem:[#allocation2 + $0x88] sm:$0xff]  ;;  %p10633_p5 = scmp.lt.s32.totalorder %s8082_s15, %s8082_s15 }
  0x51   :  { %13843 = vst [vmem:[#allocation17_spill] sm:$0xff] %v10767_v23  ;;  %13845 = vst [vmem:[#allocation19_spill] sm:$0xff] %v10771_v25  ;;  %v10778_v31 = vsub.f32 %v84_v13, %v133_v19  ;;  %9386 = vmatprep.subr.bf16.mxu1 %v10767_v23  ;;  %v135_v35 = vand.u32 4294901760, %v83_v21  ;;  %v139_v36 = vand.u32 4294901760, %v86_v22  ;;  %v141_v37 = vand.u32 4294901760, %v90_v27  ;;  %v89_v39 = vld [vmem:[#allocation2 + $0x60] sm:$0xff] }
  0x52   :  { %13844 = vst [vmem:[#allocation18_spill] sm:$0xff] %v10769_v24  ;;  %9196 = vmatpush1.bf16.msra.mxu0 %v10769_v24  ;;  %v145_v38 = vand.u32 4294901760, %v93_v28  ;;  %v92_v40 = vld [vmem:[#allocation2 + $0x78] sm:$0xff]  ;;  %9388 = vmatpush3.bf16.msra.mxu1 %v10767_v23  ;;  %v10787_v41 = vpack.c.bf16 %v137_v30, %v133_v19  ;;  %v10789_v42 = vsub.f32 %v87_v14, %v137_v30  ;;  %v13469_v44 = vand.u32 4294901760, %v10775_v29  ;;  %v99_v46 = vld [vmem:[#allocation2 + $0xb0] sm:$0xff]  ;;  %v10798_v47 = vld [vmem:[#allocation2 + $0xa0] sm:$0xff] }
  0x53   :  { %v10795_v43 = vpack.c.bf16 %v13472_v33, %v13473_v32  ;;  %v96_v45 = vld [vmem:[#allocation2 + $0x98] sm:$0xff]  ;;  %v10800_v48 = vpack.c.bf16 %v139_v36, %v135_v35  ;;  %v10802_v49 = vsub.f32 %v83_v21, %v135_v35  ;;  %v10804_v50 = vsub.f32 %v86_v22, %v139_v36  ;;  %v95_v53 = vld [vmem:[#allocation2 + $0x90] sm:$0xff]  ;;  %v98_v62 = vld [vmem:[#allocation2 + $0xa8] sm:$0xff]  ;;  %s10628_s16 = scalar_lea.vmem %s8082_s15, 768 }
  0x54   :  { %13846 = vst [vmem:[#allocation20_spill] sm:$0xff] %v10787_v41  ;;  %v10806_v51 = vpack.c.bf16 %v145_v38, %v141_v37  ;;  %v10808_v52 = vld [vmem:[#allocation2 + $0xb8] sm:$0xff]  ;;  %9198 = vmatprep.subr.bf16.mxu0 %v10787_v41  ;;  %v10812_v54 = vsub.f32 %v90_v27, %v141_v37  ;;  %v10814_v55 = vsub.f32 %v93_v28, %v145_v38  ;;  %v13468_v56 = vand.u32 4294901760, %v10782_v34  ;;  %v102_v63 = vld [vmem:[#allocation2 + $0xc8] sm:$0xff]  ;;  %v105_v8 = vld [vmem:[#allocation2 + $0xe0] sm:$0xff]  ;;  %p10629_p4 = scmp.ne.s32.totalorder %s8082_s15, %s10628_s16  ;;  %p10634_p6 = scmp.lt.s32.totalorder %s10628_s16, %s10628_s16 }
  0x55   :  { %13847 = vst [vmem:[#allocation21_spill] sm:$0xff] %v10795_v43  ;;  %13848 = vst [vmem:[#allocation22_spill] sm:$0xff] %v10800_v48  ;;  %9390 = vmatprep.subr.bf16.mxu1 %v10795_v43  ;;  %v143_v57 = vand.u32 4294901760, %v89_v39  ;;  %v147_v58 = vand.u32 4294901760, %v92_v40  ;;  %v149_v59 = vand.u32 4294901760, %v96_v45  ;;  %v153_v60 = vand.u32 4294901760, %v99_v46 }
  0x56   :  { %13849 = vst [vmem:[#allocation23_spill] sm:$0xff] %v10806_v51  ;;  %9200 = vmatpush1.bf16.msra.mxu0 %v10800_v48  ;;  %v13467_v61 = vand.u32 4294901760, %v10798_v47  ;;  %9392 = vmatpush3.bf16.msra.mxu1 %v10795_v43  ;;  %v10825_v1 = vpack.c.bf16 %v13468_v56, %v13469_v44  ;;  %v13466_v4 = vand.u32 4294901760, %v10808_v52  ;;  %v151_v5 = vand.u32 4294901760, %v95_v53  ;;  %v10830_v9 = vld [vmem:[#allocation2 + $0xd0] sm:$0xff]  ;;  %v10832_v11 = vld [vmem:[#allocation2 + $0xe8] sm:$0xff]  ;;  %p10635_p7 = por %p10634_p6, %p10633_p5 }
  0x57   :  { %9202 = vmatprep.subr.bf16.mxu0 %v10806_v51  ;;  %v10827_v2 = vsub.f32 %v89_v39, %v143_v57  ;;  %v10834_v12 = vpack.c.bf16 %v147_v58, %v143_v57  ;;  %v10836_v13 = vsub.f32 %v92_v40, %v147_v58  ;;  %v10838_v14 = vpack.c.bf16 %v153_v60, %v149_v59  ;;  %v101_v21 = vld [vmem:[#allocation2 + $0xc0] sm:$0xff]  ;;  %v104_v22 = vld [vmem:[#allocation2 + $0xd8] sm:$0xff]  ;;  %v123_v51 = vld [vmem:[#allocation2 + $0x170] sm:$0xff] }
  0x58   :  { %13850 = vst [vmem:[#allocation24_spill] sm:$0xff] %v10825_v1  ;;  %v10840_v19 = vsub.f32 %v96_v45, %v149_v59  ;;  %9394 = vmatprep.subr.bf16.mxu1 %v10825_v1  ;;  %v10843_v27 = vsub.f32 %v99_v46, %v153_v60  ;;  %v10849_v28 = vpack.c.bf16 %v13466_v4, %v13467_v61  ;;  %v155_v30 = vand.u32 4294901760, %v98_v62  ;;  %v108_v40 = vld [vmem:[#allocation2 + $0xf8] sm:$0xff]  ;;  %v111_v45 = vld [vmem:[#allocation2 + $0x110] sm:$0xff]  ;;  %v10862_v59 = vld [vmem:[#allocation2 + $0x100] sm:$0xff]  ;;  %p10636_p8 = pnand %p10635_p7, %p10629_p4 }
  0x59   :  { %13851 = vst [vmem:[#allocation25_spill] sm:$0xff] %v10834_v12  ;;  %13852 = vst [vmem:[#allocation26_spill] sm:$0xff] %v10838_v14  ;;  %v10851_v35 = vsub.f32 %v95_v53, %v151_v5  ;;  %v157_v36 = vand.u32 4294901760, %v102_v63  ;;  %v161_v37 = vand.u32 4294901760, %v105_v8  ;;  %v13477_v38 = vand.u32 4294901760, %v10830_v9  ;;  %v10864_v60 = vld [vmem:[#allocation2 + $0x118] sm:$0xff] }
  0x5a   :  { %13853 = vst [vmem:[#allocation27_spill] sm:$0xff] %v10849_v28  ;;  %9204 = vmatpush1.bf16.msra.mxu0 %v10834_v12  ;;  %v13476_v39 = vand.u32 4294901760, %v10832_v11  ;;  %9396 = vmatpush3.bf16.msra.mxu1 %v10825_v1  ;;  %v10858_v46 = vpack.c.bf16 %v155_v30, %v151_v5  ;;  %v10860_v57 = vsub.f32 %v98_v62, %v155_v30  ;;  %v159_v53 = vand.u32 4294901760, %v101_v21  ;;  %v107_v4 = vld [vmem:[#allocation2 + $0xf0] sm:$0xff]  ;;  %v110_v5 = vld [vmem:[#allocation2 + $0x108] sm:$0xff]  ;;  %v117_v0 = vld [vmem:[#allocation2 + $0x140] sm:$0xff] }
  0x5b   :  { %9206 = vmatprep.subr.bf16.mxu0 %v10838_v14  ;;  %v163_v58 = vand.u32 4294901760, %v104_v22  ;;  %9398 = vmatprep.subr.bf16.mxu1 %v10849_v28  ;;  %v10867_v61 = vpack.c.bf16 %v161_v37, %v157_v36  ;;  %v10869_v56 = vsub.f32 %v102_v63, %v157_v36  ;;  %v10871_v44 = vsub.f32 %v105_v8, %v161_v37  ;;  %v114_v30 = vld [vmem:[#allocation2 + $0x128] sm:$0xff]  ;;  %v116_v14 = vld [vmem:[#allocation2 + $0x138] sm:$0xff]  ;;  %v10909_v48 = vld [vmem:[#allocation2 + $0x160] sm:$0xff] }
  0x5c   :  { %13854 = vst [vmem:[#allocation28_spill] sm:$0xff] %v10858_v46  ;;  %v10877_v62 = vpack.c.bf16 %v13476_v39, %v13477_v38  ;;  %v10881_v32 = vsub.f32 %v101_v21, %v159_v53  ;;  %v165_v7 = vand.u32 4294901760, %v108_v40  ;;  %v169_v63 = vand.u32 4294901760, %v111_v45  ;;  %v10888_v39 = vld [vmem:[#allocation2 + $0x130] sm:$0xff]  ;;  %v120_v1 = vld [vmem:[#allocation2 + $0x158] sm:$0xff] }
  0x5d   :  { %13855 = vst [vmem:[#allocation29_spill] sm:$0xff] %v10867_v61  ;;  %v10879_v33 = vpack.c.bf16 %v163_v58, %v159_v53  ;;  %v10883_v10 = vsub.f32 %v104_v22, %v163_v58  ;;  %v167_v37 = vand.u32 4294901760, %v107_v4  ;;  %13858 = vst [vmem:[#allocation32_spill] sm:$0xff] %v10888_v39  ;;  %v171_v21 = vand.u32 4294901760, %v110_v5  ;;  %v10894_v58 = vld [vmem:[#allocation2 + $0x148] sm:$0xff]  ;;  %v119_v24 = vld [vmem:[#allocation2 + $0x150] sm:$0xff] }
  0x5e   :  { %13856 = vst [vmem:[#allocation30_spill] sm:$0xff] %v10877_v62  ;;  %9208 = vmatpush1.bf16.msra.mxu0 %v10858_v46  ;;  %9400 = vmatpush3.bf16.msra.mxu1 %v10849_v28  ;;  %v10892_v38 = vsub.f32 %v108_v40, %v165_v7  ;;  %v173_v22 = vand.u32 4294901760, %v114_v30  ;;  %v177_v53 = vand.u32 4294901760, %v117_v0  ;;  %v113_v46 = vld [vmem:[#allocation2 + $0x120] sm:$0xff]  ;;  %v10897_v8 = vpack.c.bf16 %v169_v63, %v165_v7 }
  0x5f   :  { %13857 = vst [vmem:[#allocation31_spill] sm:$0xff] %v10879_v33  ;;  %9210 = vmatprep.subr.bf16.mxu0 %v10867_v61  ;;  %9402 = vmatprep.subr.bf16.mxu1 %v10877_v62  ;;  %v10899_v36 = vsub.f32 %v111_v45, %v169_v63  ;;  %v13860_v12 = vand.u32 4294901760, %v10862_v59  ;;  %v13861_v28 = vand.u32 4294901760, %v10864_v60  ;;  %v10907_v40 = vsub.f32 %v107_v4, %v167_v37  ;;  %v10919_v63 = vld [vmem:[#allocation2 + $0x178] sm:$0xff] }
  0x60   :  { %13859 = vst [vmem:[#allocation33_spill] sm:$0xff] %v10897_v8  ;;  %v10911_v43 = vpack.c.bf16 %v171_v21, %v167_v37  ;;  %v10913_v41 = vsub.f32 %v110_v5, %v171_v21  ;;  %v10915_v7 = vpack.c.bf16 %v177_v53, %v173_v22  ;;  %v10917_v45 = vsub.f32 %v114_v30, %v173_v22  ;;  %v122_v22 = vld [vmem:[#allocation2 + $0x168] sm:$0xff] }
  0x61   :  { %v10905_v61 = vpack.c.bf16 %v13861_v28, %v13860_v12  ;;  %13863 = vst [vmem:[#allocation35_spill] sm:$0xff] %v10907_v40  ;;  %v10922_v12 = vsub.f32 %v117_v0, %v177_v53  ;;  %v13515_v4 = vand.u32 4294901760, %v10888_v39  ;;  %v13514_v28 = vand.u32 4294901760, %v10894_v58 }
  0x62   :  { %13864 = vst [vmem:[#allocation36_spill] sm:$0xff] %v10911_v43  ;;  %13865 = vst [vmem:[#allocation37_spill] sm:$0xff] %v10913_v41  ;;  %9212 = vmatpush1.bf16.msra.mxu0 %v10879_v33  ;;  %v175_v23 = vand.u32 4294901760, %v113_v46  ;;  %9404 = vmatpush3.bf16.msra.mxu1 %v10877_v62  ;;  %v179_v5 = vand.u32 4294901760, %v116_v14  ;;  %v181_v37 = vand.u32 4294901760, %v120_v1  ;;  %v185_v30 = vand.u32 4294901760, %v123_v51 }
  0x63   :  { %13862 = vst [vmem:[#allocation34_spill] sm:$0xff] %v10905_v61  ;;  %13866 = vst [vmem:[#allocation38_spill] sm:$0xff] %v10915_v7  ;;  %9214 = vmatprep.subr.bf16.mxu0 %v10897_v8  ;;  %9406 = vmatprep.subr.bf16.mxu1 %v10905_v61  ;;  %v10934_v0 = vpack.c.bf16 %v13514_v28, %v13515_v4  ;;  %v13517_v33 = vand.u32 4294901760, %v10919_v63  ;;  %v183_v62 = vand.u32 4294901760, %v119_v24  ;;  %v73_v8 = vld [vmem:[#allocation7] sm:$0xff]  ;;  %v13873_v28 = vand.u32 4294901760, %v10909_v48 }
  0x64   :  { %13867 = vst [vmem:[#allocation39_spill] sm:$0xff] %v10917_v45  ;;  %13868 = vst [vmem:[#allocation40_spill] sm:$0xff] %v10922_v12  ;;  %v10936_v53 = vsub.f32 %v113_v46, %v175_v23  ;;  %v10939_v16 = vpack.c.bf16 %v179_v5, %v175_v23  ;;  %v10941_v12 = vsub.f32 %v116_v14, %v179_v5  ;;  %v187_v4 = vand.u32 4294901760, %v122_v22 }
  0x65   :  { %13869 = vst [vmem:[#allocation41_spill] sm:$0xff] %v10934_v0  ;;  %v10943_v21 = vpack.c.bf16 %v185_v30, %v181_v37  ;;  %v10945_v45 = vsub.f32 %v120_v1, %v181_v37  ;;  %v10948_v39 = vsub.f32 %v123_v51, %v185_v30  ;;  %v10954_v46 = vpack.c.bf16 %v13517_v33, %v13873_v28  ;;  %v74_v28 = vld [vmem:[#allocation7 + $0x8] sm:$0xff] }
  0x66   :  { %13870 = vst [vmem:[#allocation42_spill] sm:$0xff] %v10936_v53  ;;  %13871 = vst [vmem:[#allocation43_spill] sm:$0xff] %v10939_v16  ;;  %9216 = vmatpush1.bf16.msra.mxu0 %v10911_v43  ;;  %v10956_v53 = vsub.f32 %v119_v24, %v183_v62  ;;  %9408 = vmatpush3.bf16.msra.mxu1 %v10905_v61  ;;  %v13520_v23 = vand.u32 4294901760, %v10757_v17  ;;  %v10962_v14 = vand.u32 4294901760, %v73_v8  ;;  %v13877_v51 = vand.u32 4294901760, %v10747_v3 }
  0x67   :  { %13872 = vst [vmem:[#allocation44_spill] sm:$0xff] %v10943_v21  ;;  %13874 = vst [vmem:[#allocation45_spill] sm:$0xff] %v10954_v46  ;;  %9218 = vmatprep.subr.bf16.mxu0 %v10915_v7  ;;  %9410 = vmatprep.subr.bf16.mxu1 %v10934_v0  ;;  %v10970_v24 = vpack.c.bf16 %v187_v4, %v183_v62  ;;  %v10972_v37 = vsub.f32 %v122_v22, %v187_v4  ;;  %v13880_v30 = vand.u32 4294901760, %v10749_v6  ;;  %vm8071_vm2 = vcmask 785408  }
  0x68   :  { %13875 = vst [vmem:[#allocation46_spill] sm:$0xff] %v10956_v53  ;;  %13876 = vst [vmem:[#allocation47_spill] sm:$0xff] %v10962_v14  ;;  %v10967_v5 = vsub.f32 %v10747_v3, %v13877_v51  ;;  %v13523_v1 = vand.u32 4294901760, %v10771_v25  ;;  %v247_v7 = vsub.f32 %v10757_v17, %v13520_v23  ;;  %v13881_v3 = vand.u32 4294901760, %v10759_v18 }
  0x69   :  { %13879 = vst [vmem:[#allocation49_spill] sm:$0xff] %v10970_v24  ;;  %v10977_v33 = vsub.f32 %v10749_v6, %v13880_v30  ;;  %v10987_v62 = vsub.f32 %v73_v8, %v10962_v14  ;;  %v10996_v23 = vand.u32 4294901760, %v74_v28 }
  0x6a   :  { %13878 = vst [vmem:[#allocation48_spill] sm:$0xff] %v10967_v5  ;;  %v259_v51 = vsub.f32 %v10759_v18, %v13881_v3  ;;  %9220 = vmatpush1.bf16.msra.mxu0 %v10939_v16  ;;  %v253_v22 = vsub.f32 %v10771_v25, %v13523_v1  ;;  %9412 = vmatpush3.bf16.msra.mxu1 %v10934_v0  ;;  %v248_v8 = vand.u32 4294901760, %v247_v7  ;;  %v13885_v16 = vand.u32 4294901760, %v10967_v5 }
  0x6b   :  { %13882 = vst [vmem:[#allocation50_spill] sm:$0xff] %v10987_v62  ;;  %13883 = vst [vmem:[#allocation51_spill] sm:$0xff] %v10996_v23  ;;  %9222 = vmatprep.subr.bf16.mxu0 %v10943_v21  ;;  %v11001_v4 = vand.u32 4294901760, %v10987_v62  ;;  %9414 = vmatprep.subr.bf16.mxu1 %v10954_v46  ;;  %v13886_v1 = vand.u32 4294901760, %v10977_v33  ;;  %v13887_v0 = vand.u32 4294901760, %v10773_v26  ;;  %v11014_v7 = vsub.f32 %v74_v28, %v10996_v23 }
  0x6c   :  { %v260_v3 = vand.u32 4294901760, %v259_v51  ;;  %v1134_v6 = vsub.f32 %v10967_v5, %v13885_v16  ;;  %v254_v43 = vand.u32 4294901760, %v253_v22  ;;  %v13540_v16 = vand.u32 4294901760, %v10778_v31 }
  0x6d   :  { %13884 = vst [vmem:[#allocation52_spill] sm:$0xff] %v11001_v4  ;;  %v1141_v30 = vsub.f32 %v10977_v33, %v13886_v1  ;;  %v265_v21 = vsub.f32 %v10773_v26, %v13887_v0  ;;  %13888 = vst [vmem:[#allocation53_spill] sm:$0xff] %v11014_v7  ;;  %v225_v61 = vsub.f32 %v10987_v62, %v11001_v4  ;;  %v11021_v1 = vand.u32 4294901760, %v11014_v7 }
  0x6e   :  { %v9225_v51 = vpack.c.bf16 %v260_v3, %v248_v8  ;;  %v1135_v25 = vand.u32 4294901760, %v1134_v6  ;;  %9224 = vmatpush1.bf16.msra.mxu0 %v10970_v24  ;;  %9416 = vmatpush3.bf16.msra.mxu1 %v10954_v46  ;;  %v271_v28 = vsub.f32 %v10778_v31, %v13540_v16  ;;  %v13891_v6 = vand.u32 4294901760, %v10753_v15 }
  0x6f   :  { %v1142_v5 = vand.u32 4294901760, %v1141_v30  ;;  %v266_v18 = vand.u32 4294901760, %v265_v21  ;;  %13889 = vst [vmem:[#allocation54_spill] sm:$0xff] %v11021_v1  ;;  %v11025_v0 = vand.u32 4294901760, %v225_v61  ;;  %v13892_v21 = vand.u32 4294901760, %v10761_v20 }
  0x70   :  { %9226 = vmatprep.subr.bf16.mxu0 %v9225_v51  ;;  %v11033_v8 = vsub.f32 %v10753_v15, %v13891_v6  ;;  %v236_v61 = vsub.f32 %v11014_v7, %v11021_v1  ;;  %v13893_v51 = vand.u32 4294901760, %v10789_v42  ;;  %v272_v15 = vand.u32 4294901760, %v271_v28 }
  0x71   :  { %13890 = vst [vmem:[#allocation55_spill] sm:$0xff] %v11025_v0  ;;  %v11038_v30 = vsub.f32 %v10761_v20, %v13892_v21  ;;  %v9417_v3 = vpack.c.bf16 %v1142_v5, %v1135_v25  ;;  %v9227_v22 = vpack.c.bf16 %v266_v18, %v254_v43  ;;  %8505 = vmatprep.mubr.f32.mxu1 %v11025_v0  ;;  %v13547_v20 = vand.u32 4294901760, %v10802_v49 }
  0x72   :  { %v283_v24 = vsub.f32 %v10789_v42, %v13893_v51  ;;  %227 = vmatmul.mubr.f32.vlgmr.msra.gmra.mrb[0].mxu0 %v11025_v0  ;;  %v13541_v6 = vand.u32 4294901760, %v11033_v8  ;;  %v11050_v18 = vand.u32 4294901760, %v236_v61  ;;  %v13552_v43 = vand.u32 4294901760, %v10804_v50 }
  0x73   :  { %v13544_v16 = vand.u32 4294901760, %v11038_v30  ;;  %9418 = vmatprep.subr.bf16.mxu1 %v9417_v3  ;;  %9228 = vmatpush1.bf16.msra.mxu0 %v9227_v22  ;;  %v277_v51 = vsub.f32 %v10802_v49, %v13547_v20  ;;  %v13895_v61 = vmov 0.0   ;;  %v13898_v4 = vand.u32 4294901760, %v10814_v55 }
  0x74   :  { %13894 = vst [vmem:[#allocation56_spill] sm:$0xff] %v11050_v18  ;;  %v284_v25 = vand.u32 4294901760, %v283_v24  ;;  %v1148_v21 = vsub.f32 %v11033_v8, %v13541_v6  ;;  %232 = vmatprep.mubr.f32.mxu0 %v13895_v61  ;;  %8506 = vmatmul.mubr.f32.vlgmr.msra.gmra.mrb[0].mxu1 %v11050_v18  ;;  %v289_v5 = vsub.f32 %v10804_v50, %v13552_v43  ;;  %v13896_v6 = vand.u32 4294901760, %v10812_v54 }
  0x75   :  { %v1155_v28 = vsub.f32 %v11038_v30, %v13544_v16  ;;  %v13897_v16 = vand.u32 4294901760, %v10775_v29  ;;  %9420 = vmatpush3.bf16.msra.mxu1 %v9417_v3  ;;  %v278_v46 = vand.u32 4294901760, %v277_v51  ;;  %v13899_v7 = vand.u32 4294901760, %v10782_v34  ;;  %8540 = vmatprep.mubr.f32.mxu1 %v10962_v14 }
  0x76   :  { %v9229_v24 = vpack.c.bf16 %v284_v25, %v272_v15  ;;  %v295_v0 = vsub.f32 %v10812_v54, %v13896_v6  ;;  %v1149_v20 = vand.u32 4294901760, %v1148_v21  ;;  %v307_v15 = vsub.f32 %v10814_v55, %v13898_v4  ;;  %238 = vmatmul.mubr.f32.gmra.mrb[2].mxu0 %v11050_v18 }
  0x77   :  { %v11075_v1 = vsub.f32 %v10775_v29, %v13897_v16  ;;  %v1156_v22 = vand.u32 4294901760, %v1155_v28  ;;  %v290_v25 = vand.u32 4294901760, %v289_v5  ;;  %v11085_v29 = vsub.f32 %v10782_v34, %v13899_v7  ;;  %468 = vmatprep.mubr.f32.mxu0 %v13895_v61 }
  0x78   :  { %9230 = vmatprep.subr.bf16.mxu0 %v9229_v24  ;;  %v296_v43 = vand.u32 4294901760, %v295_v0  ;;  %v308_v3 = vand.u32 4294901760, %v307_v15  ;;  %v13556_v21 = vand.u32 4294901760, %v10827_v2  ;;  %v13555_v4 = vand.u32 4294901760, %v10836_v13 }
  0x79   :  { %v13559_v6 = vand.u32 4294901760, %v11075_v1  ;;  %v9421_v16 = vpack.c.bf16 %v1156_v22, %v1149_v20  ;;  %v9231_v28 = vpack.c.bf16 %v290_v25, %v278_v46  ;;  %v13557_v5 = vand.u32 4294901760, %v11085_v29 }
  0x7a   :  { %v13558_v34 = vand.u32 4294901760, %v10840_v19  ;;  %v9233_v7 = vpack.c.bf16 %v308_v3, %v296_v43  ;;  %v301_v20 = vsub.f32 %v10827_v2, %v13556_v21  ;;  %v313_v51 = vsub.f32 %v10836_v13, %v13555_v4 }
  0x7b   :  { %v1162_v0 = vsub.f32 %v11075_v1, %v13559_v6  ;;  %9422 = vmatprep.subr.bf16.mxu1 %v9421_v16  ;;  %v13560_v46 = vand.u32 4294901760, %v10843_v27  ;;  %9232 = vmatpush1.bf16.msra.mxu0 %v9231_v28  ;;  %v1169_v24 = vsub.f32 %v11085_v29, %v13557_v5  ;;  %v13900_v15 = vand.u32 4294901760, %v10798_v47 }
  0x7c   :  { %9424 = vmatpush3.bf16.msra.mxu1 %v9421_v16  ;;  %v319_v43 = vsub.f32 %v10840_v19, %v13558_v34  ;;  %9234 = vmatprep.subr.bf16.mxu0 %v9233_v7  ;;  %v302_v3 = vand.u32 4294901760, %v301_v20  ;;  %v314_v4 = vand.u32 4294901760, %v313_v51  ;;  %v13901_v28 = vand.u32 4294901760, %v10808_v52 }
  0x7d   :  { %v1163_v22 = vand.u32 4294901760, %v1162_v0  ;;  %v11112_v25 = vsub.f32 %v10798_v47, %v13900_v15  ;;  %v331_v16 = vsub.f32 %v10843_v27, %v13560_v46  ;;  %v1170_v21 = vand.u32 4294901760, %v1169_v24 }
  0x7e   :  { %v11120_v0 = vsub.f32 %v10808_v52, %v13901_v28  ;;  %v320_v5 = vand.u32 4294901760, %v319_v43  ;;  %v13561_v6 = vand.u32 4294901760, %v10851_v35  ;;  %v9235_v47 = vpack.c.bf16 %v314_v4, %v302_v3 }
  0x7f   :  { %v13565_v34 = vand.u32 4294901760, %v11112_v25  ;;  %v332_v15 = vand.u32 4294901760, %v331_v16  ;;  %v13562_v20 = vand.u32 4294901760, %v10860_v57  ;;  %v9425_v51 = vpack.c.bf16 %v1170_v21, %v1163_v22 }
  0x80   :  { %v13563_v7 = vand.u32 4294901760, %v11120_v0  ;;  %v325_v52 = vsub.f32 %v10851_v35, %v13561_v6  ;;  %v13564_v24 = vand.u32 4294901760, %v10869_v56  ;;  %9236 = vmatpush1.bf16.msra.mxu0 %v9235_v47  ;;  %v13570_v22 = vand.u32 4294901760, %v10871_v44 }
  0x81   :  { %v1176_v46 = vsub.f32 %v11112_v25, %v13565_v34  ;;  %v9237_v43 = vpack.c.bf16 %v332_v15, %v320_v5  ;;  %v337_v21 = vsub.f32 %v10860_v57, %v13562_v20  ;;  %9426 = vmatprep.subr.bf16.mxu1 %v9425_v51  ;;  %v13902_v47 = vand.u32 4294901760, %v10830_v9 }
  0x82   :  { %v1183_v4 = vsub.f32 %v11120_v0, %v13563_v7  ;;  %v326_v16 = vand.u32 4294901760, %v325_v52  ;;  %v343_v28 = vsub.f32 %v10869_v56, %v13564_v24  ;;  %9428 = vmatpush3.bf16.msra.mxu1 %v9425_v51  ;;  %v355_v20 = vsub.f32 %v10871_v44, %v13570_v22 }
  0x83   :  { %v1177_v3 = vand.u32 4294901760, %v1176_v46  ;;  %v11146_v5 = vsub.f32 %v10830_v9, %v13902_v47  ;;  %9238 = vmatprep.subr.bf16.mxu0 %v9237_v43  ;;  %v338_v6 = vand.u32 4294901760, %v337_v21  ;;  %v13903_v46 = vand.u32 4294901760, %v10832_v11 }
  0x84   :  { %v1184_v15 = vand.u32 4294901760, %v1183_v4  ;;  %v344_v7 = vand.u32 4294901760, %v343_v28  ;;  %v13566_v34 = vand.u32 4294901760, %v10881_v32  ;;  %v13568_v9 = vand.u32 4294901760, %v10883_v10 }
  0x85   :  { %v11154_v52 = vsub.f32 %v10832_v11, %v13903_v46  ;;  %v13567_v24 = vand.u32 4294901760, %v11146_v5  ;;  %v9239_v43 = vpack.c.bf16 %v338_v6, %v326_v16  ;;  %v356_v4 = vand.u32 4294901760, %v355_v20 }
  0x86   :  { %v9429_v51 = vpack.c.bf16 %v1184_v15, %v1177_v3  ;;  %v349_v11 = vsub.f32 %v10881_v32, %v13566_v34  ;;  %v361_v28 = vsub.f32 %v10883_v10, %v13568_v9  ;;  %v13573_v46 = vand.u32 4294901760, %v10892_v38 }
  0x87   :  { %v13569_v21 = vand.u32 4294901760, %v11154_v52  ;;  %v1190_v47 = vsub.f32 %v11146_v5, %v13567_v24  ;;  %9240 = vmatpush1.bf16.msra.mxu0 %v9239_v43  ;;  %v9241_v6 = vpack.c.bf16 %v356_v4, %v344_v7  ;;  %v13571_v3 = vand.u32 4294901760, %v10899_v36 }
  0x88   :  { %9430 = vmatprep.subr.bf16.mxu1 %v9429_v51  ;;  %v13904_v16 = vand.u32 4294901760, %v10862_v59  ;;  %v350_v24 = vand.u32 4294901760, %v349_v11  ;;  %v362_v9 = vand.u32 4294901760, %v361_v28  ;;  %v367_v43 = vsub.f32 %v10892_v38, %v13573_v46 }
  0x89   :  { %v1197_v20 = vsub.f32 %v11154_v52, %v13569_v21  ;;  %9432 = vmatpush3.bf16.msra.mxu1 %v9429_v51  ;;  %v1191_v34 = vand.u32 4294901760, %v1190_v47  ;;  %9242 = vmatprep.subr.bf16.mxu0 %v9241_v6  ;;  %v379_v4 = vsub.f32 %v10899_v36, %v13571_v3  ;;  %v13905_v22 = vand.u32 4294901760, %v10864_v60 }
  0x8a   :  { %v11177_v15 = vsub.f32 %v10862_v59, %v13904_v16  ;;  %v9243_v51 = vpack.c.bf16 %v362_v9, %v350_v24  ;;  %v368_v47 = vand.u32 4294901760, %v367_v43  ;;  %v13576_v11 = vand.u32 4294901760, %v10907_v40  ;;  %v13907_v43 = vld [vmem:[#allocation40_spill] sm:$0xff] }
  0x8b   :  { %v1198_v7 = vand.u32 4294901760, %v1197_v20  ;;  %v11189_v59 = vsub.f32 %v10864_v60, %v13905_v22  ;;  %v13579_v28 = vand.u32 4294901760, %v10913_v41  ;;  %v380_v6 = vand.u32 4294901760, %v379_v4  ;;  %v13906_v22 = vld [vmem:[#allocation39_spill] sm:$0xff] }
  0x8c   :  { %v13572_v21 = vand.u32 4294901760, %v11177_v15  ;;  %9244 = vmatpush1.bf16.msra.mxu0 %v9243_v51  ;;  %v373_v60 = vsub.f32 %v10907_v40, %v13576_v11  ;;  %v13583_v9 = vand.u32 4294901760, %v13906_v22  ;;  %v13908_v51 = vld [vmem:[#allocation32_spill] sm:$0xff] }
  0x8d   :  { %v9433_v16 = vpack.c.bf16 %v1198_v7, %v1191_v34  ;;  %v13580_v3 = vand.u32 4294901760, %v11189_v59  ;;  %v385_v24 = vsub.f32 %v10913_v41, %v13579_v28  ;;  %v13585_v34 = vand.u32 4294901760, %v13907_v43 }
  0x8e   :  { %v1204_v20 = vsub.f32 %v11177_v15, %v13572_v21  ;;  %v9245_v7 = vpack.c.bf16 %v380_v6, %v368_v47  ;;  %v13909_v46 = vand.u32 4294901760, %v13908_v51  ;;  %v374_v11 = vand.u32 4294901760, %v373_v60 }
  0x8f   :  { %9434 = vmatprep.subr.bf16.mxu1 %v9433_v16  ;;  %v1211_v21 = vsub.f32 %v11189_v59, %v13580_v3  ;;  %v386_v40 = vand.u32 4294901760, %v385_v24  ;;  %v391_v28 = vsub.f32 %v13906_v22, %v13583_v9  ;;  %v403_v47 = vsub.f32 %v13907_v43, %v13585_v34 }
  0x90   :  { %v1205_v4 = vand.u32 4294901760, %v1204_v20  ;;  %v11211_v18 = vsub.f32 %v13908_v51, %v13909_v46  ;;  %9436 = vmatpush3.bf16.msra.mxu1 %v9433_v16  ;;  %9246 = vmatprep.subr.bf16.mxu0 %v9245_v7  ;;  %v13910_v3 = vand.u32 4294901760, %v10894_v58  ;;  %v13911_v16 = vld [vmem:[#allocation42_spill] sm:$0xff]  ;;  %v13586_v9 = vand.u32 4294901760, %v10941_v12 }
  0x91   :  { %v1212_v6 = vand.u32 4294901760, %v1211_v21  ;;  %v13587_v60 = vand.u32 4294901760, %v13911_v16  ;;  %v9247_v24 = vpack.c.bf16 %v386_v40, %v374_v11  ;;  %v392_v51 = vand.u32 4294901760, %v391_v28 }
  0x92   :  { %v13590_v20 = vand.u32 4294901760, %v11211_v18  ;;  %v11223_v46 = vsub.f32 %v10894_v58, %v13910_v3  ;;  %v404_v41 = vand.u32 4294901760, %v403_v47  ;;  %v409_v40 = vsub.f32 %v10941_v12, %v13586_v9 }
  0x93   :  { %v9437_v22 = vpack.c.bf16 %v1212_v6, %v1205_v4  ;;  %v397_v34 = vsub.f32 %v13911_v16, %v13587_v60  ;;  %9248 = vmatpush1.bf16.msra.mxu0 %v9247_v24  ;;  %v13589_v3 = vand.u32 4294901760, %v10945_v45  ;;  %v13591_v11 = vand.u32 4294901760, %v10948_v39 }
  0x94   :  { %v1218_v7 = vsub.f32 %v11211_v18, %v13590_v20  ;;  %v13588_v21 = vand.u32 4294901760, %v11223_v46  ;;  %v9249_v58 = vpack.c.bf16 %v404_v41, %v392_v51  ;;  %v13912_v6 = vand.u32 4294901760, %v10909_v48 }
  0x95   :  { %9438 = vmatprep.subr.bf16.mxu1 %v9437_v22  ;;  %v398_v47 = vand.u32 4294901760, %v397_v34  ;;  %v410_v41 = vand.u32 4294901760, %v409_v40  ;;  %v415_v51 = vsub.f32 %v10945_v45, %v13589_v3  ;;  %v13914_v9 = vand.u32 4294901760, %v10919_v63 }
  0x96   :  { %v1219_v28 = vand.u32 4294901760, %v1218_v7  ;;  %v1225_v4 = vsub.f32 %v11223_v46, %v13588_v21  ;;  %v11245_v24 = vsub.f32 %v10909_v48, %v13912_v6  ;;  %9440 = vmatpush3.bf16.msra.mxu1 %v9437_v22  ;;  %9250 = vmatprep.subr.bf16.mxu0 %v9249_v58  ;;  %v427_v7 = vsub.f32 %v10948_v39, %v13591_v11 }
  0x97   :  { %v11256_v34 = vsub.f32 %v10919_v63, %v13914_v9  ;;  %v13592_v22 = vand.u32 4294901760, %v10956_v53  ;;  %v13598_v58 = vand.u32 4294901760, %v10972_v37  ;;  %v9251_v40 = vpack.c.bf16 %v410_v41, %v398_v47 }
  0x98   :  { %13913 = vst [vmem:[#allocation40_spill] sm:$0xff] %v11245_v24  ;;  %v1226_v60 = vand.u32 4294901760, %v1225_v4  ;;  %v13593_v48 = vand.u32 4294901760, %v11245_v24  ;;  %v416_v6 = vand.u32 4294901760, %v415_v51  ;;  %v428_v21 = vand.u32 4294901760, %v427_v7  ;;  %v13915_v7 = vld [vmem:[#allocation16_spill] sm:$0xff] }
  0x99   :  { %v13599_v3 = vand.u32 4294901760, %v11256_v34  ;;  %v421_v63 = vsub.f32 %v10956_v53, %v13592_v22  ;;  %v433_v9 = vsub.f32 %v10972_v37, %v13598_v58  ;;  %9252 = vmatpush1.bf16.msra.mxu0 %v9251_v40  ;;  %v9257_v22 = vpack.c.bf16 %v13915_v7, %v10757_v17 }
  0x9a   :  { %v9441_v20 = vpack.c.bf16 %v1226_v60, %v1219_v28  ;;  %v1232_v11 = vsub.f32 %v11245_v24, %v13593_v48  ;;  %v9253_v4 = vpack.c.bf16 %v428_v21, %v416_v6  ;;  %v13916_v24 = vld [vmem:[#allocation48_spill] sm:$0xff]  ;;  %v13917_v21 = vld [vmem:[#allocation19_spill] sm:$0xff] }
  0x9b   :  { %v1239_v47 = vsub.f32 %v11256_v34, %v13599_v3  ;;  %v422_v28 = vand.u32 4294901760, %v421_v63  ;;  %v434_v41 = vand.u32 4294901760, %v433_v9  ;;  %v9449_v40 = vpack.c.bf16 %v10977_v33, %v13916_v24 }
  0x9c   :  { %9442 = vmatprep.subr.bf16.mxu1 %v9441_v20  ;;  %v1233_v60 = vand.u32 4294901760, %v1232_v11  ;;  %9254 = vmatprep.subr.bf16.mxu0 %v9253_v4  ;;  %v9259_v6 = vpack.c.bf16 %v10773_v26, %v13917_v21  ;;  %v9261_v11 = vpack.c.bf16 %v10789_v42, %v10778_v31  ;;  %v9263_v63 = vpack.c.bf16 %v10804_v50, %v10802_v49 }
  0x9d   :  { %9444 = vmatpush3.bf16.msra.mxu1 %v9441_v20  ;;  %v1240_v51 = vand.u32 4294901760, %v1239_v47  ;;  %v9255_v48 = vpack.c.bf16 %v434_v41, %v422_v28  ;;  %v9453_v20 = vpack.c.bf16 %v11038_v30, %v11033_v8  ;;  %v9265_v9 = vpack.c.bf16 %v10814_v55, %v10812_v54 }
  0x9e   :  { %v9267_v4 = vpack.c.bf16 %v10836_v13, %v10827_v2  ;;  %v13919_v47 = vand.u32 4294901760, %v13915_v7  ;;  %v13920_v28 = vand.u32 4294901760, %v13916_v24  ;;  %v13921_v41 = vand.u32 4294901760, %v10977_v33 }
  0x9f   :  { %v9445_v53 = vpack.c.bf16 %v1240_v51, %v1233_v60  ;;  %9256 = vmatpush1.bf16.msra.mxu0 %v9255_v48  ;;  %v9457_v48 = vpack.c.bf16 %v11085_v29, %v11075_v1  ;;  %v13922_v58 = vand.u32 4294901760, %v13917_v21  ;;  %v13923_v3 = vand.u32 4294901760, %v10773_v26 }
  0xa0   :  { %9258 = vmatprep.subr.bf16.mxu0 %v9257_v22  ;;  %v9269_v22 = vpack.c.bf16 %v10843_v27, %v10840_v19  ;;  %v11305_v51 = vpack.c.bf16 %v13921_v41, %v13920_v28  ;;  %v13925_v7 = vand.u32 4294901760, %v10789_v42  ;;  %v13926_v24 = vand.u32 4294901760, %v11033_v8 }
  0xa1   :  { %9446 = vmatprep.subr.bf16.mxu1 %v9445_v53  ;;  %v13927_v33 = vand.u32 4294901760, %v11038_v30  ;;  %v13928_v21 = vand.u32 4294901760, %v10802_v49  ;;  %v13929_v26 = vand.u32 4294901760, %v10804_v50  ;;  %v13931_v42 = vand.u32 4294901760, %v10814_v55 }
  0xa2   :  { %9448 = vmatpush3.bf16.msra.mxu1 %v9445_v53  ;;  %470 = vmatmul.mubr.f32.vlgmr.msra.gmra.mrb[0].mxu0 %v10962_v14  ;;  %v13918_v53 = vand.u32 4294901760, %v10757_v17  ;;  %v11312_v14 = vpack.c.bf16 %v13923_v3, %v13922_v58  ;;  %v13924_v17 = vand.u32 4294901760, %v10778_v31  ;;  %v13930_v31 = vand.u32 4294901760, %v10812_v54 }
  0xa3   :  { %9450 = vmatprep.subr.bf16.mxu1 %v9449_v40  ;;  %9260 = vmatpush1.bf16.msra.mxu0 %v9259_v6  ;;  %v11331_v3 = vpack.c.bf16 %v13929_v26, %v13928_v21  ;;  %v13932_v8 = vand.u32 4294901760, %v11075_v1  ;;  %v13933_v30 = vand.u32 4294901760, %v11085_v29  ;;  %v13934_v49 = vand.u32 4294901760, %v10827_v2 }
  0xa4   :  { %v11299_v60 = vpack.c.bf16 %v13919_v47, %v13918_v53  ;;  %475 = vmatprep.mubr.f32.mxu0 %v13895_v61  ;;  %v11318_v53 = vpack.c.bf16 %v13925_v7, %v13924_v17  ;;  %v11324_v47 = vpack.c.bf16 %v13927_v33, %v13926_v24  ;;  %9262 = vmatprep.subr.bf16.mxu0 %v9261_v11  ;;  %v13935_v50 = vand.u32 4294901760, %v10836_v13 }
  0xa5   :  { %8541 = vmatmul.mubr.f32.vlgmr.msra.gmra.mrb[0].mxu1 %v10996_v23  ;;  %v11337_v58 = vpack.c.bf16 %v13931_v42, %v13930_v31  ;;  %v11343_v6 = vpack.c.bf16 %v13933_v30, %v13932_v8  ;;  %v13936_v54 = vand.u32 4294901760, %v10840_v19  ;;  %v13937_v55 = vand.u32 4294901760, %v10843_v27 }
  0xa6   :  { %9452 = vmatpush3.bf16.msra.mxu1 %v9449_v40  ;;  %8575 = vmatprep.mubr.f32.mxu1 %v10987_v62  ;;  %v11350_v11 = vpack.c.bf16 %v13935_v50, %v13934_v49  ;;  %v13938_v1 = vand.u32 4294901760, %v11112_v25  ;;  %v13939_v29 = vand.u32 4294901760, %v11120_v0  ;;  %v13940_v2 = vand.u32 4294901760, %v10851_v35 }
  0xa7   :  { %v11356_v28 = vpack.c.bf16 %v13937_v55, %v13936_v54  ;;  %9454 = vmatprep.subr.bf16.mxu1 %v9453_v20  ;;  %477 = vmatmul.mubr.f32.gmra.mrb[2].mxu0 %v10996_v23  ;;  %v13941_v13 = vand.u32 4294901760, %v10860_v57  ;;  %v13942_v19 = vand.u32 4294901760, %v10869_v56  ;;  %v13943_v27 = vand.u32 4294901760, %v10871_v44 }
  0xa8   :  { %v11362_v41 = vpack.c.bf16 %v13939_v29, %v13938_v1  ;;  %v13944_v7 = vand.u32 4294901760, %v11146_v5  ;;  %v13945_v24 = vand.u32 4294901760, %v11154_v52  ;;  %9264 = vmatpush1.bf16.msra.mxu0 %v9263_v63  ;;  %611 = vmatprep.mubr.f32.mxu0 %v13895_v61  ;;  %v13946_v21 = vand.u32 4294901760, %v10881_v32  ;;  %v13952_v63 = vld [vmem:[#allocation35_spill] sm:$0xff]  ;;  %v13954_v1 = vld [vmem:[#allocation37_spill] sm:$0xff] }
  0xa9   :  { %v11369_v40 = vpack.c.bf16 %v13941_v13, %v13940_v2  ;;  %v11375_v17 = vpack.c.bf16 %v13943_v27, %v13942_v19  ;;  %v13947_v26 = vand.u32 4294901760, %v10883_v10  ;;  %v13948_v42 = vand.u32 4294901760, %v10892_v38  ;;  %9266 = vmatprep.subr.bf16.mxu0 %v9265_v9  ;;  %v13956_v13 = vld [vmem:[#allocation39_spill] sm:$0xff] }
  0xaa   :  { %v11381_v33 = vpack.c.bf16 %v13945_v24, %v13944_v7  ;;  %v13949_v8 = vand.u32 4294901760, %v10899_v36  ;;  %v13950_v49 = vand.u32 4294901760, %v11177_v15  ;;  %v13951_v50 = vand.u32 4294901760, %v11189_v59  ;;  %9456 = vmatpush3.bf16.msra.mxu1 %v9453_v20 }
  0xab   :  { %v11388_v31 = vpack.c.bf16 %v13947_v26, %v13946_v21  ;;  %v13953_v55 = vand.u32 4294901760, %v13952_v63  ;;  %v13955_v29 = vand.u32 4294901760, %v13954_v1  ;;  %v13957_v19 = vand.u32 4294901760, %v13956_v13  ;;  %9458 = vmatprep.subr.bf16.mxu1 %v9457_v48 }
  0xac   :  { %v11394_v30 = vpack.c.bf16 %v13949_v8, %v13948_v42  ;;  %v11400_v54 = vpack.c.bf16 %v13951_v50, %v13950_v49  ;;  %v13958_v27 = vand.u32 4294901760, %v13907_v43  ;;  %v13960_v24 = vand.u32 4294901760, %v11211_v18  ;;  %9268 = vmatpush1.bf16.msra.mxu0 %v9267_v4  ;;  %v13988_v4 = vld [vmem:[#allocation30_spill] sm:$0xff] }
  0xad   :  { %v11406_v2 = vpack.c.bf16 %v13955_v29, %v13953_v55  ;;  %v13961_v21 = vand.u32 4294901760, %v11223_v46  ;;  %v13963_v9 = vand.u32 4294901760, %v13911_v16  ;;  %v13964_v42 = vand.u32 4294901760, %v10941_v12  ;;  %v13967_v29 = vld [vmem:[#allocation40_spill] sm:$0xff]  ;;  %9270 = vmatprep.subr.bf16.mxu0 %v9269_v22  ;;  %v13989_v22 = vld [vmem:[#allocation31_spill] sm:$0xff] }
  0xae   :  { %v11412_v7 = vpack.c.bf16 %v13958_v27, %v13957_v19  ;;  %v13965_v49 = vand.u32 4294901760, %v10945_v45  ;;  %v13966_v50 = vand.u32 4294901760, %v10948_v39  ;;  %v13968_v19 = vand.u32 4294901760, %v13967_v29  ;;  %9460 = vmatpush3.bf16.msra.mxu1 %v9457_v48  ;;  %v13987_v48 = vld [vmem:[#allocation29_spill] sm:$0xff] }
  0xaf   :  { %v11418_v26 = vpack.c.bf16 %v13961_v21, %v13960_v24  ;;  %v11424_v8 = vpack.c.bf16 %v13964_v42, %v13963_v9  ;;  %v13969_v27 = vand.u32 4294901760, %v11256_v34  ;;  %v13970_v24 = vld [vmem:[#allocation46_spill] sm:$0xff]  ;;  %v9461_v20 = vpack.c.bf16 %v11120_v0, %v11112_v25  ;;  %v13977_v0 = vld [vmem:[#allocation20_spill] sm:$0xff] }
  0xb0   :  { %13959 = vst [vmem:[#allocation32_spill] sm:$0xff] %v11412_v7  ;;  %v11430_v55 = vpack.c.bf16 %v13966_v50, %v13965_v49  ;;  %v13971_v21 = vand.u32 4294901760, %v13970_v24  ;;  %v9271_v9 = vpack.c.bf16 %v10860_v57, %v10851_v35  ;;  %v9273_v42 = vpack.c.bf16 %v10871_v44, %v10869_v56  ;;  %v13993_v50 = vld [vmem:[#allocation38_spill] sm:$0xff] }
  0xb1   :  { %13962 = vst [vmem:[#allocation42_spill] sm:$0xff] %v11418_v26  ;;  %v11436_v23 = vpack.c.bf16 %v13969_v27, %v13968_v19  ;;  %v13972_v26 = vand.u32 4294901760, %v10972_v37  ;;  %9462 = vmatprep.subr.bf16.mxu1 %v9461_v20  ;;  %v9465_v49 = vpack.c.bf16 %v11154_v52, %v11146_v5  ;;  %v9277_v25 = vpack.c.bf16 %v10899_v36, %v10892_v38  ;;  %v13979_v5 = vld [vmem:[#allocation21_spill] sm:$0xff]  ;;  %v13980_v52 = vld [vmem:[#allocation22_spill] sm:$0xff]  ;;  %v13995_v19 = vld [vmem:[#allocation43_spill] sm:$0xff] }
  0xb2   :  { %9272 = vmatpush1.bf16.msra.mxu0 %v9271_v9  ;;  %9464 = vmatpush3.bf16.msra.mxu1 %v9461_v20  ;;  %v9469_v35 = vpack.c.bf16 %v11189_v59, %v11177_v15  ;;  %v9279_v44 = vpack.c.bf16 %v13954_v1, %v13952_v63  ;;  %v9281_v56 = vpack.c.bf16 %v13907_v43, %v13956_v13  ;;  %v13981_v15 = vld [vmem:[#allocation23_spill] sm:$0xff]  ;;  %v13982_v59 = vld [vmem:[#allocation24_spill] sm:$0xff]  ;;  %v13983_v43 = vld [vmem:[#allocation25_spill] sm:$0xff] }
  0xb3   :  { %v11442_v7 = vpack.c.bf16 %v13972_v26, %v13971_v21  ;;  %v9275_v26 = vpack.c.bf16 %v10883_v10, %v10881_v32  ;;  %9274 = vmatprep.subr.bf16.mxu0 %v9273_v42  ;;  %9466 = vmatprep.subr.bf16.mxu1 %v9465_v49  ;;  %v9473_v10 = vpack.c.bf16 %v11223_v46, %v11211_v18  ;;  %v13973_v18 = vld [vmem:[#allocation15_spill] sm:$0xff]  ;;  %v13984_v46 = vld [vmem:[#allocation26_spill] sm:$0xff]  ;;  %v13990_v63 = vld [vmem:[#allocation33_spill] sm:$0xff] }
  0xb4   :  { %v9283_v32 = vpack.c.bf16 %v10941_v12, %v13911_v16  ;;  %v9285_v38 = vpack.c.bf16 %v10948_v39, %v10945_v45  ;;  %v9477_v57 = vpack.c.bf16 %v11256_v34, %v13967_v29  ;;  %v9287_v36 = vpack.c.bf16 %v10972_v37, %v13970_v24  ;;  %v13974_v12 = vld [vmem:[#allocation17_spill] sm:$0xff]  ;;  %v13975_v39 = vld [vmem:[#allocation18_spill] sm:$0xff]  ;;  %v13978_v37 = vld [vmem:[#allocation52_spill] sm:$0xff] }
  0xb5   :  { %v13976_v45 = vld [vmem:[#allocation53_spill] sm:$0xff]  ;;  %v13985_v16 = vld [vmem:[#allocation27_spill] sm:$0xff]  ;;  %v13986_v34 = vld [vmem:[#allocation28_spill] sm:$0xff] }
  0xb6   :  { %9276 = vmatpush1.bf16.msra.mxu0 %v9275_v26  ;;  %9468 = vmatpush3.bf16.msra.mxu1 %v9465_v49  ;;  %v13991_v1 = vld [vmem:[#allocation34_spill] sm:$0xff]  ;;  %v13992_v13 = vld [vmem:[#allocation36_spill] sm:$0xff]  ;;  %v13994_v29 = vld [vmem:[#allocation41_spill] sm:$0xff] }
  0xb7   :  { %9278 = vmatprep.subr.bf16.mxu0 %v9277_v25  ;;  %9470 = vmatprep.subr.bf16.mxu1 %v9469_v35  ;;  %v13996_v27 = vld [vmem:[#allocation44_spill] sm:$0xff]  ;;  %v13997_v24 = vld [vmem:[#allocation45_spill] sm:$0xff]  ;;  %v13999_v20 = vld [vmem:[#allocation54_spill] sm:$0xff] }
  0xb8   :  { %v13998_v21 = vld [vmem:[#allocation49_spill] sm:$0xff]  ;;  %v14000_v9 = vld [vmem:[#allocation47_spill] sm:$0xff] }
  0xba   :  { %9280 = vmatpush1.bf16.msra.mxu0 %v9279_v44  ;;  %9472 = vmatpush3.bf16.msra.mxu1 %v9469_v35 }
  0xbb   :  { %9282 = vmatprep.subr.bf16.mxu0 %v9281_v56  ;;  %9474 = vmatprep.subr.bf16.mxu1 %v9473_v10 }
  0xbe   :  { %9284 = vmatpush1.bf16.msra.mxu0 %v9283_v32  ;;  %9476 = vmatpush3.bf16.msra.mxu1 %v9473_v10 }
  0xbf   :  { %9286 = vmatprep.subr.bf16.mxu0 %v9285_v38  ;;  %9478 = vmatprep.subr.bf16.mxu1 %v9477_v57 }
  0xc2   :  { %9288 = vmatpush1.bf16.msra.mxu0 %v9287_v36  ;;  %9480 = vmatpush3.bf16.msra.mxu1 %v9477_v57 }
  0xc3   :  { %9290 = vmatprep.subr.bf16.mxu0 %v13973_v18  ;;  %9482 = vmatprep.subr.bf16.mxu1 %v13974_v12 }
  0xc5   :  { %614 = vmatmul.mubr.f32.vlgmr.msra.gmra.mrb[0].mxu0 %v10987_v62  ;;  %8576 = vmatmul.mubr.f32.vlgmr.msra.gmra.mrb[0].mxu1 %v13976_v45 }
  0xc6   :  { %9292 = vmatpush1.bf16.msra.mxu0 %v13975_v39  ;;  %619 = vmatprep.mubr.f32.mxu0 %v13895_v61 }
  0xc7   :  { %9294 = vmatprep.subr.bf16.mxu0 %v13977_v0  ;;  %9484 = vmatpush3.bf16.msra.mxu1 %v13974_v12 }
  0xc8   :  { %8610 = vmatprep.mubr.f32.mxu1 %v13978_v37  ;;  %9486 = vmatprep.subr.bf16.mxu1 %v13979_v5 }
  0xc9   :  { %622 = vmatmul.mubr.f32.gmra.mrb[2].mxu0 %v13976_v45 }
  0xca   :  { %9296 = vmatpush1.bf16.msra.mxu0 %v13980_v52  ;;  %724 = vmatprep.mubr.f32.mxu0 %v13895_v61 }
  0xcb   :  { %9298 = vmatprep.subr.bf16.mxu0 %v13981_v15  ;;  %9488 = vmatpush3.bf16.msra.mxu1 %v13979_v5 }
  0xcc   :  { %9490 = vmatprep.subr.bf16.mxu1 %v13982_v59 }
  0xce   :  { %9300 = vmatpush1.bf16.msra.mxu0 %v13983_v43 }
  0xcf   :  { %9302 = vmatprep.subr.bf16.mxu0 %v13984_v46  ;;  %9492 = vmatpush3.bf16.msra.mxu1 %v13982_v59 }
  0xd0   :  { %9494 = vmatprep.subr.bf16.mxu1 %v13985_v16 }
  0xd2   :  { %9304 = vmatpush1.bf16.msra.mxu0 %v13986_v34 }
  0xd3   :  { %9306 = vmatprep.subr.bf16.mxu0 %v13987_v48  ;;  %9496 = vmatpush3.bf16.msra.mxu1 %v13985_v16 }
  0xd4   :  { %9498 = vmatprep.subr.bf16.mxu1 %v13988_v4 }
  0xd6   :  { %9308 = vmatpush1.bf16.msra.mxu0 %v13989_v22 }
  0xd7   :  { %9310 = vmatprep.subr.bf16.mxu0 %v13990_v63  ;;  %9500 = vmatpush3.bf16.msra.mxu1 %v13988_v4 }
  0xd8   :  { %9502 = vmatprep.subr.bf16.mxu1 %v13991_v1 }
  0xda   :  { %9312 = vmatpush1.bf16.msra.mxu0 %v13992_v13 }
  0xdb   :  { %9314 = vmatprep.subr.bf16.mxu0 %v13993_v50  ;;  %9504 = vmatpush3.bf16.msra.mxu1 %v13991_v1 }
  0xdc   :  { %9506 = vmatprep.subr.bf16.mxu1 %v13994_v29 }
  0xde   :  { %9316 = vmatpush1.bf16.msra.mxu0 %v13995_v19 }
  0xdf   :  { %9318 = vmatprep.subr.bf16.mxu0 %v13996_v27  ;;  %9508 = vmatpush3.bf16.msra.mxu1 %v13994_v29 }
  0xe0   :  { %9510 = vmatprep.subr.bf16.mxu1 %v13997_v24 }
  0xe2   :  { %9320 = vmatpush1.bf16.msra.mxu0 %v13998_v21 }
  0xe3   :  { %9322 = vmatprep.subr.bf16.mxu0 %v11299_v60  ;;  %9512 = vmatpush3.bf16.msra.mxu1 %v13997_v24  ;;  %v14002_v60 = vld [vmem:[#allocation42_spill] sm:$0xff] }
  0xe4   :  { %9514 = vmatprep.subr.bf16.mxu1 %v11305_v51 }
  0xe5   :  { %728 = vmatmul.mubr.f32.vlgmr.msra.gmra.mrb[0].mxu0 %v13978_v37 }
  0xe6   :  { %9324 = vmatpush1.bf16.msra.mxu0 %v11312_v14  ;;  %733 = vmatprep.mubr.f32.mxu0 %v13895_v61  ;;  %v14001_v14 = vld [vmem:[#allocation32_spill] sm:$0xff] }
  0xe7   :  { %8611 = vmatmul.mubr.f32.vlgmr.msra.gmra.mrb[0].mxu1 %v13999_v20  ;;  %9326 = vmatprep.subr.bf16.mxu0 %v11318_v53  ;;  %v1713_v53 = vld [vmem:[#allocation5] sm:$0xff] }
  0xe8   :  { %9516 = vmatpush3.bf16.msra.mxu1 %v11305_v51  ;;  %8645 = vmatprep.mubr.f32.mxu1 %v14000_v9  ;;  %v14003_v51 = vld [vmem:[#allocation51_spill] sm:$0xff] }
  0xe9   :  { %9518 = vmatprep.subr.bf16.mxu1 %v11324_v47  ;;  %737 = vmatmul.mubr.f32.gmra.mrb[2].mxu0 %v13999_v20 }
  0xea   :  { %9328 = vmatpush1.bf16.msra.mxu0 %v11331_v3  ;;  %903 = vmatprep.mubr.f32.mxu0 %v13895_v61 }
  0xeb   :  { %9330 = vmatprep.subr.bf16.mxu0 %v11337_v58  ;;  %v1726_v58 = vsel %vm1725_vm0, %v1713_v53, 0 }
  0xec   :  { %9520 = vmatpush3.bf16.msra.mxu1 %v11324_v47 }
  0xed   :  { %9522 = vmatprep.subr.bf16.mxu1 %v11343_v6 }
  0xee   :  { %9332 = vmatpush1.bf16.msra.mxu0 %v11350_v11  ;;  %v11575_v11 = vand.u32 4294901760, %v1726_v58 }
  0xef   :  { %9334 = vmatprep.subr.bf16.mxu0 %v11356_v28 }
  0xf0   :  { %9524 = vmatpush3.bf16.msra.mxu1 %v11343_v6  ;;  %v75_v6 = vld [vmem:[#allocation8] sm:$0xff] }
  0xf1   :  { %9526 = vmatprep.subr.bf16.mxu1 %v11362_v41 }
  0xf2   :  { %9336 = vmatpush1.bf16.msra.mxu0 %v11369_v40  ;;  %v1720_v40 = vsel %vm1718_vm1, %v75_v6, 0 }
  0xf3   :  { %9338 = vmatprep.subr.bf16.mxu0 %v11375_v17  ;;  %v76_v17 = vld [vmem:[#allocation8 + $0x8] sm:$0xff] }
  0xf4   :  { %9528 = vmatpush3.bf16.msra.mxu1 %v11362_v41  ;;  %v1714_v41 = vld [vmem:[#allocation5 + $0x8] sm:$0xf] }
  0xf5   :  { %9530 = vmatprep.subr.bf16.mxu1 %v11381_v33 }
  0xf6   :  { %9340 = vmatpush1.bf16.msra.mxu0 %v11388_v31  ;;  %v1730_v31 = vsel %vm1725_vm0, %v1714_v41, 0  ;;  %v2752_v41 = vld [vmem:[#allocation2 + $0x1d0] sm:$0xff] }
  0xf7   :  { %9342 = vmatprep.subr.bf16.mxu0 %v11394_v30 }
  0xf8   :  { %9532 = vmatpush3.bf16.msra.mxu1 %v11381_v33  ;;  %v11586_v33 = vsub.f32 %v1726_v58, %v11575_v11 }
  0xf9   :  { %9534 = vmatprep.subr.bf16.mxu1 %v11400_v54 }
  0xfa   :  { %9344 = vmatpush1.bf16.msra.mxu0 %v11406_v2  ;;  %v1723_v2 = vsel %vm1718_vm1, %v76_v17, 0 }
  0xfb   :  { %9346 = vmatprep.subr.bf16.mxu0 %v14001_v14  ;;  %v11605_v49 = vand.u32 4294901760, %v1723_v2 }
  0xfc   :  { %9536 = vmatpush3.bf16.msra.mxu1 %v11400_v54  ;;  %v11591_v54 = vand.u32 4294901760, %v1720_v40 }
  0xfd   :  { %9538 = vmatprep.subr.bf16.mxu1 %v14002_v60  ;;  %14006 = vst [vmem:[#allocation19_spill] sm:$0xff] %v11605_v49  ;;  %v11617_v56 = vsub.f32 %v1723_v2, %v11605_v49  ;;  %v11725_v2 = vld [vmem:[#allocation2 + $0x2b0] sm:$0xff] }
  0xfe   :  { %9348 = vmatpush1.bf16.msra.mxu0 %v11424_v8  ;;  %14004 = vst [vmem:[#allocation16_spill] sm:$0xff] %v11591_v54  ;;  %v1829_v8 = vand.u32 4294901760, %v11586_v33  ;;  %v11603_v42 = vsub.f32 %v1720_v40, %v11591_v54 }
  0xff   :  { %9350 = vmatprep.subr.bf16.mxu0 %v11430_v55  ;;  %14008 = vst [vmem:[#allocation37_spill] sm:$0xff] %v11617_v56  ;;  %v11628_v57 = vand.u32 4294901760, %v11617_v56 }
 0x100   :  { %9540 = vmatpush3.bf16.msra.mxu1 %v14002_v60  ;;  %14005 = vst [vmem:[#allocation48_spill] sm:$0xff] %v11603_v42  ;;  %v1830_v25 = vsub.f32 %v11586_v33, %v1829_v8  ;;  %v11614_v44 = vand.u32 4294901760, %v11603_v42 }
 0x101   :  { %9542 = vmatprep.subr.bf16.mxu1 %v11436_v23  ;;  %14009 = vst [vmem:[#allocation39_spill] sm:$0xff] %v11628_v57 }
 0x102   :  { %9352 = vmatpush1.bf16.msra.mxu0 %v11442_v7  ;;  %v11596_v7 = vand.u32 4294901760, %v1730_v31  ;;  %14007 = vst [vmem:[#allocation35_spill] sm:$0xff] %v11614_v44  ;;  %v1831_v32 = vand.u32 4294901760, %v1830_v25  ;;  %v1802_v38 = vsub.f32 %v11603_v42, %v11614_v44  ;;  %v2802_v25 = vand.u32 4294901760, %v2752_v41 }
 0x103   :  { %9354 = vmatprep.subr.bf16.mxu0 %v13973_v18 }
 0x104   :  { %9544 = vmatpush3.bf16.msra.mxu1 %v11436_v23  ;;  %v1717_v23 = vcombine.high %v1713_v53, %v1713_v53  ;;  %v2334_v26 = vsub.f32 %v1730_v31, %v11596_v7  ;;  %v11637_v18 = vand.u32 4294901760, %v1802_v38  ;;  %v2751_v38 = vld [vmem:[#allocation2 + $0x1c8] sm:$0xff] }
 0x105   :  { %9546 = vmatprep.subr.bf16.mxu1 %v13974_v12  ;;  %905 = vmatmul.mubr.f32.vlgmr.msra.gmra.mrb[0].mxu0 %v14000_v9 }
 0x106   :  { %9356 = vmatpush1.bf16.msra.mxu0 %v13975_v39  ;;  %910 = vmatprep.mubr.f32.mxu0 %v13895_v61  ;;  %v1728_v47 = vsel %vm1725_vm0, %v1717_v23, 0  ;;  %v11621_v10 = vand.u32 4294901760, %v2334_v26  ;;  %14010 = vst [vmem:[#allocation40_spill] sm:$0xff] %v11637_v18  ;;  %v2742_v23 = vld [vmem:[#allocation2 + $0x180] sm:$0xff] }
 0x107   :  { %8646 = vmatmul.mubr.f32.vlgmr.msra.gmra.mrb[0].mxu1 %v14003_v51  ;;  %9358 = vmatprep.subr.bf16.mxu0 %v13977_v0  ;;  %v11569_v3 = vand.u32 4294901760, %v1728_v47  ;;  %v2792_v31 = vand.u32 4294901760, %v2742_v23 }
 0x108   :  { %9548 = vmatpush3.bf16.msra.mxu1 %v13974_v12  ;;  %8680 = vmatprep.mubr.f32.mxu1 %v14000_v9  ;;  %v2336_v36 = vsub.f32 %v2334_v26, %v11621_v10  ;;  %v1813_v12 = vsub.f32 %v11617_v56, %v11628_v57 }
 0x109   :  { %9550 = vmatprep.subr.bf16.mxu1 %v13979_v5  ;;  %912 = vmatmul.mubr.f32.gmra.mrb[2].mxu0 %v14003_v51  ;;  %v11579_v28 = vsub.f32 %v1728_v47, %v11569_v3  ;;  %v2745_v47 = vld [vmem:[#allocation2 + $0x198] sm:$0xff] }
 0x10a   :  { %9360 = vmatpush1.bf16.msra.mxu0 %v13980_v52  ;;  %1014 = vmatprep.mubr.f32.mxu0 %v13895_v61  ;;  %v2337_v39 = vand.u32 4294901760, %v2336_v36  ;;  %v11647_v0 = vand.u32 4294901760, %v1813_v12  ;;  %v11665_v52 = vld [vmem:[#allocation2 + $0x1a8] sm:$0xff] }
 0x10b   :  { %9362 = vmatprep.subr.bf16.mxu0 %v13981_v15  ;;  %v1823_v30 = vand.u32 4294901760, %v11579_v28 }
 0x10c   :  { %9552 = vmatpush3.bf16.msra.mxu1 %v13979_v5  ;;  %14011 = vst [vmem:[#allocation46_spill] sm:$0xff] %v11647_v0  ;;  %v11663_v5 = vld [vmem:[#allocation2 + $0x190] sm:$0xff] }
 0x10d   :  { %9554 = vmatprep.subr.bf16.mxu1 %v13982_v59  ;;  %v1824_v55 = vsub.f32 %v11579_v28, %v1823_v30  ;;  %v3695_v15 = vand.u32 4294901760, %v11663_v5 }
 0x10e   :  { %9364 = vmatpush1.bf16.msra.mxu0 %v13983_v43 }
 0x10f   :  { %9366 = vmatprep.subr.bf16.mxu0 %v13984_v46  ;;  %v1825_v35 = vand.u32 4294901760, %v1824_v55  ;;  %v11679_v46 = vld [vmem:[#allocation2 + $0x1c0] sm:$0xff] }
 0x110   :  { %9556 = vmatpush3.bf16.msra.mxu1 %v13982_v59  ;;  %v3698_v59 = vand.u32 4294901760, %v11665_v52  ;;  %v14031_v20 = vand.u32 4294901760, %v11679_v46 }
 0x111   :  { %9558 = vmatprep.subr.bf16.mxu1 %v13985_v16 }
 0x112   :  { %9368 = vmatpush1.bf16.msra.mxu0 %v13986_v34  ;;  %v11677_v43 = vpack.c.bf16 %v3698_v59, %v3695_v15  ;;  %v11683_v34 = vld [vmem:[#allocation2 + $0x1f0] sm:$0xff] }
 0x113   :  { %9370 = vmatprep.subr.bf16.mxu0 %v13987_v48  ;;  %v11685_v48 = vld [vmem:[#allocation2 + $0x208] sm:$0xff] }
 0x114   :  { %9560 = vmatpush3.bf16.msra.mxu1 %v13985_v16  ;;  %14012 = vst [vmem:[#allocation15_spill] sm:$0xff] %v11677_v43  ;;  %v11681_v16 = vld [vmem:[#allocation2 + $0x1d8] sm:$0xff]  ;;  %v13607_v14 = vand.u32 4294901760, %v11685_v48 }
 0x115   :  { %9562 = vmatprep.subr.bf16.mxu1 %v13988_v4  ;;  %v14033_v37 = vand.u32 4294901760, %v11681_v16 }
 0x116   :  { %9372 = vmatpush1.bf16.msra.mxu0 %v13989_v22  ;;  %v11690_v22 = vld [vmem:[#allocation2 + $0x238] sm:$0xff] }
 0x117   :  { %9374 = vmatprep.subr.bf16.mxu0 %v13990_v63  ;;  %v11692_v63 = vld [vmem:[#allocation2 + $0x250] sm:$0xff]  ;;  %v13605_v53 = vand.u32 4294901760, %v11690_v22 }
 0x118   :  { %9564 = vmatpush3.bf16.msra.mxu1 %v13988_v4  ;;  %v11688_v4 = vld [vmem:[#allocation2 + $0x220] sm:$0xff] }
 0x119   :  { %9566 = vmatprep.subr.bf16.mxu1 %v13991_v1  ;;  %v13606_v60 = vand.u32 4294901760, %v11688_v4 }
 0x11a   :  { %9376 = vmatpush1.bf16.msra.mxu0 %v13992_v13  ;;  %v2743_v13 = vld [vmem:[#allocation2 + $0x188] sm:$0xff] }
 0x11b   :  { %9378 = vmatprep.subr.bf16.mxu0 %v13993_v50  ;;  %v2746_v50 = vld [vmem:[#allocation2 + $0x1a0] sm:$0xff]  ;;  %v2790_v6 = vand.u32 4294901760, %v2743_v13  ;;  %v11737_v55 = vpack.c.bf16 %v13605_v53, %v13606_v60  ;;  %v11754_v53 = vsub.f32 %v11665_v52, %v3698_v59 }
 0x11c   :  { %9568 = vmatpush3.bf16.msra.mxu1 %v13991_v1  ;;  %v11696_v1 = vld [vmem:[#allocation2 + $0x268] sm:$0xff] }
 0x11d   :  { %9570 = vmatprep.subr.bf16.mxu1 %v13994_v29  ;;  %v13608_v58 = vand.u32 4294901760, %v11696_v1  ;;  %14015 = vst [vmem:[#allocation20_spill] sm:$0xff] %v11737_v55  ;;  %14019 = vst [vmem:[#allocation24_spill] sm:$0xff] %v11754_v53  ;;  %v11758_v60 = vsub.f32 %v2743_v13, %v2790_v6 }
 0x11e   :  { %9380 = vmatpush1.bf16.msra.mxu0 %v13995_v19  ;;  %v13613_v19 = vand.u32 4294901760, %v11681_v16 }
 0x11f   :  { %9382 = vmatprep.subr.bf16.mxu0 %v13996_v27  ;;  %v11702_v27 = vld [vmem:[#allocation2 + $0x280] sm:$0xff] }
 0x120   :  { %9572 = vmatpush3.bf16.msra.mxu1 %v13994_v29  ;;  %v13614_v29 = vand.u32 4294901760, %v11679_v46  ;;  %v13611_v40 = vand.u32 4294901760, %v11702_v27 }
 0x121   :  { %9574 = vmatprep.subr.bf16.mxu1 %v13997_v24 }
 0x122   :  { %9384 = vmatpush1.bf16.msra.mxu0 %v13998_v21  ;;  %v13612_v21 = vand.u32 4294901760, %v11683_v34 }
 0x123   :  { %1733 = vmatprep.subr.mxu0 %v11569_v3 }
 0x124   :  { %9576 = vmatpush3.bf16.msra.mxu1 %v13997_v24  ;;  %v11704_v24 = vld [vmem:[#allocation2 + $0x298] sm:$0xff] }
 0x125   :  { %1016 = vmatmul.mubr.f32.vlgmr.msra.gmra.mrb[0].mxu0 %v14000_v9  ;;  %1826 = vmatprep.subr.mxu1 %v1825_v35  ;;  %v13610_v17 = vand.u32 4294901760, %v11704_v24  ;;  %v11739_v35 = vld [vmem:[#allocation2 + $0x2c8] sm:$0xff] }
 0x126   :  { %1735 = vmatpush1.msra.mxu0 %v11575_v11  ;;  %1021 = vmatprep.mubr.f32.mxu0 %v13895_v61 }
 0x127   :  { %8681 = vmatmul.mubr.f32.vlgmr.msra.gmra.mrb[0].mxu1 %v14003_v51  ;;  %8683 = vmatprep.subr.mxu0 %v11596_v7 }
 0x128   :  { %1832 = vmatpush1.msra.mxu1 %v1831_v32  ;;  %1895 = vmatprep.mubr.f32.mxu1 %v13895_v61  ;;  %v2748_v32 = vld [vmem:[#allocation2 + $0x1b0] sm:$0xff] }
 0x129   :  { %1023 = vmatmul.mubr.f32.gmra.mrb[2].mxu0 %v14003_v51  ;;  %1912 = vmatprep.subr.mxu1 %v11579_v28  ;;  %v2749_v28 = vld [vmem:[#allocation2 + $0x1b8] sm:$0xff]  ;;  %v2800_v13 = vand.u32 4294901760, %v2748_v32 }
 0x12a   :  { %1798 = vmatprep.mubr.f32.mxu0 %v13895_v61 }
 0x12b   :  { %1897 = vmatmul.mubr.f32.vlgmr.msra.gmra.mrb[2].mxu1 %v11591_v54 }
 0x12c   :  { %1902 = vmatprep.mubr.f32.mxu1 %v13895_v61  ;;  %1915 = vmatpush1.msra.mxu1 %v11586_v33  ;;  %v11723_v33 = vpack.c.bf16 %v13613_v19, %v13614_v29  ;;  %v2754_v19 = vld [vmem:[#allocation2 + $0x1e0] sm:$0xff]  ;;  %v2757_v29 = vld [vmem:[#allocation2 + $0x1f8] sm:$0xff] }
 0x12d   :  { %1804 = vmatmul.mubr.f32.vlgmr.msra.gmra.mrb[4].mxu0 %v11637_v18  ;;  %1996 = vmatprep.subr.mxu1 %v11569_v3 }
 0x12e   :  { %8684 = vmatpush3.msra.mxu0 %v11596_v7  ;;  %1809 = vmatprep.mubr.f32.mxu0 %v13895_v61  ;;  %14013 = vst [vmem:[#allocation17_spill] sm:$0xff] %v11723_v33 }
 0x12f   :  { %1904 = vmatmul.mubr.f32.gmra.mrb[4].mxu1 %v11605_v49  ;;  %8688 = vmatprep.subr.mxu0 %v2337_v39 }
 0x130   :  { %1978 = vmatprep.mubr.f32.mxu1 %v13895_v61 }
 0x131   :  { %1815 = vmatmul.mubr.f32.gmra.mrb[6].mxu0 %v11647_v0 }
 0x132   :  { %8685 = vmatprep.mubr.f32.mxu0 %v11637_v18  ;;  %v2763_v18 = vld [vmem:[#allocation2 + $0x228] sm:$0xff] }
 0x133   :  { %1981 = vmatmul.mubr.f32.vlgmr.msra.gmra.mrb[2].mxu1 %v11603_v42  ;;  %v2820_v51 = vand.u32 4294901760, %v2763_v18 }
 0x134   :  { %1986 = vmatprep.mubr.f32.mxu1 %v13895_v61  ;;  %1998 = vmatpush1.msra.mxu1 %v11575_v11 }
 0x135   :  { %8686 = vmatmul.mubr.f32.vlgmr.msra.gmra.mrb[8].mxu0 %v11647_v0  ;;  %2083 = vmatprep.subr.mxu1 %v1823_v30  ;;  %v2796_v30 = vand.u32 4294901760, %v2745_v47  ;;  %v11807_v0 = vsub.f32 %v2748_v32, %v2800_v13 }
 0x136   :  { %8689 = vmatpush3.msra.mxu0 %v2337_v39  ;;  %8690 = vmatprep.mubr.f32.mxu0 %v11591_v54  ;;  %v11751_v39 = vsub.f32 %v11663_v5, %v3695_v15  ;;  %v2755_v15 = vld [vmem:[#allocation2 + $0x1e8] sm:$0xff]  ;;  %v11790_v5 = vsub.f32 %v2752_v41, %v2802_v25  ;;  %v14027_v41 = vand.u32 4294901760, %v11739_v35 }
 0x137   :  { %1989 = vmatmul.mubr.f32.gmra.mrb[4].mxu1 %v11617_v56  ;;  %8693 = vmatprep.subr.mxu0 %v2334_v26  ;;  %v11771_v52 = vpack.c.bf16 %v2796_v30, %v2792_v31  ;;  %14030 = vst [vmem:[#allocation33_spill] sm:$0xff] %v11807_v0 }
 0x138   :  { %2061 = vmatprep.mubr.f32.mxu1 %v13895_v61  ;;  %14018 = vst [vmem:[#allocation23_spill] sm:$0xff] %v11751_v39  ;;  %14024 = vst [vmem:[#allocation29_spill] sm:$0xff] %v11790_v5 }
 0x139   :  { %14021 = vst [vmem:[#allocation26_spill] sm:$0xff] %v11771_v52 }
 0x13b   :  { %2065 = vmatmul.mubr.f32.vlgmr.msra.gmra.mrb[2].mxu1 %v11614_v44 }
 0x13c   :  { %2070 = vmatprep.mubr.f32.mxu1 %v13895_v61  ;;  %2087 = vmatpush1.msra.mxu1 %v1829_v8  ;;  %v11731_v8 = vpack.c.bf16 %v13607_v14, %v13612_v21 }
 0x13d   :  { %8691 = vmatmul.mubr.f32.vlgmr.msra.gmra.mrb[8].mxu0 %v11605_v49  ;;  %2166 = vmatprep.subr.mxu1 %v11569_v3  ;;  %v13609_v3 = vand.u32 4294901760, %v11692_v63 }
 0x13e   :  { %8694 = vmatpush3.msra.mxu0 %v2334_v26  ;;  %8695 = vmatprep.mubr.f32.mxu0 %v11603_v42  ;;  %14014 = vst [vmem:[#allocation18_spill] sm:$0xff] %v11731_v8  ;;  %v2798_v26 = vand.u32 4294901760, %v2749_v28  ;;  %v14025_v42 = vld [vmem:[#allocation55_spill] sm:$0xff] }
 0x13f   :  { %2074 = vmatmul.mubr.f32.gmra.mrb[4].mxu1 %v11628_v57  ;;  %8698 = vmatprep.subr.mxu0 %v11596_v7  ;;  %v11746_v36 = vpack.c.bf16 %v13608_v58, %v13609_v3  ;;  %v11766_v58 = vpack.c.bf16 %v13610_v17, %v13611_v40  ;;  %v11776_v3 = vld [vmem:[#allocation2 + $0x2f8] sm:$0xff]  ;;  %v11780_v17 = vsub.f32 %v2742_v23, %v2792_v31  ;;  %v2806_v23 = vand.u32 4294901760, %v2755_v15 }
 0x140   :  { %2150 = vmatprep.mubr.f32.mxu1 %v13895_v61  ;;  %v11782_v40 = vsub.f32 %v2745_v47, %v2796_v30  ;;  %v11784_v21 = vpack.c.bf16 %v2802_v25, %v2798_v26  ;;  %v11788_v59 = vsub.f32 %v2749_v28, %v2798_v26  ;;  %v14026_v28 = vand.u32 4294901760, %v11725_v2  ;;  %v2760_v30 = vld [vmem:[#allocation2 + $0x210] sm:$0xff] }
 0x141   :  { %14016 = vst [vmem:[#allocation21_spill] sm:$0xff] %v11746_v36  ;;  %14020 = vst [vmem:[#allocation25_spill] sm:$0xff] %v11766_v58 }
 0x142   :  { %14022 = vst [vmem:[#allocation27_spill] sm:$0xff] %v11784_v21  ;;  %14023 = vst [vmem:[#allocation28_spill] sm:$0xff] %v11788_v59  ;;  %v11803_v26 = vpack.c.bf16 %v14027_v41, %v14026_v28  ;;  %v11819_v28 = vsub.f32 %v11681_v16, %v14033_v37  ;;  %v14040_v16 = vand.u32 4294901760, %v11776_v3 }
 0x143   :  { %2152 = vmatmul.mubr.f32.vlgmr.msra.gmra.mrb[2].mxu1 %v11591_v54 }
 0x144   :  { %2157 = vmatprep.mubr.f32.mxu1 %v13895_v61  ;;  %2168 = vmatpush1.msra.mxu1 %v11575_v11  ;;  %v2794_v11 = vand.u32 4294901760, %v2746_v50  ;;  %14028 = vst [vmem:[#allocation30_spill] sm:$0xff] %v11803_v26  ;;  %14034 = vst [vmem:[#allocation36_spill] sm:$0xff] %v11819_v28 }
 0x145   :  { %8696 = vmatmul.mubr.f32.vlgmr.msra.gmra.mrb[8].mxu0 %v11617_v56  ;;  %9770 = vmatprep.subr.bf16.mxu1 %v11677_v43  ;;  %v2764_v56 = vld [vmem:[#allocation2 + $0x230] sm:$0xff] }
 0x146   :  { %8699 = vmatpush3.msra.mxu0 %v11596_v7  ;;  %8700 = vmatprep.mubr.f32.mxu0 %v11614_v44  ;;  %v11748_v12 = vpack.c.bf16 %v2794_v11, %v2790_v6  ;;  %v11760_v14 = vsub.f32 %v2746_v50, %v2794_v11  ;;  %v2804_v50 = vand.u32 4294901760, %v2751_v38  ;;  %v2758_v6 = vld [vmem:[#allocation2 + $0x200] sm:$0xff]  ;;  %v2761_v44 = vld [vmem:[#allocation2 + $0x218] sm:$0xff]  ;;  %v2818_v45 = vand.u32 4294901760, %v2764_v56 }
 0x147   :  { %2159 = vmatmul.mubr.f32.gmra.mrb[4].mxu1 %v11605_v49  ;;  %8703 = vmatprep.subr.mxu0 %v11621_v10  ;;  %v11774_v11 = vld [vmem:[#allocation2 + $0x2e0] sm:$0xff]  ;;  %v2810_v47 = vand.u32 4294901760, %v2758_v6  ;;  %v2814_v41 = vand.u32 4294901760, %v2761_v44 }
 0x148   :  { %2231 = vmatprep.mubr.f32.mxu1 %v13895_v61  ;;  %14017 = vst [vmem:[#allocation22_spill] sm:$0xff] %v11748_v12  ;;  %v11805_v25 = vpack.c.bf16 %v2804_v50, %v2800_v13  ;;  %v11809_v31 = vsub.f32 %v2751_v38, %v2804_v50  ;;  %v14036_v38 = vand.u32 4294901760, %v11754_v53  ;;  %v14039_v37 = vand.u32 4294901760, %v11774_v11 }
 0x149   :  { %v11828_v50 = vpack.c.bf16 %v2810_v47, %v2806_v23 }
 0x14a   :  { %14029 = vst [vmem:[#allocation31_spill] sm:$0xff] %v11805_v25  ;;  %v3806_v13 = vsub.f32 %v11754_v53, %v14036_v38  ;;  %v11838_v62 = vpack.c.bf16 %v14040_v16, %v14039_v37  ;;  %v2766_v37 = vld [vmem:[#allocation2 + $0x240] sm:$0xff]  ;;  %v2769_v16 = vld [vmem:[#allocation2 + $0x258] sm:$0xff]  ;;  %v14044_v53 = vand.u32 4294901760, %v11683_v34 }
 0x14b   :  { %2233 = vmatmul.mubr.f32.vlgmr.msra.gmra.mrb[2].mxu1 %v11591_v54  ;;  %14037 = vst [vmem:[#allocation38_spill] sm:$0xff] %v11828_v50 }
 0x14c   :  { %9772 = vmatpush3.bf16.msra.mxu1 %v11677_v43  ;;  %2238 = vmatprep.mubr.f32.mxu1 %v13895_v61  ;;  %v14035_v43 = vand.u32 4294901760, %v11751_v39  ;;  %14041 = vst [vmem:[#allocation43_spill] sm:$0xff] %v11838_v62 }
 0x14d   :  { %9774 = vmatprep.subr.bf16.mxu1 %v11723_v33  ;;  %8701 = vmatmul.mubr.f32.vlgmr.msra.gmra.mrb[8].mxu0 %v11628_v57  ;;  %v2808_v57 = vand.u32 4294901760, %v2754_v19 }
 0x14e   :  { %8704 = vmatpush3.msra.mxu0 %v11621_v10  ;;  %8705 = vmatprep.mubr.f32.mxu0 %v11591_v54  ;;  %v2812_v10 = vand.u32 4294901760, %v2757_v29  ;;  %v3799_v32 = vsub.f32 %v11751_v39, %v14035_v43  ;;  %v11853_v39 = vsub.f32 %v11683_v34, %v14044_v53 }
 0x14f   :  { %2240 = vmatmul.mubr.f32.gmra.mrb[4].mxu1 %v11605_v49  ;;  %8708 = vmatprep.subr.mxu0 %v11596_v7  ;;  %v11844_v38 = vsub.f32 %v2754_v19, %v2808_v57 }
 0x150   :  { %9776 = vmatpush3.bf16.msra.mxu1 %v11723_v33  ;;  %8745 = vmatprep.mubr.f32.mxu1 %v14025_v42  ;;  %v11814_v33 = vsub.f32 %v11679_v46, %v14031_v20  ;;  %v11830_v20 = vsub.f32 %v2755_v15, %v2806_v23  ;;  %v11832_v46 = vsub.f32 %v2758_v6, %v2810_v47  ;;  %v2767_v15 = vld [vmem:[#allocation2 + $0x248] sm:$0xff]  ;;  %v2770_v23 = vld [vmem:[#allocation2 + $0x260] sm:$0xff]  ;;  %v3800_v6 = vand.u32 4294901760, %v3799_v32 }
 0x151   :  { %9778 = vmatprep.subr.bf16.mxu1 %v11731_v8  ;;  %v11842_v43 = vpack.c.bf16 %v2812_v10, %v2808_v57  ;;  %14043 = vst [vmem:[#allocation45_spill] sm:$0xff] %v11844_v38  ;;  %14045 = vst [vmem:[#allocation49_spill] sm:$0xff] %v11853_v39  ;;  %v14046_v57 = vand.u32 4294901760, %v11685_v48  ;;  %v3807_v47 = vand.u32 4294901760, %v3806_v13  ;;  %v11866_v42 = vsub.f32 %v2761_v44, %v2814_v41 }
 0x152   :  { %14032 = vst [vmem:[#allocation34_spill] sm:$0xff] %v11814_v33  ;;  %14038 = vst [vmem:[#allocation41_spill] sm:$0xff] %v11830_v20  ;;  %v11868_v38 = vsub.f32 %v2764_v56, %v2818_v45  ;;  %v2822_v34 = vand.u32 4294901760, %v2767_v15  ;;  %v2826_v53 = vand.u32 4294901760, %v2770_v23  ;;  %v14054_v32 = vand.u32 4294901760, %v11814_v33 }
 0x153   :  { %14042 = vst [vmem:[#allocation44_spill] sm:$0xff] %v11842_v43  ;;  %v11858_v19 = vsub.f32 %v11685_v48, %v14046_v57  ;;  %14050 = vst [vmem:[#allocation58_spill] sm:$0xff] %v11866_v42  ;;  %v14055_v44 = vand.u32 4294901760, %v11819_v28 }
 0x154   :  { %9780 = vmatpush3.bf16.msra.mxu1 %v11731_v8  ;;  %v2816_v8 = vand.u32 4294901760, %v2760_v30  ;;  %14051 = vst [vmem:[#allocation59_spill] sm:$0xff] %v11868_v38  ;;  %v3813_v13 = vsub.f32 %v11814_v33, %v14054_v32  ;;  %v2775_v38 = vld [vmem:[#allocation2 + $0x288] sm:$0xff]  ;;  %v14057_v32 = vand.u32 4294901760, %v11690_v22 }
 0x155   :  { %9782 = vmatprep.subr.bf16.mxu1 %v11737_v55  ;;  %8706 = vmatmul.mubr.f32.vlgmr.msra.gmra.mrb[8].mxu0 %v11605_v49  ;;  %14047 = vst [vmem:[#allocation32_spill] sm:$0xff] %v11858_v19 }
 0x156   :  { %8709 = vmatpush3.msra.mxu0 %v11596_v7  ;;  %8710 = vmatprep.mubr.f32.mxu0 %v11591_v54  ;;  %v11861_v7 = vsub.f32 %v2757_v29, %v2812_v10  ;;  %v11863_v54 = vpack.c.bf16 %v2818_v45, %v2814_v41  ;;  %v11871_v48 = vpack.c.bf16 %v2820_v51, %v2816_v8  ;;  %v2824_v29 = vand.u32 4294901760, %v2766_v37 }
 0x157   :  { %9578 = vmatprep.subr.bf16.mxu0 %v11748_v12  ;;  %v11873_v57 = vsub.f32 %v2760_v30, %v2816_v8  ;;  %v2828_v10 = vand.u32 4294901760, %v2769_v16  ;;  %v2773_v12 = vld [vmem:[#allocation2 + $0x278] sm:$0xff]  ;;  %v3820_v45 = vsub.f32 %v11819_v28, %v14055_v44  ;;  %v11883_v8 = vpack.c.bf16 %v3807_v47, %v3800_v6 }
 0x158   :  { %14048 = vst [vmem:[#allocation42_spill] sm:$0xff] %v11861_v7  ;;  %14049 = vst [vmem:[#allocation57_spill] sm:$0xff] %v11863_v54  ;;  %9784 = vmatpush3.bf16.msra.mxu1 %v11737_v55  ;;  %v2776_v7 = vld [vmem:[#allocation2 + $0x290] sm:$0xff]  ;;  %v11885_v30 = vsub.f32 %v2763_v18, %v2820_v51  ;;  %v11895_v33 = vsub.f32 %v11690_v22, %v14057_v32  ;;  %v11898_v44 = vpack.c.bf16 %v2826_v53, %v2822_v34  ;;  %v2779_v51 = vld [vmem:[#allocation2 + $0x2a8] sm:$0xff] }
 0x159   :  { %9786 = vmatprep.subr.bf16.mxu1 %v11746_v36  ;;  %14052 = vst [vmem:[#allocation60_spill] sm:$0xff] %v11871_v48  ;;  %14053 = vst [vmem:[#allocation61_spill] sm:$0xff] %v11873_v57  ;;  %v2772_v55 = vld [vmem:[#allocation2 + $0x270] sm:$0xff]  ;;  %v14056_v57 = vand.u32 4294901760, %v11688_v4  ;;  %v11900_v41 = vsub.f32 %v2767_v15, %v2822_v34  ;;  %v2830_v6 = vand.u32 4294901760, %v2773_v12  ;;  %v2834_v47 = vand.u32 4294901760, %v2776_v7 }
 0x15a   :  { %14058 = vst [vmem:[#allocation62_spill] sm:$0xff] %v11895_v33  ;;  %14059 = vst [vmem:[#allocation63_spill] sm:$0xff] %v11898_v44  ;;  %v2782_v18 = vld [vmem:[#allocation2 + $0x2c0] sm:$0xff]  ;;  %v2832_v22 = vand.u32 4294901760, %v2772_v55  ;;  %v2836_v32 = vand.u32 4294901760, %v2775_v38  ;;  %v3814_v56 = vand.u32 4294901760, %v3813_v13  ;;  %v11920_v13 = vsub.f32 %v2766_v37, %v2824_v29 }
 0x15b   :  { %v11890_v42 = vsub.f32 %v11688_v4, %v14056_v57  ;;  %14060 = vst [vmem:[#allocation64_spill] sm:$0xff] %v11900_v41  ;;  %v11904_v4 = vsub.f32 %v2770_v23, %v2826_v53  ;;  %v11906_v57 = vpack.c.bf16 %v2828_v10, %v2824_v29  ;;  %v14063_v15 = vand.u32 4294901760, %v11853_v39 }
 0x15c   :  { %9788 = vmatpush3.bf16.msra.mxu1 %v11746_v36  ;;  %v3821_v36 = vand.u32 4294901760, %v3820_v45  ;;  %v14064_v28 = vand.u32 4294901760, %v11858_v19  ;;  %v2838_v23 = vand.u32 4294901760, %v2779_v51  ;;  %v2842_v53 = vand.u32 4294901760, %v2782_v18 }
 0x15d   :  { %9790 = vmatprep.subr.bf16.mxu1 %v11766_v58  ;;  %8711 = vmatmul.mubr.f32.vlgmr.msra.gmra.mrb[8].mxu0 %v11605_v49  ;;  %14061 = vst [vmem:[#allocation65_spill] sm:$0xff] %v11904_v4  ;;  %14062 = vst [vmem:[#allocation66_spill] sm:$0xff] %v11906_v57  ;;  %v3827_v34 = vsub.f32 %v11853_v39, %v14063_v15  ;;  %v11922_v45 = vsub.f32 %v2769_v16, %v2828_v10  ;;  %v2778_v49 = vld [vmem:[#allocation2 + $0x2a0] sm:$0xff] }
 0x15e   :  { %9580 = vmatpush1.bf16.msra.mxu0 %v11771_v52  ;;  %v3834_v41 = vsub.f32 %v11858_v19, %v14064_v28  ;;  %2886 = vmatprep.mubr.f32.mxu0 %v13895_v61  ;;  %v11924_v15 = vpack.c.bf16 %v2834_v47, %v2830_v6  ;;  %v11926_v39 = vsub.f32 %v2773_v12, %v2830_v6  ;;  %v2781_v52 = vld [vmem:[#allocation2 + $0x2b8] sm:$0xff]  ;;  %v11945_v6 = vld [vmem:[#allocation2 + $0x2f0] sm:$0xff] }
 0x15f   :  { %9582 = vmatprep.subr.bf16.mxu0 %v11784_v21  ;;  %v11929_v28 = vsub.f32 %v2776_v7, %v2834_v47  ;;  %v11931_v21 = vpack.c.bf16 %v2836_v32, %v2832_v22  ;;  %v11933_v19 = vsub.f32 %v2772_v55, %v2832_v22  ;;  %v11941_v16 = vpack.c.bf16 %v3821_v36, %v3814_v56  ;;  %v2785_v7 = vld [vmem:[#allocation2 + $0x2d8] sm:$0xff] }
 0x160   :  { %9792 = vmatpush3.bf16.msra.mxu1 %v11766_v58  ;;  %14065 = vst [vmem:[#allocation67_spill] sm:$0xff] %v11924_v15  ;;  %v14067_v58 = vand.u32 4294901760, %v11692_v63  ;;  %v3828_v12 = vand.u32 4294901760, %v3827_v34  ;;  %v3835_v29 = vand.u32 4294901760, %v3834_v41  ;;  %v11943_v10 = vsub.f32 %v2775_v38, %v2836_v32 }
 0x161   :  { %9794 = vmatprep.subr.bf16.mxu1 %v11803_v26  ;;  %14066 = vst [vmem:[#allocation68_spill] sm:$0xff] %v11931_v21  ;;  %v11948_v55 = vpack.c.bf16 %v2842_v53, %v2838_v23  ;;  %v14069_v47 = vand.u32 4294901760, %v11890_v42  ;;  %v14071_v56 = vand.u32 4294901760, %v11696_v1  ;;  %v11962_v41 = vsub.f32 %v2779_v51, %v2838_v23  ;;  %v11976_v51 = vld [vmem:[#allocation2 + $0x2e8] sm:$0xff] }
 0x162   :  { %v11938_v37 = vsub.f32 %v11692_v63, %v14067_v58  ;;  %9584 = vmatpush1.bf16.msra.mxu0 %v11805_v25  ;;  %v14070_v58 = vand.u32 4294901760, %v11895_v33  ;;  %v2840_v22 = vand.u32 4294901760, %v2778_v49  ;;  %v2844_v32 = vand.u32 4294901760, %v2781_v52 }
 0x163   :  { %9586 = vmatprep.subr.bf16.mxu0 %v11828_v50  ;;  %14068 = vst [vmem:[#allocation69_spill] sm:$0xff] %v11948_v55  ;;  %v3841_v63 = vsub.f32 %v11890_v42, %v14069_v47  ;;  %v11959_v38 = vsub.f32 %v11696_v1, %v14071_v56  ;;  %v14072_v34 = vand.u32 4294901760, %v11702_v27  ;;  %v11970_v47 = vsub.f32 %v2782_v18, %v2842_v53  ;;  %v11974_v56 = vld [vmem:[#allocation2 + $0x2d0] sm:$0xff] }
 0x164   :  { %v3848_v36 = vsub.f32 %v11895_v33, %v14070_v58  ;;  %9796 = vmatpush3.bf16.msra.mxu1 %v11803_v26  ;;  %v2846_v58 = vand.u32 4294901760, %v2785_v7  ;;  %v11979_v23 = vpack.c.bf16 %v3835_v29, %v3828_v12  ;;  %v11981_v26 = vsub.f32 %v2778_v49, %v2840_v22  ;;  %v14079_v49 = vld [vmem:[#allocation56_spill] sm:$0xff] }
 0x165   :  { %v11967_v50 = vsub.f32 %v11702_v27, %v14072_v34  ;;  %9798 = vmatprep.subr.bf16.mxu1 %v11838_v62  ;;  %v14073_v18 = vand.u32 4294901760, %v11704_v24  ;;  %v3842_v34 = vand.u32 4294901760, %v3841_v63  ;;  %v13683_v25 = vand.u32 4294901760, %v11959_v38 }
 0x166   :  { %9588 = vmatpush1.bf16.msra.mxu0 %v11842_v43  ;;  %v3849_v1 = vand.u32 4294901760, %v3848_v36  ;;  %v11993_v12 = vpack.c.bf16 %v2844_v32, %v2840_v22  ;;  %v14075_v63 = vand.u32 4294901760, %v11945_v6  ;;  %v14077_v33 = vand.u32 4294901760, %v11938_v37 }
 0x167   :  { %v11987_v53 = vsub.f32 %v11704_v24, %v14073_v18  ;;  %9590 = vmatprep.subr.bf16.mxu0 %v11863_v54  ;;  %v11999_v24 = vsub.f32 %v2781_v52, %v2844_v32  ;;  %v12005_v18 = vsub.f32 %v2785_v7, %v2846_v58  ;;  %v14078_v29 = vand.u32 4294901760, %v11758_v60 }
 0x168   :  { %9800 = vmatpush3.bf16.msra.mxu1 %v11838_v62  ;;  %14074 = vst [vmem:[#allocation70_spill] sm:$0xff] %v11993_v12  ;;  %v12003_v36 = vpack.c.bf16 %v14075_v63, %v2846_v58  ;;  %v3855_v22 = vsub.f32 %v11938_v37, %v14077_v33  ;;  %v12021_v7 = vpack.c.bf16 %v3849_v1, %v3842_v34  ;;  %v14080_v58 = vand.u32 4294901760, %v11760_v14 }
 0x169   :  { %9802 = vmatprep.subr.bf16.mxu1 %v11883_v8  ;;  %v12014_v27 = vsub.f32 %v11758_v60, %v14078_v29  ;;  %v3862_v33 = vsub.f32 %v11959_v38, %v13683_v25  ;;  %v14081_v63 = vand.u32 4294901760, %v11974_v56  ;;  %v14082_v32 = vand.u32 4294901760, %v11976_v51 }
 0x16a   :  { %14076 = vst [vmem:[#allocation71_spill] sm:$0xff] %v12003_v36  ;;  %9592 = vmatpush1.bf16.msra.mxu0 %v11871_v48  ;;  %v2924_v29 = vsub.f32 %v11760_v14, %v14080_v58  ;;  %v14084_v1 = vand.u32 4294901760, %v11967_v50  ;;  %v14086_v52 = vand.u32 4294901760, %v11739_v35  ;;  %v14088_v54 = vand.u32 4294901760, %v11780_v17 }
 0x16b   :  { %8746 = vmatmul.mubr.f32.vlgmr.msra.gmra.mrb[6].mxu1 %v14079_v49  ;;  %9594 = vmatprep.subr.bf16.mxu0 %v11898_v44  ;;  %v12035_v48 = vpack.c.bf16 %v14082_v32, %v14081_v63  ;;  %v14085_v44 = vand.u32 4294901760, %v11725_v2  ;;  %v2913_v25 = vand.u32 4294901760, %v12014_v27  ;;  %v14089_v43 = vand.u32 4294901760, %v11782_v40 }
 0x16c   :  { %9804 = vmatpush3.bf16.msra.mxu1 %v11883_v8  ;;  %v3869_v34 = vsub.f32 %v11967_v50, %v14084_v1  ;;  %8780 = vmatprep.mubr.f32.mxu1 %v14000_v9  ;;  %v3856_v8 = vand.u32 4294901760, %v3855_v22  ;;  %v12051_v32 = vsub.f32 %v11739_v35, %v14086_v52  ;;  %v2918_v22 = vsub.f32 %v11780_v17, %v14088_v54 }
 0x16d   :  { %14083 = vst [vmem:[#allocation72_spill] sm:$0xff] %v12035_v48  ;;  %v12044_v58 = vsub.f32 %v11725_v2, %v14085_v44  ;;  %9806 = vmatprep.subr.bf16.mxu1 %v11941_v16  ;;  %v14087_v2 = vand.u32 4294901760, %v11987_v53  ;;  %v2930_v35 = vsub.f32 %v11782_v40, %v14089_v43  ;;  %v3863_v52 = vand.u32 4294901760, %v3862_v33 }
 0x16e   :  { %9596 = vmatpush1.bf16.msra.mxu0 %v11906_v57  ;;  %v2925_v1 = vand.u32 4294901760, %v2924_v29  ;;  %v14090_v63 = vand.u32 4294901760, %v11788_v59  ;;  %v14091_v57 = vand.u32 4294901760, %v11774_v11  ;;  %v3870_v54 = vand.u32 4294901760, %v3869_v34 }
 0x16f   :  { %v3876_v44 = vsub.f32 %v11987_v53, %v14087_v2  ;;  %9598 = vmatprep.subr.bf16.mxu0 %v11924_v15  ;;  %v14092_v62 = vand.u32 4294901760, %v11790_v5  ;;  %v14093_v33 = vand.u32 4294901760, %v11776_v3  ;;  %v2919_v9 = vand.u32 4294901760, %v2918_v22  ;;  %v14099_v22 = vld [vmem:[#allocation42_spill] sm:$0xff] }
 0x170   :  { %v2936_v27 = vsub.f32 %v11788_v59, %v14090_v63  ;;  %v12073_v2 = vsub.f32 %v11774_v11, %v14091_v57  ;;  %9808 = vmatpush3.bf16.msra.mxu1 %v11941_v16  ;;  %v14095_v11 = vand.u32 4294901760, %v11807_v0  ;;  %v14096_v16 = vand.u32 4294901760, %v11809_v31 }
 0x171   :  { %v2948_v43 = vsub.f32 %v11790_v5, %v14092_v62  ;;  %v12083_v29 = vsub.f32 %v11776_v3, %v14093_v33  ;;  %9810 = vmatprep.subr.bf16.mxu1 %v11979_v23  ;;  %v3877_v15 = vand.u32 4294901760, %v3876_v44  ;;  %v2931_v3 = vand.u32 4294901760, %v2930_v35 }
 0x172   :  { %v2942_v57 = vsub.f32 %v11807_v0, %v14095_v11  ;;  %v2954_v34 = vsub.f32 %v11809_v31, %v14096_v16  ;;  %9600 = vmatpush1.bf16.msra.mxu0 %v11931_v21  ;;  %v9817_v63 = vpack.c.bf16 %v3863_v52, %v3856_v8  ;;  %v2937_v5 = vand.u32 4294901760, %v2936_v27  ;;  %v14097_v11 = vld [vmem:[#allocation45_spill] sm:$0xff] }
 0x173   :  { %14094 = vst [vmem:[#allocation73_spill] sm:$0xff] %v12083_v29  ;;  %9602 = vmatprep.subr.bf16.mxu0 %v11948_v55  ;;  %v2949_v16 = vand.u32 4294901760, %v2948_v43  ;;  %v14098_v62 = vand.u32 4294901760, %v12044_v58  ;;  %v14100_v8 = vand.u32 4294901760, %v12051_v32  ;;  %v14101_v0 = vand.u32 4294901760, %v11830_v20 }
 0x174   :  { %9812 = vmatpush3.bf16.msra.mxu1 %v11979_v23  ;;  %v2943_v27 = vand.u32 4294901760, %v2942_v57  ;;  %v2955_v59 = vand.u32 4294901760, %v2954_v34  ;;  %v9609_v43 = vpack.c.bf16 %v2925_v1, %v2913_v25  ;;  %v9611_v33 = vpack.c.bf16 %v2931_v3, %v2919_v9 }
 0x175   :  { %v3883_v21 = vsub.f32 %v12044_v58, %v14098_v62  ;;  %9814 = vmatprep.subr.bf16.mxu1 %v12021_v7  ;;  %v3890_v52 = vsub.f32 %v12051_v32, %v14100_v8  ;;  %v2960_v23 = vsub.f32 %v11830_v20, %v14101_v0  ;;  %v9821_v62 = vpack.c.bf16 %v3877_v15, %v3870_v54  ;;  %v14105_v0 = vld [vmem:[#allocation58_spill] sm:$0xff] }
 0x176   :  { %9604 = vmatpush1.bf16.msra.mxu0 %v11993_v12  ;;  %v14102_v44 = vand.u32 4294901760, %v11832_v46  ;;  %v14103_v55 = vand.u32 4294901760, %v12073_v2  ;;  %v14104_v34 = vand.u32 4294901760, %v14097_v11  ;;  %v14106_v12 = vld [vmem:[#allocation59_spill] sm:$0xff]  ;;  %v9613_v9 = vpack.c.bf16 %v2949_v16, %v2937_v5 }
 0x177   :  { %9606 = vmatprep.subr.bf16.mxu0 %v12003_v36  ;;  %v3884_v15 = vand.u32 4294901760, %v3883_v21  ;;  %v14107_v1 = vand.u32 4294901760, %v12083_v29  ;;  %v14108_v3 = vand.u32 4294901760, %v14099_v22  ;;  %v9615_v36 = vpack.c.bf16 %v2955_v59, %v2943_v27  ;;  %v14110_v21 = vld [vmem:[#allocation64_spill] sm:$0xff]  ;;  %v14113_v16 = vld [vmem:[#allocation55_spill] sm:$0xff] }
 0x178   :  { %v2972_v35 = vsub.f32 %v11832_v46, %v14102_v44  ;;  %v3897_v57 = vsub.f32 %v12073_v2, %v14103_v55  ;;  %v2966_v8 = vsub.f32 %v14097_v11, %v14104_v34  ;;  %9816 = vmatpush3.bf16.msra.mxu1 %v12021_v7  ;;  %v3891_v44 = vand.u32 4294901760, %v3890_v52  ;;  %v14109_v11 = vld [vmem:[#allocation61_spill] sm:$0xff] }
 0x179   :  { %v3904_v54 = vsub.f32 %v12083_v29, %v14107_v1  ;;  %v2978_v55 = vsub.f32 %v14099_v22, %v14108_v3  ;;  %9818 = vmatprep.subr.bf16.mxu1 %v9817_v63  ;;  %v2961_v34 = vand.u32 4294901760, %v2960_v23  ;;  %v13716_v20 = vand.u32 4294901760, %v14109_v11 }
 0x17a   :  { %9608 = vmatpush1.bf16.msra.mxu0 %v12035_v48  ;;  %v2973_v25 = vand.u32 4294901760, %v2972_v35  ;;  %v3898_v1 = vand.u32 4294901760, %v3897_v57  ;;  %v2967_v29 = vand.u32 4294901760, %v2966_v8  ;;  %v14111_v3 = vand.u32 4294901760, %v14105_v0 }
 0x17b   :  { %9610 = vmatprep.subr.bf16.mxu0 %v9609_v43  ;;  %v14112_v59 = vand.u32 4294901760, %v14106_v12  ;;  %v3905_v23 = vand.u32 4294901760, %v3904_v54  ;;  %v2979_v35 = vand.u32 4294901760, %v2978_v55  ;;  %v9825_v43 = vpack.c.bf16 %v3891_v44, %v3884_v15 }
 0x17c   :  { %v2984_v52 = vsub.f32 %v14105_v0, %v14111_v3  ;;  %9820 = vmatpush3.bf16.msra.mxu1 %v9817_v63  ;;  %v2990_v57 = vsub.f32 %v14109_v11, %v13716_v20  ;;  %v14114_v63 = vand.u32 4294901760, %v11885_v30  ;;  %v14115_v55 = vand.u32 4294901760, %v14110_v21 }
 0x17d   :  { %v2996_v27 = vsub.f32 %v14106_v12, %v14112_v59  ;;  %9822 = vmatprep.subr.bf16.mxu1 %v9821_v62  ;;  %2892 = vmatmul.mubr.f32.vlgmr.msra.gmra.mrb[10].mxu0 %v14113_v16  ;;  %v14116_v7 = vand.u32 4294901760, %v11904_v4  ;;  %v14117_v44 = vand.u32 4294901760, %v11945_v6  ;;  %v9619_v5 = vpack.c.bf16 %v2979_v35, %v2967_v29 }
 0x17e   :  { %9612 = vmatpush1.bf16.msra.mxu0 %v9611_v33  ;;  %v3002_v54 = vsub.f32 %v11885_v30, %v14114_v63  ;;  %v3008_v59 = vsub.f32 %v14110_v21, %v14115_v55  ;;  %2897 = vmatprep.mubr.f32.mxu0 %v13895_v61  ;;  %v9617_v33 = vpack.c.bf16 %v2973_v25, %v2961_v34  ;;  %v2985_v3 = vand.u32 4294901760, %v2984_v52 }
 0x17f   :  { %v3020_v15 = vsub.f32 %v11904_v4, %v14116_v7  ;;  %v12164_v20 = vsub.f32 %v11945_v6, %v14117_v44  ;;  %9614 = vmatprep.subr.bf16.mxu0 %v9613_v9  ;;  %v2997_v8 = vand.u32 4294901760, %v2996_v27  ;;  %v9829_v63 = vpack.c.bf16 %v3905_v23, %v3898_v1 }
 0x180   :  { %9824 = vmatpush3.bf16.msra.mxu1 %v9821_v62  ;;  %v14118_v55 = vand.u32 4294901760, %v11920_v13  ;;  %v14119_v7 = vand.u32 4294901760, %v11922_v45  ;;  %v14120_v4 = vand.u32 4294901760, %v11926_v39  ;;  %v14121_v25 = vand.u32 4294901760, %v11929_v28 }
 0x181   :  { %9826 = vmatprep.subr.bf16.mxu1 %v9825_v43  ;;  %v13724_v62 = vand.u32 4294901760, %v11933_v19  ;;  %v13721_v29 = vand.u32 4294901760, %v11943_v10  ;;  %2903 = vmatmul.mubr.f32.gmra.mrb[12].mxu0 %v14079_v49  ;;  %v2991_v34 = vand.u32 4294901760, %v2990_v57  ;;  %v3003_v1 = vand.u32 4294901760, %v3002_v54  ;;  %v14126_v57 = vld [vmem:[#allocation23_spill] sm:$0xff]  ;;  %v14127_v54 = vld [vmem:[#allocation24_spill] sm:$0xff] }
 0x182   :  { %v3014_v16 = vsub.f32 %v11920_v13, %v14118_v55  ;;  %v3026_v48 = vsub.f32 %v11922_v45, %v14119_v7  ;;  %v3032_v6 = vsub.f32 %v11926_v39, %v14120_v4  ;;  %v3044_v9 = vsub.f32 %v11929_v28, %v14121_v25  ;;  %9616 = vmatpush1.bf16.msra.mxu0 %v9615_v36 }
 0x183   :  { %v3009_v52 = vand.u32 4294901760, %v3008_v59  ;;  %v3021_v27 = vand.u32 4294901760, %v3020_v15  ;;  %3133 = vmatprep.mubr.f32.mxu0 %v13895_v61  ;;  %v14122_v23 = vand.u32 4294901760, %v11974_v56  ;;  %9618 = vmatprep.subr.bf16.mxu0 %v9617_v33  ;;  %v9621_v35 = vpack.c.bf16 %v2997_v8, %v2985_v3 }
 0x184   :  { %v13722_v44 = vand.u32 4294901760, %v11962_v41  ;;  %v13723_v55 = vand.u32 4294901760, %v11970_v47  ;;  %v14124_v7 = vand.u32 4294901760, %v11976_v51  ;;  %9828 = vmatpush3.bf16.msra.mxu1 %v9825_v43  ;;  %v9833_v59 = vpack.c.bf16 %v14127_v54, %v14126_v57 }
 0x185   :  { %v12185_v4 = vsub.f32 %v11974_v56, %v14122_v23  ;;  %v3015_v15 = vand.u32 4294901760, %v3014_v16  ;;  %v3027_v25 = vand.u32 4294901760, %v3026_v48  ;;  %9830 = vmatprep.subr.bf16.mxu1 %v9829_v63  ;;  %v3033_v56 = vand.u32 4294901760, %v3032_v6 }
 0x186   :  { %v12192_v36 = vsub.f32 %v11976_v51, %v14124_v7  ;;  %v3045_v23 = vand.u32 4294901760, %v3044_v9  ;;  %v3038_v8 = vsub.f32 %v11933_v19, %v13724_v62  ;;  %v3050_v3 = vsub.f32 %v11943_v10, %v13721_v29  ;;  %9620 = vmatpush1.bf16.msra.mxu0 %v9619_v5  ;;  %v14128_v5 = vld [vmem:[#allocation34_spill] sm:$0xff]  ;;  %v14130_v9 = vld [vmem:[#allocation51_spill] sm:$0xff] }
 0x187   :  { %14123 = vst [vmem:[#allocation42_spill] sm:$0xff] %v12185_v4  ;;  %v9623_v51 = vpack.c.bf16 %v3003_v1, %v2991_v34  ;;  %v9625_v33 = vpack.c.bf16 %v3021_v27, %v3009_v52  ;;  %v13726_v43 = vand.u32 4294901760, %v11981_v26  ;;  %v13725_v7 = vand.u32 4294901760, %v11999_v24  ;;  %9622 = vmatprep.subr.bf16.mxu0 %v9621_v35  ;;  %v14129_v34 = vld [vmem:[#allocation36_spill] sm:$0xff] }
 0x188   :  { %14125 = vst [vmem:[#allocation58_spill] sm:$0xff] %v12192_v36  ;;  %v3056_v48 = vsub.f32 %v11962_v41, %v13722_v44  ;;  %v3068_v16 = vsub.f32 %v11970_v47, %v13723_v55  ;;  %v13727_v6 = vand.u32 4294901760, %v12005_v18  ;;  %9832 = vmatpush3.bf16.msra.mxu1 %v9829_v63  ;;  %v9837_v1 = vpack.c.bf16 %v14129_v34, %v14128_v5 }
 0x189   :  { %9834 = vmatprep.subr.bf16.mxu1 %v9833_v59  ;;  %v9627_v52 = vpack.c.bf16 %v3027_v25, %v3015_v15  ;;  %v9629_v27 = vpack.c.bf16 %v3045_v23, %v3033_v56  ;;  %v3039_v35 = vand.u32 4294901760, %v3038_v8  ;;  %v3051_v29 = vand.u32 4294901760, %v3050_v3  ;;  %v14132_v3 = vld [vmem:[#allocation50_spill] sm:$0xff] }
 0x18a   :  { %9624 = vmatpush1.bf16.msra.mxu0 %v9623_v51  ;;  %v3062_v44 = vsub.f32 %v11981_v26, %v13726_v43  ;;  %v3074_v55 = vsub.f32 %v11999_v24, %v13725_v7  ;;  %v13729_v62 = vand.u32 4294901760, %v12185_v4  ;;  %v3057_v15 = vand.u32 4294901760, %v3056_v48  ;;  %v14133_v51 = vld [vmem:[#allocation49_spill] sm:$0xff]  ;;  %v14134_v7 = vld [vmem:[#allocation32_spill] sm:$0xff] }
 0x18b   :  { %8781 = vmatmul.mubr.f32.vlgmr.msra.gmra.mrb[6].mxu1 %v14130_v9  ;;  %9626 = vmatprep.subr.bf16.mxu0 %v9625_v33  ;;  %v3069_v25 = vand.u32 4294901760, %v3068_v16  ;;  %v3080_v56 = vsub.f32 %v12005_v18, %v13727_v6  ;;  %v14131_v23 = vand.u32 4294901760, %v12164_v20  ;;  %v9841_v43 = vpack.c.bf16 %v14134_v7, %v14133_v51  ;;  %v14136_v7 = vld [vmem:[#allocation62_spill] sm:$0xff] }
 0x18c   :  { %9836 = vmatpush3.bf16.msra.mxu1 %v9833_v59  ;;  %8815 = vmatprep.mubr.f32.mxu1 %v14132_v3  ;;  %v9631_v63 = vpack.c.bf16 %v3051_v29, %v3039_v35  ;;  %v3063_v33 = vand.u32 4294901760, %v3062_v44  ;;  %v3075_v48 = vand.u32 4294901760, %v3074_v55  ;;  %v3086_v16 = vsub.f32 %v12185_v4, %v13729_v62  ;;  %v14158_v62 = vld [vmem:[#allocation38_spill] sm:$0xff] }
 0x18d   :  { %v3092_v8 = vsub.f32 %v12164_v20, %v14131_v23  ;;  %9838 = vmatprep.subr.bf16.mxu1 %v9837_v1  ;;  %v14135_v6 = vand.u32 4294901760, %v12192_v36  ;;  %v9633_v59 = vpack.c.bf16 %v3069_v25, %v3057_v15  ;;  %v3081_v23 = vand.u32 4294901760, %v3080_v56  ;;  %v14139_v25 = vld [vmem:[#allocation47_spill] sm:$0xff] }
 0x18e   :  { %9628 = vmatpush1.bf16.msra.mxu0 %v9627_v52  ;;  %v9845_v29 = vpack.c.bf16 %v14136_v7, %v11890_v42  ;;  %v9635_v44 = vpack.c.bf16 %v3075_v48, %v3063_v33  ;;  %v3087_v55 = vand.u32 4294901760, %v3086_v16  ;;  %v9857_v56 = vpack.c.bf16 %v12051_v32, %v12044_v58  ;;  %v14141_v48 = vld [vmem:[#allocation41_spill] sm:$0xff] }
 0x18f   :  { %v3098_v49 = vsub.f32 %v12192_v36, %v14135_v6  ;;  %9630 = vmatprep.subr.bf16.mxu0 %v9629_v27  ;;  %v3093_v34 = vand.u32 4294901760, %v3092_v8  ;;  %v9849_v6 = vpack.c.bf16 %v11959_v38, %v11938_v37  ;;  %v14140_v8 = vld [vmem:[#allocation33_spill] sm:$0xff]  ;;  %v9649_v16 = vpack.c.bf16 %v11832_v46, %v14141_v48 }
 0x190   :  { %9840 = vmatpush3.bf16.msra.mxu1 %v9837_v1  ;;  %v9641_v1 = vpack.c.bf16 %v11760_v14, %v11758_v60  ;;  %v9647_v33 = vpack.c.bf16 %v11809_v31, %v14140_v8 }
 0x191   :  { %9842 = vmatprep.subr.bf16.mxu1 %v9841_v43  ;;  %v3099_v52 = vand.u32 4294901760, %v3098_v49  ;;  %v9637_v35 = vpack.c.bf16 %v3093_v34, %v3081_v23  ;;  %v9643_v49 = vpack.c.bf16 %v11782_v40, %v11780_v17  ;;  %v14138_v34 = vld [vmem:[#allocation29_spill] sm:$0xff] }
 0x192   :  { %9632 = vmatpush1.bf16.msra.mxu0 %v9631_v63  ;;  %v9853_v63 = vpack.c.bf16 %v11987_v53, %v11967_v50 }
 0x193   :  { %9634 = vmatprep.subr.bf16.mxu0 %v9633_v59  ;;  %v9639_v27 = vpack.c.bf16 %v3099_v52, %v3087_v55  ;;  %v14142_v59 = vld [vmem:[#allocation73_spill] sm:$0xff]  ;;  %v9653_v55 = vpack.c.bf16 %v14106_v12, %v14105_v0  ;;  %v9655_v52 = vpack.c.bf16 %v11885_v30, %v14109_v11 }
 0x194   :  { %9844 = vmatpush3.bf16.msra.mxu1 %v9841_v43  ;;  %v14137_v43 = vld [vmem:[#allocation28_spill] sm:$0xff]  ;;  %v9861_v23 = vpack.c.bf16 %v14142_v59, %v12073_v2 }
 0x195   :  { %9846 = vmatprep.subr.bf16.mxu1 %v9845_v29  ;;  %v9645_v15 = vpack.c.bf16 %v14138_v34, %v14137_v43 }
 0x196   :  { %9636 = vmatpush1.bf16.msra.mxu0 %v9635_v44 }
 0x197   :  { %9638 = vmatprep.subr.bf16.mxu0 %v9637_v35  ;;  %v14144_v35 = vld [vmem:[#allocation65_spill] sm:$0xff] }
 0x198   :  { %9848 = vmatpush3.bf16.msra.mxu1 %v9845_v29  ;;  %v14143_v29 = vld [vmem:[#allocation45_spill] sm:$0xff] }
 0x199   :  { %9850 = vmatprep.subr.bf16.mxu1 %v9849_v6  ;;  %v9651_v44 = vpack.c.bf16 %v14099_v22, %v14143_v29 }
 0x19a   :  { %9640 = vmatpush1.bf16.msra.mxu0 %v9639_v27  ;;  %v14145_v27 = vld [vmem:[#allocation15_spill] sm:$0xff] }
 0x19b   :  { %9642 = vmatprep.subr.bf16.mxu0 %v9641_v1  ;;  %v9659_v1 = vpack.c.bf16 %v11922_v45, %v11920_v13 }
 0x19c   :  { %9852 = vmatpush3.bf16.msra.mxu1 %v9849_v6  ;;  %v9657_v6 = vpack.c.bf16 %v14144_v35, %v14110_v21 }
 0x19d   :  { %9854 = vmatprep.subr.bf16.mxu1 %v9853_v63  ;;  %3135 = vmatmul.mubr.f32.vlgmr.msra.gmra.mrb[10].mxu0 %v14139_v25 }
 0x19e   :  { %9644 = vmatpush1.bf16.msra.mxu0 %v9643_v49  ;;  %3140 = vmatprep.mubr.f32.mxu0 %v13895_v61  ;;  %v9661_v49 = vpack.c.bf16 %v11929_v28, %v11926_v39 }
 0x19f   :  { %9646 = vmatprep.subr.bf16.mxu0 %v9645_v15  ;;  %v14147_v15 = vld [vmem:[#allocation52_spill] sm:$0xff] }
 0x1a0   :  { %9856 = vmatpush3.bf16.msra.mxu1 %v9853_v63  ;;  %v14146_v63 = vld [vmem:[#allocation53_spill] sm:$0xff] }
 0x1a1   :  { %9858 = vmatprep.subr.bf16.mxu1 %v9857_v56  ;;  %3142 = vmatmul.mubr.f32.gmra.mrb[12].mxu0 %v14130_v9 }
 0x1a2   :  { %9648 = vmatpush1.bf16.msra.mxu0 %v9647_v33  ;;  %3276 = vmatprep.mubr.f32.mxu0 %v13895_v61  ;;  %v9663_v33 = vpack.c.bf16 %v11943_v10, %v11933_v19 }
 0x1a3   :  { %9650 = vmatprep.subr.bf16.mxu0 %v9649_v16  ;;  %v9665_v16 = vpack.c.bf16 %v11970_v47, %v11962_v41 }
 0x1a4   :  { %9860 = vmatpush3.bf16.msra.mxu1 %v9857_v56  ;;  %v14148_v56 = vld [vmem:[#allocation17_spill] sm:$0xff] }
 0x1a5   :  { %9862 = vmatprep.subr.bf16.mxu1 %v9861_v23 }
 0x1a6   :  { %9652 = vmatpush1.bf16.msra.mxu0 %v9651_v44  ;;  %v9667_v44 = vpack.c.bf16 %v11999_v24, %v11981_v26 }
 0x1a7   :  { %9654 = vmatprep.subr.bf16.mxu0 %v9653_v55  ;;  %v9669_v55 = vpack.c.bf16 %v12164_v20, %v12005_v18 }
 0x1a8   :  { %9864 = vmatpush3.bf16.msra.mxu1 %v9861_v23  ;;  %v14149_v23 = vld [vmem:[#allocation18_spill] sm:$0xff] }
 0x1a9   :  { %9866 = vmatprep.subr.bf16.mxu1 %v14145_v27 }
 0x1aa   :  { %9656 = vmatpush1.bf16.msra.mxu0 %v9655_v52  ;;  %v14150_v52 = vld [vmem:[#allocation20_spill] sm:$0xff] }
 0x1ab   :  { %8816 = vmatmul.mubr.f32.vlgmr.msra.gmra.mrb[6].mxu1 %v14146_v63  ;;  %9658 = vmatprep.subr.bf16.mxu0 %v9657_v6  ;;  %v9671_v6 = vpack.c.bf16 %v12192_v36, %v12185_v4  ;;  %v14168_v4 = vld [vmem:[#allocation54_spill] sm:$0xff] }
 0x1ac   :  { %9868 = vmatpush3.bf16.msra.mxu1 %v14145_v27  ;;  %8850 = vmatprep.mubr.f32.mxu1 %v14147_v15 }
 0x1ad   :  { %9870 = vmatprep.subr.bf16.mxu1 %v14148_v56 }
 0x1ae   :  { %9660 = vmatpush1.bf16.msra.mxu0 %v9659_v1  ;;  %v14151_v1 = vld [vmem:[#allocation21_spill] sm:$0xff] }
 0x1af   :  { %9662 = vmatprep.subr.bf16.mxu0 %v9661_v49  ;;  %v14152_v49 = vld [vmem:[#allocation22_spill] sm:$0xff] }
 0x1b0   :  { %9872 = vmatpush3.bf16.msra.mxu1 %v14148_v56 }
 0x1b1   :  { %9874 = vmatprep.subr.bf16.mxu1 %v14149_v23 }
 0x1b2   :  { %9664 = vmatpush1.bf16.msra.mxu0 %v9663_v33  ;;  %v14153_v33 = vld [vmem:[#allocation25_spill] sm:$0xff] }
 0x1b3   :  { %9666 = vmatprep.subr.bf16.mxu0 %v9665_v16  ;;  %v14154_v16 = vld [vmem:[#allocation26_spill] sm:$0xff] }
 0x1b4   :  { %9876 = vmatpush3.bf16.msra.mxu1 %v14149_v23 }
 0x1b5   :  { %9878 = vmatprep.subr.bf16.mxu1 %v14150_v52 }
 0x1b6   :  { %9668 = vmatpush1.bf16.msra.mxu0 %v9667_v44  ;;  %v14155_v44 = vld [vmem:[#allocation27_spill] sm:$0xff] }
 0x1b7   :  { %9670 = vmatprep.subr.bf16.mxu0 %v9669_v55  ;;  %v14156_v55 = vld [vmem:[#allocation30_spill] sm:$0xff] }
 0x1b8   :  { %9880 = vmatpush3.bf16.msra.mxu1 %v14150_v52 }
 0x1b9   :  { %9882 = vmatprep.subr.bf16.mxu1 %v14151_v1 }
 0x1ba   :  { %9672 = vmatpush1.bf16.msra.mxu0 %v9671_v6  ;;  %v14157_v6 = vld [vmem:[#allocation31_spill] sm:$0xff] }
 0x1bb   :  { %9674 = vmatprep.subr.bf16.mxu0 %v14152_v49 }
 0x1bc   :  { %9884 = vmatpush3.bf16.msra.mxu1 %v14151_v1  ;;  %v14163_v1 = vld [vmem:[#allocation57_spill] sm:$0xff] }
 0x1bd   :  { %9886 = vmatprep.subr.bf16.mxu1 %v14153_v33  ;;  %3279 = vmatmul.mubr.f32.vlgmr.msra.gmra.mrb[10].mxu0 %v14132_v3  ;;  %v14159_v3 = vld [vmem:[#allocation43_spill] sm:$0xff] }
 0x1be   :  { %9676 = vmatpush1.bf16.msra.mxu0 %v14154_v16  ;;  %3284 = vmatprep.mubr.f32.mxu0 %v13895_v61  ;;  %v14160_v16 = vand.u32 4294901760, %v14126_v57  ;;  %v14169_v57 = vld [vmem:[#allocation63_spill] sm:$0xff] }
 0x1bf   :  { %9678 = vmatprep.subr.bf16.mxu0 %v14155_v44  ;;  %v14161_v44 = vand.u32 4294901760, %v14127_v54  ;;  %v14170_v54 = vand.u32 4294901760, %v14133_v51  ;;  %v14179_v51 = vand.u32 4294901760, %v11938_v37  ;;  %v14187_v37 = vld [vmem:[#allocation72_spill] sm:$0xff] }
 0x1c0   :  { %9888 = vmatpush3.bf16.msra.mxu1 %v14153_v33  ;;  %v14162_v33 = vld [vmem:[#allocation44_spill] sm:$0xff] }
 0x1c1   :  { %9890 = vmatprep.subr.bf16.mxu1 %v14156_v55  ;;  %3287 = vmatmul.mubr.f32.gmra.mrb[12].mxu0 %v14146_v63  ;;  %v9897_v49 = vpack.c.bf16 %v14161_v44, %v14160_v16  ;;  %v14164_v63 = vand.u32 4294901760, %v14128_v5  ;;  %v14171_v16 = vld [vmem:[#allocation32_spill] sm:$0xff]  ;;  %v14174_v5 = vld [vmem:[#allocation67_spill] sm:$0xff] }
 0x1c2   :  { %9680 = vmatpush1.bf16.msra.mxu0 %v14157_v6  ;;  %3389 = vmatprep.mubr.f32.mxu0 %v13895_v61  ;;  %v14165_v6 = vld [vmem:[#allocation36_spill] sm:$0xff]  ;;  %v14172_v44 = vand.u32 4294901760, %v14171_v16 }
 0x1c3   :  { %9682 = vmatprep.subr.bf16.mxu0 %v14158_v62  ;;  %v14166_v62 = vand.u32 4294901760, %v14165_v6 }
 0x1c4   :  { %9892 = vmatpush3.bf16.msra.mxu1 %v14156_v55  ;;  %v14167_v55 = vld [vmem:[#allocation60_spill] sm:$0xff] }
 0x1c5   :  { %9894 = vmatprep.subr.bf16.mxu1 %v14159_v3  ;;  %v9901_v36 = vpack.c.bf16 %v14166_v62, %v14164_v63  ;;  %v14175_v62 = vand.u32 4294901760, %v11890_v42  ;;  %v14176_v63 = vand.u32 4294901760, %v14136_v7  ;;  %v14183_v42 = vand.u32 4294901760, %v11758_v60 }
 0x1c6   :  { %9684 = vmatpush1.bf16.msra.mxu0 %v14162_v33  ;;  %v14173_v33 = vld [vmem:[#allocation66_spill] sm:$0xff]  ;;  %v14184_v7 = vand.u32 4294901760, %v11760_v14  ;;  %v14190_v60 = vand.u32 4294901760, %v14137_v43  ;;  %v14191_v14 = vand.u32 4294901760, %v14138_v34  ;;  %v14196_v43 = vand.u32 4294901760, %v14141_v48 }
 0x1c7   :  { %9686 = vmatprep.subr.bf16.mxu0 %v14163_v1  ;;  %v9905_v1 = vpack.c.bf16 %v14172_v44, %v14170_v54  ;;  %v9909_v6 = vpack.c.bf16 %v14176_v63, %v14175_v62  ;;  %v14180_v54 = vand.u32 4294901760, %v11959_v38  ;;  %v14181_v44 = vld [vmem:[#allocation70_spill] sm:$0xff]  ;;  %v14185_v63 = vand.u32 4294901760, %v11967_v50 }
 0x1c8   :  { %9896 = vmatpush3.bf16.msra.mxu1 %v14159_v3  ;;  %v9705_v62 = vpack.c.bf16 %v14184_v7, %v14183_v42  ;;  %v14188_v38 = vand.u32 4294901760, %v11780_v17  ;;  %v9709_v42 = vpack.c.bf16 %v14191_v14, %v14190_v60  ;;  %v14192_v50 = vand.u32 4294901760, %v12044_v58 }
 0x1c9   :  { %9898 = vmatprep.subr.bf16.mxu1 %v9897_v49  ;;  %v9913_v16 = vpack.c.bf16 %v14180_v54, %v14179_v51  ;;  %v14189_v51 = vand.u32 4294901760, %v11782_v40  ;;  %v14194_v17 = vand.u32 4294901760, %v14140_v8  ;;  %v14195_v40 = vand.u32 4294901760, %v11809_v31 }
 0x1ca   :  { %9688 = vmatpush1.bf16.msra.mxu0 %v14167_v55  ;;  %v14197_v34 = vand.u32 4294901760, %v11832_v46  ;;  %v14198_v58 = vand.u32 4294901760, %v12073_v2  ;;  %v14200_v31 = vand.u32 4294901760, %v14143_v29  ;;  %v14201_v8 = vand.u32 4294901760, %v14099_v22 }
 0x1cb   :  { %8851 = vmatmul.mubr.f32.vlgmr.msra.gmra.mrb[6].mxu1 %v14168_v4  ;;  %9690 = vmatprep.subr.bf16.mxu0 %v14169_v57  ;;  %v14178_v57 = vld [vmem:[#allocation69_spill] sm:$0xff]  ;;  %v9707_v54 = vpack.c.bf16 %v14189_v51, %v14188_v38  ;;  %v9711_v7 = vpack.c.bf16 %v14195_v40, %v14194_v17  ;;  %v14202_v46 = vand.u32 4294901760, %v14105_v0  ;;  %v14203_v48 = vand.u32 4294901760, %v14106_v12 }
 0x1cc   :  { %9900 = vmatpush3.bf16.msra.mxu1 %v9897_v49  ;;  %8885 = vmatprep.mubr.f32.mxu1 %v14139_v25  ;;  %v14177_v49 = vld [vmem:[#allocation68_spill] sm:$0xff]  ;;  %v14204_v2 = vand.u32 4294901760, %v14109_v11  ;;  %v14206_v22 = vand.u32 4294901760, %v14110_v21  ;;  %v14207_v29 = vand.u32 4294901760, %v14144_v35  ;;  %v14208_v12 = vand.u32 4294901760, %v11920_v13 }
 0x1cd   :  { %9902 = vmatprep.subr.bf16.mxu1 %v9901_v36  ;;  %v14209_v0 = vand.u32 4294901760, %v11922_v45  ;;  %v14211_v11 = vand.u32 4294901760, %v11929_v28  ;;  %v14212_v13 = vand.u32 4294901760, %v11933_v19  ;;  %v14213_v45 = vand.u32 4294901760, %v11943_v10 }
 0x1ce   :  { %9692 = vmatpush1.bf16.msra.mxu0 %v14173_v33  ;;  %v9721_v38 = vpack.c.bf16 %v14207_v29, %v14206_v22  ;;  %v14216_v28 = vand.u32 4294901760, %v11981_v26  ;;  %v14218_v19 = vand.u32 4294901760, %v12005_v18  ;;  %v14219_v10 = vand.u32 4294901760, %v12164_v20  ;;  %v14224_v20 = vld [vmem:[#allocation21_spill] sm:$0xff]  ;;  %v14232_v29 = vld [vmem:[#allocation44_spill] sm:$0xff] }
 0x1cf   :  { %9694 = vmatprep.subr.bf16.mxu0 %v14174_v5  ;;  %v9723_v51 = vpack.c.bf16 %v14209_v0, %v14208_v12  ;;  %v9727_v35 = vpack.c.bf16 %v14213_v45, %v14212_v13  ;;  %v14237_v13 = vld [vmem:[#allocation16_spill] sm:$0xff] }
 0x1d0   :  { %9904 = vmatpush3.bf16.msra.mxu1 %v9901_v36  ;;  %v14182_v36 = vld [vmem:[#allocation71_spill] sm:$0xff] }
 0x1d1   :  { %9906 = vmatprep.subr.bf16.mxu1 %v9905_v1 }
 0x1d2   :  { %9696 = vmatpush1.bf16.msra.mxu0 %v14177_v49 }
 0x1d3   :  { %9698 = vmatprep.subr.bf16.mxu0 %v14178_v57 }
 0x1d4   :  { %9908 = vmatpush3.bf16.msra.mxu1 %v9905_v1  ;;  %v14186_v1 = vand.u32 4294901760, %v11987_v53  ;;  %v14193_v53 = vand.u32 4294901760, %v12051_v32  ;;  %v14199_v32 = vand.u32 4294901760, %v14142_v59  ;;  %v14205_v59 = vand.u32 4294901760, %v11885_v30 }
 0x1d5   :  { %9910 = vmatprep.subr.bf16.mxu1 %v9909_v6  ;;  %v14210_v30 = vand.u32 4294901760, %v11926_v39  ;;  %v14215_v39 = vand.u32 4294901760, %v11970_v47  ;;  %v14220_v47 = vld [vmem:[#allocation42_spill] sm:$0xff] }
 0x1d6   :  { %9700 = vmatpush1.bf16.msra.mxu0 %v14181_v44  ;;  %v9917_v57 = vpack.c.bf16 %v14186_v1, %v14185_v63  ;;  %v9715_v63 = vpack.c.bf16 %v14201_v8, %v14200_v31  ;;  %v9719_v1 = vpack.c.bf16 %v14205_v59, %v14204_v2  ;;  %v14229_v31 = vld [vmem:[#allocation30_spill] sm:$0xff] }
 0x1d7   :  { %9702 = vmatprep.subr.bf16.mxu0 %v14182_v36  ;;  %v9725_v21 = vpack.c.bf16 %v14211_v11, %v14210_v30  ;;  %v14235_v11 = vld [vmem:[#allocation40_spill] sm:$0xff] }
 0x1d8   :  { %9912 = vmatpush3.bf16.msra.mxu1 %v9909_v6  ;;  %v9921_v6 = vpack.c.bf16 %v14193_v53, %v14192_v50  ;;  %v14222_v50 = vld [vmem:[#allocation58_spill] sm:$0xff] }
 0x1d9   :  { %9914 = vmatprep.subr.bf16.mxu1 %v9913_v16  ;;  %v14223_v53 = vand.u32 4294901760, %v14222_v50 }
 0x1da   :  { %9704 = vmatpush1.bf16.msra.mxu0 %v14187_v37 }
 0x1db   :  { %9706 = vmatprep.subr.bf16.mxu0 %v9705_v62  ;;  %v9925_v62 = vpack.c.bf16 %v14199_v32, %v14198_v58  ;;  %v14227_v58 = vld [vmem:[#allocation26_spill] sm:$0xff]  ;;  %v14228_v32 = vld [vmem:[#allocation27_spill] sm:$0xff] }
 0x1dc   :  { %9916 = vmatpush3.bf16.msra.mxu1 %v9913_v16  ;;  %v9713_v16 = vpack.c.bf16 %v14197_v34, %v14196_v43 }
 0x1dd   :  { %9918 = vmatprep.subr.bf16.mxu1 %v9917_v57  ;;  %3393 = vmatmul.mubr.f32.vlgmr.msra.gmra.mrb[10].mxu0 %v14147_v15  ;;  %v12647_v15 = vld [vmem:[#allocation2 + $0x340] sm:$0xff] }
 0x1de   :  { %9708 = vmatpush1.bf16.msra.mxu0 %v9707_v54  ;;  %3398 = vmatprep.mubr.f32.mxu0 %v13895_v61  ;;  %v14214_v54 = vand.u32 4294901760, %v11962_v41  ;;  %v4380_v41 = vld [vmem:[#allocation5 + $0x14] sm:$0xf] }
 0x1df   :  { %9710 = vmatprep.subr.bf16.mxu0 %v9709_v42  ;;  %v9733_v42 = vpack.c.bf16 %v14219_v10, %v14218_v19  ;;  %v14242_v10 = vld [vmem:[#allocation35_spill] sm:$0xff] }
 0x1e0   :  { %9920 = vmatpush3.bf16.msra.mxu1 %v9917_v57  ;;  %v9717_v57 = vpack.c.bf16 %v14203_v48, %v14202_v46  ;;  %v9729_v60 = vpack.c.bf16 %v14215_v39, %v14214_v54  ;;  %v4379_v46 = vld [vmem:[#allocation5 + $0xc] sm:$0xff]  ;;  %v14230_v48 = vld [vmem:[#allocation31_spill] sm:$0xff] }
 0x1e1   :  { %9922 = vmatprep.subr.bf16.mxu1 %v9921_v6  ;;  %3402 = vmatmul.mubr.f32.gmra.mrb[12].mxu0 %v14168_v4  ;;  %v4383_v59 = vcombine.high %v4379_v46, %v4379_v46  ;;  %v14239_v54 = vld [vmem:[#allocation19_spill] sm:$0xff] }
 0x1e2   :  { %9712 = vmatpush1.bf16.msra.mxu0 %v9711_v7  ;;  %3568 = vmatprep.mubr.f32.mxu0 %v13895_v61  ;;  %v14225_v7 = vld [vmem:[#allocation22_spill] sm:$0xff] }
 0x1e3   :  { %9714 = vmatprep.subr.bf16.mxu0 %v9713_v16  ;;  %v4386_v12 = vsel %vm1725_vm0, %v4383_v59, 0 }
 0x1e4   :  { %9924 = vmatpush3.bf16.msra.mxu1 %v9921_v6  ;;  %v12477_v30 = vand.u32 4294901760, %v4386_v12 }
 0x1e5   :  { %9926 = vmatprep.subr.bf16.mxu1 %v9925_v62 }
 0x1e6   :  { %9716 = vmatpush1.bf16.msra.mxu0 %v9715_v63 }
 0x1e7   :  { %9718 = vmatprep.subr.bf16.mxu0 %v9717_v57  ;;  %v14231_v57 = vld [vmem:[#allocation38_spill] sm:$0xff] }
 0x1e8   :  { %9928 = vmatpush3.bf16.msra.mxu1 %v9925_v62 }
 0x1e9   :  { %9930 = vmatprep.subr.bf16.mxu1 %v14145_v27 }
 0x1ea   :  { %9720 = vmatpush1.bf16.msra.mxu0 %v9719_v1 }
 0x1eb   :  { %8886 = vmatmul.mubr.f32.vlgmr.msra.gmra.mrb[6].mxu1 %v14130_v9  ;;  %9722 = vmatprep.subr.bf16.mxu0 %v9721_v38  ;;  %v14233_v38 = vld [vmem:[#allocation57_spill] sm:$0xff] }
 0x1ec   :  { %9932 = vmatpush3.bf16.msra.mxu1 %v14145_v27  ;;  %8920 = vmatprep.mubr.f32.mxu1 %v14139_v25  ;;  %v14217_v27 = vand.u32 4294901760, %v11999_v24  ;;  %v4388_v24 = vsel %vm1725_vm0, %v4380_v41, 0 }
 0x1ed   :  { %9934 = vmatprep.subr.bf16.mxu1 %v14148_v56 }
 0x1ee   :  { %9724 = vmatpush1.bf16.msra.mxu0 %v9723_v51  ;;  %v9731_v14 = vpack.c.bf16 %v14217_v27, %v14216_v28  ;;  %v14234_v51 = vld [vmem:[#allocation63_spill] sm:$0xff] }
 0x1ef   :  { %9726 = vmatprep.subr.bf16.mxu0 %v9725_v21  ;;  %v4384_v21 = vsel %vm1725_vm0, %v4379_v46, 0  ;;  %v5415_v46 = vld [vmem:[#allocation2 + $0x348] sm:$0xff] }
 0x1f0   :  { %9936 = vmatpush3.bf16.msra.mxu1 %v14148_v56  ;;  %v14221_v56 = vand.u32 4294901760, %v14220_v47  ;;  %v12490_v45 = vand.u32 4294901760, %v4384_v21 }
 0x1f1   :  { %9938 = vmatprep.subr.bf16.mxu1 %v14149_v23 }
 0x1f2   :  { %9728 = vmatpush1.bf16.msra.mxu0 %v9727_v35  ;;  %v9735_v26 = vpack.c.bf16 %v14223_v53, %v14221_v56  ;;  %v14238_v35 = vld [vmem:[#allocation69_spill] sm:$0xff] }
 0x1f3   :  { %9730 = vmatprep.subr.bf16.mxu0 %v9729_v60 }
 0x1f4   :  { %9940 = vmatpush3.bf16.msra.mxu1 %v14149_v23  ;;  %v12440_v23 = vand.u32 4294901760, %v4388_v24 }
 0x1f5   :  { %9942 = vmatprep.subr.bf16.mxu1 %v14150_v52 }
 0x1f6   :  { %9732 = vmatpush1.bf16.msra.mxu0 %v9731_v14  ;;  %v4992_v16 = vsub.f32 %v4388_v24, %v12440_v23  ;;  %v14241_v14 = vld [vmem:[#allocation37_spill] sm:$0xff] }
 0x1f7   :  { %9734 = vmatprep.subr.bf16.mxu0 %v9733_v42 }
 0x1f8   :  { %9944 = vmatpush3.bf16.msra.mxu1 %v14150_v52  ;;  %v12435_v18 = vpop.f32.mrb[0].mxu0  ;;  %v14226_v52 = vld [vmem:[#allocation25_spill] sm:$0xff]  ;;  %v12460_v63 = vand.u32 4294901760, %v4992_v16 }
 0x1f9   :  { %9946 = vmatprep.subr.bf16.mxu1 %v14224_v20  ;;  %v12438_v6 = vpop.f32.mrb[1].mxu0 }
 0x1fa   :  { %v12442_v17 = vpop.f32.mrb[0].mxu1  ;;  %9736 = vmatpush1.bf16.msra.mxu0 %v9735_v26  ;;  %v4994_v22 = vsub.f32 %v4992_v16, %v12460_v63 }
 0x1fb   :  { %v12444_v40 = vpop.f32.mrb[1].mxu1  ;;  %9738 = vmatprep.subr.bf16.mxu0 %v14225_v7  ;;  %v14247_v7 = vld [vmem:[#allocation39_spill] sm:$0xff] }
 0x1fc   :  { %9948 = vmatpush3.bf16.msra.mxu1 %v14224_v20  ;;  %v12448_v43 = vpop.f32.mrb[2].mxu0  ;;  %v4995_v0 = vand.u32 4294901760, %v4994_v22  ;;  %v5407_v20 = vld [vmem:[#allocation2 + $0x308] sm:$0xff] }
 0x1fd   :  { %9950 = vmatprep.subr.bf16.mxu1 %v14226_v52  ;;  %v12451_v34 = vpop.f32.mrb[3].mxu0  ;;  %3570 = vmatmul.mubr.f32.vlgmr.msra.gmra.mrb[10].mxu0 %v14139_v25 }
 0x1fe   :  { %9740 = vmatpush1.bf16.msra.mxu0 %v14227_v58  ;;  %3575 = vmatprep.mubr.f32.mxu0 %v13895_v61  ;;  %v5416_v58 = vld [vmem:[#allocation2 + $0x350] sm:$0xff] }
 0x1ff   :  { %9742 = vmatprep.subr.bf16.mxu0 %v14228_v32 }
 0x200   :  { %9952 = vmatpush3.bf16.msra.mxu1 %v14226_v52  ;;  %v1805_v62 = vpop.f32.mrb[4].mxu0  ;;  %v5406_v52 = vld [vmem:[#allocation2 + $0x300] sm:$0xff] }
 0x201   :  { %9954 = vmatprep.subr.bf16.mxu1 %v14229_v31  ;;  %v1807_v8 = vpop.f32.mrb[5].mxu0  ;;  %3577 = vmatmul.mubr.f32.gmra.mrb[12].mxu0 %v14130_v9 }
 0x202   :  { %9744 = vmatpush1.bf16.msra.mxu0 %v14230_v48  ;;  %3679 = vmatprep.mubr.f32.mxu0 %v13895_v61 }
 0x203   :  { %9746 = vmatprep.subr.bf16.mxu0 %v14231_v57  ;;  %v5466_v57 = vand.u32 4294901760, %v5416_v58 }
 0x204   :  { %9956 = vmatpush3.bf16.msra.mxu1 %v14229_v31  ;;  %v1816_v2 = vpop.f32.mrb[6].mxu0 }
 0x205   :  { %9958 = vmatprep.subr.bf16.mxu1 %v14159_v3  ;;  %v1818_v1 = vpop.f32.mrb[7].mxu0 }
 0x206   :  { %9748 = vmatpush1.bf16.msra.mxu0 %v14232_v29  ;;  %v5468_v29 = vand.u32 4294901760, %v5415_v46 }
 0x207   :  { %9750 = vmatprep.subr.bf16.mxu0 %v14233_v38  ;;  %v5418_v38 = vld [vmem:[#allocation2 + $0x360] sm:$0xff] }
 0x208   :  { %9960 = vmatpush3.bf16.msra.mxu1 %v14159_v3  ;;  %v14236_v3 = vld [vmem:[#allocation46_spill] sm:$0xff] }
 0x209   :  { %8923 = vmatprep.subr.mxu1 %v12440_v23 }
 0x20a   :  { %9752 = vmatpush1.bf16.msra.mxu0 %v14167_v55  ;;  %v12486_v55 = vsub.f32 %v4386_v12, %v12477_v30  ;;  %v5421_v12 = vld [vmem:[#allocation2 + $0x378] sm:$0xff] }
 0x20b   :  { %8921 = vmatmul.mubr.f32.vlgmr.msra.gmra.mrb[6].mxu1 %v14130_v9  ;;  %9754 = vmatprep.subr.bf16.mxu0 %v14234_v51 }
 0x20c   :  { %8924 = vmatpush3.msra.mxu1 %v12440_v23  ;;  %8925 = vmatprep.mubr.f32.mxu1 %v14235_v11 }
 0x20d   :  { %8928 = vmatprep.subr.mxu1 %v4995_v0 }
 0x20e   :  { %9756 = vmatpush1.bf16.msra.mxu0 %v14173_v33  ;;  %v13738_v33 = vand.u32 4294901760, %v12486_v55 }
 0x20f   :  { %8926 = vmatmul.mubr.f32.vlgmr.msra.gmra.mrb[8].mxu1 %v14236_v3  ;;  %9758 = vmatprep.subr.bf16.mxu0 %v14174_v5  ;;  %v12496_v5 = vsub.f32 %v4384_v21, %v12490_v45 }
 0x210   :  { %8929 = vmatpush3.msra.mxu1 %v4995_v0  ;;  %8930 = vmatprep.mubr.f32.mxu1 %v14237_v13  ;;  %v4482_v39 = vsub.f32 %v12486_v55, %v13738_v33 }
 0x211   :  { %8933 = vmatprep.subr.mxu1 %v4992_v16 }
 0x212   :  { %9760 = vmatpush1.bf16.msra.mxu0 %v14177_v49  ;;  %v14240_v49 = vld [vmem:[#allocation48_spill] sm:$0xff]  ;;  %v4483_v60 = vand.u32 4294901760, %v4482_v39  ;;  %v5428_v39 = vld [vmem:[#allocation2 + $0x3b0] sm:$0xff] }
 0x213   :  { %9762 = vmatprep.subr.bf16.mxu0 %v14238_v35  ;;  %v5425_v35 = vld [vmem:[#allocation2 + $0x398] sm:$0xff] }
 0x216   :  { %9764 = vmatpush1.bf16.msra.mxu0 %v14181_v44  ;;  %v13737_v44 = vand.u32 4294901760, %v12496_v5 }
 0x217   :  { %8931 = vmatmul.mubr.f32.vlgmr.msra.gmra.mrb[8].mxu1 %v14239_v54  ;;  %9766 = vmatprep.subr.bf16.mxu0 %v14182_v36 }
 0x218   :  { %8934 = vmatpush3.msra.mxu1 %v4992_v16  ;;  %8935 = vmatprep.mubr.f32.mxu1 %v14240_v49  ;;  %v4488_v36 = vsub.f32 %v12496_v5, %v13737_v44  ;;  %v5409_v16 = vld [vmem:[#allocation2 + $0x318] sm:$0xff] }
 0x219   :  { %8938 = vmatprep.subr.mxu1 %v12440_v23  ;;  %v5460_v31 = vand.u32 4294901760, %v5409_v16 }
 0x21a   :  { %9768 = vmatpush1.bf16.msra.mxu0 %v14187_v37  ;;  %v4489_v56 = vand.u32 4294901760, %v4488_v36 }
 0x21b   :  { %4391 = vmatprep.subr.mxu0 %v12477_v30 }
 0x21d   :  { %3681 = vmatmul.mubr.f32.vlgmr.msra.gmra.mrb[10].mxu0 %v14139_v25 }
 0x21e   :  { %v2234_v28 = vpop.f32.mrb[2].mxu1  ;;  %4393 = vmatpush1.msra.mxu0 %v12490_v45  ;;  %3686 = vmatprep.mubr.f32.mxu0 %v13895_v61 }
 0x21f   :  { %v10345_v27 = vadd.f32 %v2234_v28, %v1805_v62  ;;  %8936 = vmatmul.mubr.f32.vlgmr.msra.gmra.mrb[8].mxu1 %v14241_v14  ;;  %v2236_v37 = vpop.f32.mrb[3].mxu1  ;;  %4484 = vmatprep.subr.mxu0 %v4483_v60  ;;  %v5456_v62 = vand.u32 4294901760, %v5406_v52  ;;  %v12556_v60 = vsub.f32 %v5409_v16, %v5460_v31  ;;  %v5478_v16 = vand.u32 4294901760, %v5425_v35 }
 0x220   :  { %v10346_v19 = vadd.f32 %v2236_v37, %v1807_v8  ;;  %8939 = vmatpush3.msra.mxu1 %v12440_v23  ;;  %8940 = vmatprep.mubr.f32.mxu1 %v14242_v10  ;;  %v5412_v8 = vld [vmem:[#allocation2 + $0x330] sm:$0xff] }
 0x221   :  { %v12518_v42 = vmul.f32 %v10345_v27, %v12435_v18  ;;  %3688 = vmatmul.mubr.f32.gmra.mrb[12].mxu0 %v14130_v9  ;;  %8943 = vmatprep.subr.mxu1 %v12460_v63  ;;  %v5464_v22 = vand.u32 4294901760, %v5412_v8  ;;  %v12550_v51 = vpack.c.bf16 %v5460_v31, %v5456_v62  ;;  %v12552_v21 = vsub.f32 %v5406_v52, %v5456_v62  ;;  %v5424_v37 = vld [vmem:[#allocation2 + $0x390] sm:$0xff]  ;;  %v5430_v31 = vld [vmem:[#allocation2 + $0x3c0] sm:$0xff] }
 0x222   :  { %v12523_v41 = vmul.f32 %v10346_v19, %v12438_v6  ;;  %v2241_v47 = vpop.f32.mrb[4].mxu1  ;;  %4456 = vmatprep.mubr.f32.mxu0 %v13895_v61  ;;  %v5410_v6 = vld [vmem:[#allocation2 + $0x320] sm:$0xff]  ;;  %v5427_v19 = vld [vmem:[#allocation2 + $0x3a8] sm:$0xff] }
 0x223   :  { %14243 = vst [vmem:[#allocation59_spill] sm:$0xff] %v12518_v42  ;;  %v10347_v50 = vadd.f32 %v2241_v47, %v1816_v2  ;;  %v2243_v53 = vpop.f32.mrb[5].mxu1  ;;  %v5458_v32 = vand.u32 4294901760, %v5410_v6  ;;  %v5419_v2 = vld [vmem:[#allocation2 + $0x368] sm:$0xff]  ;;  %14251 = vst [vmem:[#allocation62_spill] sm:$0xff] %v12550_v51  ;;  %v12571_v52 = vpack.c.bf16 %v5468_v29, %v5464_v22  ;;  %v5484_v62 = vand.u32 4294901760, %v5427_v19 }
 0x224   :  { %14244 = vst [vmem:[#allocation61_spill] sm:$0xff] %v12523_v41  ;;  %v10348_v26 = vadd.f32 %v2243_v53, %v1818_v1  ;;  %14252 = vst [vmem:[#allocation28_spill] sm:$0xff] %v12552_v21  ;;  %v5470_v36 = vand.u32 4294901760, %v5419_v2  ;;  %v5472_v53 = vand.u32 4294901760, %v5418_v38 }
 0x225   :  { %v12527_v24 = vmul.f32 %v10347_v50, %v12448_v43  ;;  %4462 = vmatmul.mubr.f32.vlgmr.msra.gmra.mrb[14].mxu0 %v14235_v11  ;;  %v5413_v43 = vld [vmem:[#allocation2 + $0x338] sm:$0xff]  ;;  %v12548_v0 = vsub.f32 %v5410_v6, %v5458_v32  ;;  %v12564_v50 = vsub.f32 %v5416_v58, %v5466_v57  ;;  %14256 = vst [vmem:[#allocation73_spill] sm:$0xff] %v12571_v52  ;;  %v12611_v11 = vld [vmem:[#allocation2 + $0x310] sm:$0xff] }
 0x226   :  { %v12531_v18 = vmul.f32 %v10348_v26, %v12451_v34  ;;  %4490 = vmatpush1.msra.mxu0 %v4489_v56  ;;  %4467 = vmatprep.mubr.f32.mxu0 %v13895_v61  ;;  %v5454_v34 = vand.u32 4294901760, %v5407_v20  ;;  %v5462_v48 = vand.u32 4294901760, %v5413_v43  ;;  %v5476_v26 = vand.u32 4294901760, %v5421_v12 }
 0x227   :  { %14245 = vst [vmem:[#allocation64_spill] sm:$0xff] %v12527_v24  ;;  %8941 = vmatmul.mubr.f32.vlgmr.msra.gmra.mrb[8].mxu1 %v14247_v7  ;;  %4570 = vmatprep.subr.mxu0 %v12486_v55  ;;  %14250 = vst [vmem:[#allocation49_spill] sm:$0xff] %v12548_v0  ;;  %v12577_v58 = vsub.f32 %v5412_v8, %v5464_v22  ;;  %v12583_v44 = vsub.f32 %v5419_v2, %v5470_v36  ;;  %v5437_v8 = vld [vmem:[#allocation2 + $0x3f8] sm:$0xff]  ;;  %v5440_v22 = vld [vmem:[#allocation2 + $0x410] sm:$0xff] }
 0x228   :  { %14246 = vst [vmem:[#allocation23_spill] sm:$0xff] %v12531_v18  ;;  %8944 = vmatpush3.msra.mxu1 %v12460_v63  ;;  %8945 = vmatprep.mubr.f32.mxu1 %v14237_v13  ;;  %v5422_v63 = vld [vmem:[#allocation2 + $0x380] sm:$0xff]  ;;  %v12542_v59 = vpack.c.bf16 %v5458_v32, %v5454_v34  ;;  %v12544_v1 = vsub.f32 %v5407_v20, %v5454_v34  ;;  %v5431_v34 = vld [vmem:[#allocation2 + $0x3c8] sm:$0xff]  ;;  %v5436_v2 = vld [vmem:[#allocation2 + $0x3f0] sm:$0xff] }
 0x229   :  { %4473 = vmatmul.mubr.f32.gmra.mrb[16].mxu0 %v14236_v3  ;;  %8948 = vmatprep.subr.mxu1 %v12440_v23  ;;  %v12558_v28 = vpack.c.bf16 %v5466_v57, %v5462_v48  ;;  %v5474_v27 = vand.u32 4294901760, %v5422_v63  ;;  %v12562_v56 = vsub.f32 %v5413_v43, %v5462_v48  ;;  %v5434_v32 = vld [vmem:[#allocation2 + $0x3e0] sm:$0xff]  ;;  %14258 = vst [vmem:[#allocation65_spill] sm:$0xff] %v12577_v58  ;;  %v5433_v48 = vld [vmem:[#allocation2 + $0x3d8] sm:$0xff]  ;;  %14260 = vst [vmem:[#allocation17_spill] sm:$0xff] %v12583_v44 }
 0x22a   :  { %4553 = vmatprep.mubr.f32.mxu0 %v13895_v61  ;;  %14248 = vst [vmem:[#allocation24_spill] sm:$0xff] %v12542_v59  ;;  %14249 = vst [vmem:[#allocation34_spill] sm:$0xff] %v12544_v1  ;;  %v12579_v57 = vsub.f32 %v5415_v46, %v5468_v29  ;;  %v12587_v18 = vpack.c.bf16 %v5476_v26, %v5472_v53  ;;  %v5490_v24 = vand.u32 4294901760, %v5434_v32  ;;  %v5488_v29 = vand.u32 4294901760, %v5430_v31 }
 0x22b   :  { %14253 = vst [vmem:[#allocation29_spill] sm:$0xff] %v12558_v28  ;;  %14254 = vst [vmem:[#allocation33_spill] sm:$0xff] %v12562_v56  ;;  %v12585_v33 = vsub.f32 %v5422_v63, %v5474_v27  ;;  %v12592_v41 = vsub.f32 %v5421_v12, %v5476_v26  ;;  %v5492_v42 = vand.u32 4294901760, %v5433_v48  ;;  %v12598_v63 = vsub.f32 %v5425_v35, %v5478_v16  ;;  %v12613_v35 = vld [vmem:[#allocation2 + $0x328] sm:$0xff] }
 0x22c   :  { %14261 = vst [vmem:[#allocation18_spill] sm:$0xff] %v12587_v18  ;;  %v14268_v12 = vand.u32 4294901760, %v12486_v55  ;;  %v5498_v3 = vand.u32 4294901760, %v5440_v22  ;;  %v5442_v55 = vld [vmem:[#allocation2 + $0x420] sm:$0xff] }
 0x22d   :  { %4555 = vmatmul.mubr.f32.vlgmr.msra.gmra.mrb[14].mxu0 %v14237_v13  ;;  %14263 = vst [vmem:[#allocation43_spill] sm:$0xff] %v12592_v41  ;;  %14265 = vst [vmem:[#allocation60_spill] sm:$0xff] %v12598_v63 }
 0x22e   :  { %4573 = vmatpush1.msra.mxu0 %v12496_v5  ;;  %4560 = vmatprep.mubr.f32.mxu0 %v13895_v61 }
 0x22f   :  { %8946 = vmatmul.mubr.f32.vlgmr.msra.gmra.mrb[8].mxu1 %v14239_v54  ;;  %4654 = vmatprep.subr.mxu0 %v12477_v30 }
 0x230   :  { %v8712_v47 = vpop.f32.mrb[8].mxu0  ;;  %8949 = vmatpush3.msra.mxu1 %v12440_v23  ;;  %8950 = vmatprep.mubr.f32.mxu1 %v14237_v13  ;;  %v5482_v23 = vand.u32 4294901760, %v5428_v39 }
 0x231   :  { %v12567_v20 = vmul.f32 %v8712_v47, %v12442_v17  ;;  %4562 = vmatmul.mubr.f32.gmra.mrb[16].mxu0 %v14239_v54  ;;  %v2725_v6 = vpop.f32.mrb[9].mxu0  ;;  %9962 = vmatprep.subr.bf16.mxu1 %v12542_v59  ;;  %v5480_v17 = vand.u32 4294901760, %v5424_v37  ;;  %v12581_v47 = vpack.c.bf16 %v5474_v27, %v5470_v36  ;;  %v5439_v36 = vld [vmem:[#allocation2 + $0x408] sm:$0xff] }
 0x232   :  { %v12574_v43 = vmul.f32 %v2725_v6, %v12444_v40  ;;  %4636 = vmatprep.mubr.f32.mxu0 %v13895_v61  ;;  %v12589_v40 = vsub.f32 %v5418_v38, %v5472_v53  ;;  %v5486_v6 = vand.u32 4294901760, %v5431_v34  ;;  %v12594_v46 = vpack.c.bf16 %v5482_v23, %v5478_v16  ;;  %v5443_v53 = vld [vmem:[#allocation2 + $0x428] sm:$0xff] }
 0x233   :  { %14255 = vst [vmem:[#allocation41_spill] sm:$0xff] %v12567_v20  ;;  %14259 = vst [vmem:[#allocation15_spill] sm:$0xff] %v12581_v47  ;;  %v12600_v38 = vsub.f32 %v5428_v39, %v5482_v23  ;;  %v12602_v27 = vpack.c.bf16 %v5484_v62, %v5480_v17  ;;  %v12607_v26 = vsub.f32 %v5424_v37, %v5480_v17  ;;  %v5494_v20 = vand.u32 4294901760, %v5437_v8 }
 0x234   :  { %14257 = vst [vmem:[#allocation45_spill] sm:$0xff] %v12574_v43  ;;  %14262 = vst [vmem:[#allocation20_spill] sm:$0xff] %v12589_v40  ;;  %v12609_v43 = vsub.f32 %v5427_v19, %v5484_v62  ;;  %v12616_v39 = vpack.c.bf16 %v5490_v24, %v5486_v6  ;;  %v12618_v16 = vsub.f32 %v5431_v34, %v5486_v6  ;;  %v5496_v23 = vand.u32 4294901760, %v5436_v2 }
 0x235   :  { %4639 = vmatmul.mubr.f32.vlgmr.msra.gmra.mrb[14].mxu0 %v14240_v49  ;;  %14264 = vst [vmem:[#allocation36_spill] sm:$0xff] %v12594_v46  ;;  %14266 = vst [vmem:[#allocation32_spill] sm:$0xff] %v12600_v38  ;;  %v5446_v49 = vld [vmem:[#allocation2 + $0x440] sm:$0xff]  ;;  %v5500_v4 = vand.u32 4294901760, %v5439_v36  ;;  %v12623_v37 = vsub.f32 %v5434_v32, %v5490_v24  ;;  %v12625_v19 = vpack.c.bf16 %v5492_v42, %v5488_v29  ;;  %v5502_v17 = vand.u32 4294901760, %v5443_v53 }
 0x236   :  { %4656 = vmatpush1.msra.mxu0 %v12490_v45  ;;  %4644 = vmatprep.mubr.f32.mxu0 %v13895_v61  ;;  %14267 = vst [vmem:[#allocation66_spill] sm:$0xff] %v12602_v27  ;;  %14269 = vst [vmem:[#allocation67_spill] sm:$0xff] %v12607_v26  ;;  %v5506_v62 = vand.u32 4294901760, %v5446_v49  ;;  %v12628_v34 = vsub.f32 %v5430_v31, %v5488_v29  ;;  %v12630_v6 = vsub.f32 %v5433_v48, %v5492_v42  ;;  %v5449_v48 = vld [vmem:[#allocation2 + $0x458] sm:$0xff]  ;;  %v5452_v29 = vld [vmem:[#allocation2 + $0x470] sm:$0xff] }
 0x237   :  { %8951 = vmatmul.mubr.f32.vlgmr.msra.gmra.mrb[8].mxu1 %v14239_v54  ;;  %4741 = vmatprep.subr.mxu0 %v14268_v12  ;;  %14270 = vst [vmem:[#allocation68_spill] sm:$0xff] %v12609_v43  ;;  %14271 = vst [vmem:[#allocation70_spill] sm:$0xff] %v12616_v39  ;;  %v5445_v12 = vld [vmem:[#allocation2 + $0x438] sm:$0xff]  ;;  %v12634_v59 = vpack.c.bf16 %v5498_v3, %v5494_v20  ;;  %v5504_v24 = vand.u32 4294901760, %v5442_v55  ;;  %v12641_v9 = vpack.c.bf16 %v5500_v4, %v5496_v23 }
 0x238   :  { %9964 = vmatpush1.bf16.msra.mxu1 %v12550_v51  ;;  %14272 = vst [vmem:[#allocation71_spill] sm:$0xff] %v12618_v16  ;;  %5550 = vmatprep.mubr.f32.mxu1 %v13895_v61  ;;  %14273 = vst [vmem:[#allocation72_spill] sm:$0xff] %v12625_v19  ;;  %v5508_v32 = vand.u32 4294901760, %v5445_v12  ;;  %v12643_v31 = vsub.f32 %v5436_v2, %v5496_v23  ;;  %v12645_v42 = vsub.f32 %v5439_v36, %v5500_v4 }
 0x239   :  { %9966 = vmatprep.subr.bf16.mxu1 %v12558_v28  ;;  %4647 = vmatmul.mubr.f32.gmra.mrb[16].mxu0 %v14241_v14  ;;  %14274 = vst [vmem:[#allocation42_spill] sm:$0xff] %v12634_v59  ;;  %v12636_v28 = vsub.f32 %v5437_v8, %v5494_v20  ;;  %v12639_v14 = vsub.f32 %v5440_v22, %v5498_v3  ;;  %14275 = vst [vmem:[#allocation58_spill] sm:$0xff] %v12641_v9  ;;  %v12653_v8 = vld [vmem:[#allocation2 + $0x358] sm:$0xff]  ;;  %v12655_v3 = vld [vmem:[#allocation2 + $0x450] sm:$0xff]  ;;  %v14277_v23 = vand.u32 4294901760, %v12496_v5 }
 0x23a   :  { %4719 = vmatprep.mubr.f32.mxu0 %v13895_v61  ;;  %v12651_v20 = vpack.c.bf16 %v5506_v62, %v5502_v17  ;;  %v12657_v22 = vld [vmem:[#allocation2 + $0x468] sm:$0xff]  ;;  %v12665_v51 = vsub.f32 %v5443_v53, %v5502_v17  ;;  %v12676_v4 = vpack.c.bf16 %v5508_v32, %v5504_v24  ;;  %v5510_v36 = vand.u32 4294901760, %v5449_v48  ;;  %v12692_v5 = vld [vmem:[#allocation2 + $0x370] sm:$0xff] }
 0x23b   :  { %v5514_v2 = vand.u32 4294901760, %v5452_v29  ;;  %v5512_v17 = vand.u32 4294901760, %v12655_v3 }
 0x23c   :  { %9968 = vmatpush1.bf16.msra.mxu1 %v12571_v52  ;;  %14276 = vst [vmem:[#allocation21_spill] sm:$0xff] %v12651_v20  ;;  %v14280_v52 = vand.u32 4294901760, %v12613_v35  ;;  %14282 = vst [vmem:[#allocation26_spill] sm:$0xff] %v12676_v4 }
 0x23d   :  { %9970 = vmatprep.subr.bf16.mxu1 %v12581_v47  ;;  %4723 = vmatmul.mubr.f32.vlgmr.msra.gmra.mrb[14].mxu0 %v14242_v10  ;;  %v12667_v10 = vsub.f32 %v5446_v49, %v5506_v62  ;;  %v14279_v47 = vand.u32 4294901760, %v12611_v11  ;;  %v5516_v62 = vand.u32 4294901760, %v12657_v22  ;;  %v14285_v49 = vand.u32 4294901760, %v12552_v21 }
 0x23e   :  { %4745 = vmatpush1.msra.mxu0 %v14277_v23  ;;  %4728 = vmatprep.mubr.f32.mxu0 %v13895_v61 }
 0x23f   :  { %14278 = vst [vmem:[#allocation22_spill] sm:$0xff] %v12667_v10  ;;  %v12673_v25 = vpack.c.bf16 %v14280_v52, %v14279_v47  ;;  %4824 = vmatprep.subr.mxu0 %v12477_v30  ;;  %v14283_v30 = vand.u32 4294901760, %v12544_v1  ;;  %v14284_v47 = vand.u32 4294901760, %v12548_v0  ;;  %v5582_v53 = vsub.f32 %v12552_v21, %v14285_v49 }
 0x240   :  { %9972 = vmatpush1.bf16.msra.mxu1 %v12587_v18  ;;  %v12698_v18 = vsub.f32 %v5442_v55, %v5504_v24  ;;  %v12706_v10 = vpack.c.bf16 %v5514_v2, %v5510_v36  ;;  %v14287_v49 = vand.u32 4294901760, %v12556_v60  ;;  %v14288_v55 = vand.u32 4294901760, %v12647_v15 }
 0x241   :  { %14281 = vst [vmem:[#allocation25_spill] sm:$0xff] %v12673_v25  ;;  %9974 = vmatprep.subr.bf16.mxu1 %v12594_v46  ;;  %4732 = vmatmul.mubr.f32.gmra.mrb[16].mxu0 %v14247_v7  ;;  %v5576_v52 = vsub.f32 %v12544_v1, %v14283_v30  ;;  %v5588_v23 = vsub.f32 %v12548_v0, %v14284_v47  ;;  %v12702_v7 = vld [vmem:[#allocation2 + $0x388] sm:$0xff] }
 0x242   :  { %4808 = vmatprep.mubr.f32.mxu0 %v13895_v61  ;;  %v12700_v46 = vsub.f32 %v5445_v12, %v5508_v32  ;;  %14286 = vst [vmem:[#allocation27_spill] sm:$0xff] %v12706_v10  ;;  %v12708_v47 = vsub.f32 %v5449_v48, %v5510_v36  ;;  %v12710_v0 = vsub.f32 %v5452_v29, %v5514_v2  ;;  %v14289_v12 = vand.u32 4294901760, %v12653_v8  ;;  %v12725_v48 = vld [vmem:[#allocation2 + $0x3a0] sm:$0xff]  ;;  %v12727_v29 = vld [vmem:[#allocation2 + $0x3b8] sm:$0xff] }
 0x243   :  { %v5594_v21 = vsub.f32 %v12556_v60, %v14287_v49  ;;  %v12722_v32 = vpack.c.bf16 %v5516_v62, %v5512_v17  ;;  %v5577_v36 = vand.u32 4294901760, %v5576_v52  ;;  %v5589_v49 = vand.u32 4294901760, %v5588_v23 }
 0x244   :  { %9976 = vmatpush1.bf16.msra.mxu1 %v12602_v27  ;;  %v12720_v24 = vpack.c.bf16 %v14289_v12, %v14288_v55  ;;  %v5583_v55 = vand.u32 4294901760, %v5582_v53  ;;  %v14292_v12 = vand.u32 4294901760, %v12562_v56  ;;  %v14293_v27 = vand.u32 4294901760, %v12564_v50 }
 0x245   :  { %14291 = vst [vmem:[#allocation31_spill] sm:$0xff] %v12722_v32  ;;  %9978 = vmatprep.subr.bf16.mxu1 %v12616_v39  ;;  %4810 = vmatmul.mubr.f32.vlgmr.msra.gmra.mrb[14].mxu0 %v14237_v13  ;;  %v5595_v23 = vand.u32 4294901760, %v5594_v21  ;;  %v12759_v21 = vsub.f32 %v12655_v3, %v5512_v17  ;;  %v12762_v30 = vsub.f32 %v12657_v22, %v5516_v62  ;;  %v14299_v17 = vand.u32 4294901760, %v12583_v44  ;;  %v12778_v62 = vld [vmem:[#allocation2 + $0x3d0] sm:$0xff] }
 0x246   :  { %14290 = vst [vmem:[#allocation30_spill] sm:$0xff] %v12720_v24  ;;  %4826 = vmatpush1.msra.mxu0 %v12490_v45  ;;  %4815 = vmatprep.mubr.f32.mxu0 %v13895_v61  ;;  %v5600_v1 = vsub.f32 %v12562_v56, %v14292_v12  ;;  %v5612_v2 = vsub.f32 %v12564_v50, %v14293_v27  ;;  %v14294_v12 = vand.u32 4294901760, %v12577_v58  ;;  %v14295_v45 = vand.u32 4294901760, %v12692_v5 }
 0x247   :  { %10154 = vmatprep.subr.bf16.mxu0 %v12673_v25  ;;  %v5624_v22 = vsub.f32 %v12583_v44, %v14299_v17  ;;  %v14300_v52 = vand.u32 4294901760, %v12725_v48  ;;  %v14304_v44 = vand.u32 4294901760, %v12589_v40 }
 0x248   :  { %9980 = vmatpush1.bf16.msra.mxu1 %v12625_v19  ;;  %v12751_v56 = vsub.f32 %v12577_v58, %v14294_v12  ;;  %v14296_v12 = vand.u32 4294901760, %v12702_v7  ;;  %v5601_v39 = vand.u32 4294901760, %v5600_v1  ;;  %v5613_v27 = vand.u32 4294901760, %v5612_v2  ;;  %v12780_v19 = vld [vmem:[#allocation2 + $0x3e8] sm:$0xff] }
 0x249   :  { %9982 = vmatprep.subr.bf16.mxu1 %v12634_v59  ;;  %4817 = vmatmul.mubr.f32.gmra.mrb[16].mxu0 %v14239_v54  ;;  %v14298_v59 = vand.u32 4294901760, %v12579_v57  ;;  %v14301_v1 = vand.u32 4294901760, %v12727_v29  ;;  %v14303_v58 = vand.u32 4294901760, %v12585_v33 }
 0x24a   :  { %v12768_v53 = vpack.c.bf16 %v14296_v12, %v14295_v45  ;;  %4889 = vmatprep.mubr.f32.mxu0 %v13895_v61  ;;  %v9993_v45 = vpack.c.bf16 %v5589_v49, %v5577_v36  ;;  %v12782_v12 = vpack.c.bf16 %v5595_v23, %v5583_v55  ;;  %v5607_v17 = vand.u32 4294901760, %v12751_v56 }
 0x24b   :  { %v5618_v3 = vsub.f32 %v12579_v57, %v14298_v59  ;;  %v12788_v2 = vpack.c.bf16 %v14301_v1, %v14300_v52  ;;  %v5636_v59 = vsub.f32 %v12585_v33, %v14303_v58  ;;  %v5630_v36 = vsub.f32 %v12589_v40, %v14304_v44  ;;  %v12804_v1 = vld [vmem:[#allocation2 + $0x400] sm:$0xff]  ;;  %v12813_v40 = vld [vmem:[#allocation2 + $0x418] sm:$0xff] }
 0x24c   :  { %14297 = vst [vmem:[#allocation38_spill] sm:$0xff] %v12768_v53  ;;  %9984 = vmatpush1.bf16.msra.mxu1 %v12641_v9  ;;  %v14305_v49 = vand.u32 4294901760, %v12592_v41  ;;  %v14306_v23 = vand.u32 4294901760, %v12598_v63  ;;  %v14307_v44 = vand.u32 4294901760, %v12600_v38 }
 0x24d   :  { %14302 = vst [vmem:[#allocation44_spill] sm:$0xff] %v12788_v2  ;;  %9986 = vmatprep.subr.bf16.mxu1 %v12651_v20  ;;  %4891 = vmatmul.mubr.f32.vlgmr.msra.gmra.mrb[14].mxu0 %v14237_v13  ;;  %v5619_v20 = vand.u32 4294901760, %v5618_v3  ;;  %v13802_v13 = vand.u32 4294901760, %v12609_v43  ;;  %v5637_v58 = vand.u32 4294901760, %v5636_v59  ;;  %v12827_v3 = vld [vmem:[#allocation2 + $0x448] sm:$0xff]  ;;  %v14308_v59 = vand.u32 4294901760, %v12607_v26 }
 0x24e   :  { %v5642_v55 = vsub.f32 %v12592_v41, %v14305_v49  ;;  %v5648_v52 = vsub.f32 %v12598_v63, %v14306_v23  ;;  %v5660_v9 = vsub.f32 %v12600_v38, %v14307_v44  ;;  %10156 = vmatpush3.bf16.msra.mxu0 %v12673_v25  ;;  %4896 = vmatprep.mubr.f32.mxu0 %v13895_v61  ;;  %v5625_v63 = vand.u32 4294901760, %v5624_v22 }
 0x24f   :  { %v9997_v23 = vpack.c.bf16 %v5613_v27, %v5601_v39  ;;  %10158 = vmatprep.subr.bf16.mxu0 %v12720_v24  ;;  %v5631_v49 = vand.u32 4294901760, %v5630_v36  ;;  %v12825_v27 = vld [vmem:[#allocation2 + $0x430] sm:$0xff]  ;;  %v5654_v56 = vsub.f32 %v12607_v26, %v14308_v59  ;;  %v14313_v36 = vand.u32 4294901760, %v12618_v16 }
 0x250   :  { %9988 = vmatpush1.bf16.msra.mxu1 %v12676_v4  ;;  %v5643_v25 = vand.u32 4294901760, %v5642_v55  ;;  %v5649_v41 = vand.u32 4294901760, %v5648_v52  ;;  %v5661_v22 = vand.u32 4294901760, %v5660_v9  ;;  %v14309_v55 = vand.u32 4294901760, %v12778_v62 }
 0x251   :  { %9990 = vmatprep.subr.bf16.mxu1 %v12706_v10  ;;  %4898 = vmatmul.mubr.f32.gmra.mrb[16].mxu0 %v14239_v54  ;;  %v14310_v52 = vand.u32 4294901760, %v12780_v19  ;;  %v5666_v9 = vsub.f32 %v12609_v43, %v13802_v13  ;;  %v14312_v54 = vld [vmem:[#allocation55_spill] sm:$0xff]  ;;  %v5672_v38 = vsub.f32 %v12618_v16, %v14313_v36  ;;  %v14314_v10 = vand.u32 4294901760, %v12623_v37 }
 0x252   :  { %10160 = vmatpush3.bf16.msra.mxu0 %v12720_v24  ;;  %8985 = vmatprep.mubr.f32.mxu0 %v14312_v54  ;;  %v9999_v44 = vpack.c.bf16 %v5619_v20, %v5607_v17  ;;  %v10001_v59 = vpack.c.bf16 %v5637_v58, %v5625_v63  ;;  %v10003_v4 = vpack.c.bf16 %v5643_v25, %v5631_v49  ;;  %v14315_v24 = vand.u32 4294901760, %v12804_v1  ;;  %v12871_v20 = vld [vmem:[#allocation2 + $0x460] sm:$0xff] }
 0x253   :  { %v12841_v39 = vpack.c.bf16 %v14310_v52, %v14309_v55  ;;  %10162 = vmatprep.subr.bf16.mxu0 %v12768_v53  ;;  %v5684_v55 = vsub.f32 %v12623_v37, %v14314_v10  ;;  %v14316_v43 = vand.u32 4294901760, %v12813_v40  ;;  %v10005_v36 = vpack.c.bf16 %v5661_v22, %v5649_v41 }
 0x254   :  { %9992 = vmatpush1.bf16.msra.mxu1 %v12722_v32  ;;  %v5655_v16 = vand.u32 4294901760, %v5654_v56  ;;  %v14318_v10 = vand.u32 4294901760, %v12628_v34  ;;  %v14319_v13 = vand.u32 4294901760, %v12630_v6  ;;  %v14320_v25 = vand.u32 4294901760, %v12636_v28 }
 0x255   :  { %14311 = vst [vmem:[#allocation57_spill] sm:$0xff] %v12841_v39  ;;  %v12863_v26 = vpack.c.bf16 %v14316_v43, %v14315_v24  ;;  %9994 = vmatprep.subr.bf16.mxu1 %v9993_v45  ;;  %v14321_v63 = vand.u32 4294901760, %v12639_v14  ;;  %v12880_v24 = vld [vmem:[#allocation2 + $0x478] sm:$0xff]  ;;  %v14322_v45 = vand.u32 4294901760, %v12611_v11  ;;  %v5667_v58 = vand.u32 4294901760, %v5666_v9 }
 0x256   :  { %v5678_v52 = vsub.f32 %v12628_v34, %v14318_v10  ;;  %v5690_v32 = vsub.f32 %v12630_v6, %v14319_v13  ;;  %10164 = vmatpush3.bf16.msra.mxu0 %v12768_v53  ;;  %v5696_v43 = vsub.f32 %v12636_v28, %v14320_v25  ;;  %v14323_v13 = vand.u32 4294901760, %v12613_v35 }
 0x257   :  { %14317 = vst [vmem:[#allocation63_spill] sm:$0xff] %v12863_v26  ;;  %v5708_v41 = vsub.f32 %v12639_v14, %v14321_v63  ;;  %v12885_v17 = vsub.f32 %v12611_v11, %v14322_v45  ;;  %5556 = vmatmul.mubr.f32.vlgmr.msra.gmra.mrb[10].mxu1 %v14312_v54  ;;  %10166 = vmatprep.subr.bf16.mxu0 %v12788_v2  ;;  %v5673_v49 = vand.u32 4294901760, %v5672_v38  ;;  %v5685_v22 = vand.u32 4294901760, %v5684_v55 }
 0x258   :  { %v12890_v56 = vsub.f32 %v12613_v35, %v14323_v13  ;;  %v14324_v10 = vand.u32 4294901760, %v12825_v27  ;;  %v14325_v25 = vand.u32 4294901760, %v12827_v3  ;;  %9996 = vmatpush1.bf16.msra.mxu1 %v12782_v12  ;;  %5561 = vmatprep.mubr.f32.mxu1 %v13895_v61  ;;  %v5679_v38 = vand.u32 4294901760, %v5678_v52  ;;  %v14327_v13 = vld [vmem:[#allocation22_spill] sm:$0xff] }
 0x259   :  { %9998 = vmatprep.subr.bf16.mxu1 %v9997_v23  ;;  %v5691_v9 = vand.u32 4294901760, %v5690_v32  ;;  %v13817_v55 = vand.u32 4294901760, %v12880_v24  ;;  %v5697_v12 = vand.u32 4294901760, %v5696_v43  ;;  %v10007_v54 = vpack.c.bf16 %v5667_v58, %v5655_v16 }
 0x25a   :  { %v12898_v63 = vpack.c.bf16 %v14325_v25, %v14324_v10  ;;  %10168 = vmatpush3.bf16.msra.mxu0 %v12788_v2  ;;  %v5709_v25 = vand.u32 4294901760, %v5708_v41  ;;  %v14328_v45 = vand.u32 4294901760, %v12647_v15  ;;  %v14329_v32 = vand.u32 4294901760, %v12653_v8  ;;  %v14330_v10 = vld [vmem:[#allocation56_spill] sm:$0xff] }
 0x25b   :  { %10170 = vmatprep.subr.bf16.mxu0 %v12841_v39  ;;  %5567 = vmatmul.mubr.f32.gmra.mrb[12].mxu1 %v14330_v10  ;;  %v14331_v43 = vand.u32 4294901760, %v12643_v31  ;;  %v14332_v35 = vand.u32 4294901760, %v12645_v42  ;;  %v14333_v58 = vand.u32 4294901760, %v12665_v51 }
 0x25c   :  { %14326 = vst [vmem:[#allocation69_spill] sm:$0xff] %v12898_v63  ;;  %v12915_v23 = vsub.f32 %v12647_v15, %v14328_v45  ;;  %v12920_v52 = vsub.f32 %v12653_v8, %v14329_v32  ;;  %10000 = vmatpush1.bf16.msra.mxu1 %v9999_v44  ;;  %5797 = vmatprep.mubr.f32.mxu1 %v13895_v61  ;;  %v14334_v32 = vand.u32 4294901760, %v12871_v20 }
 0x25d   :  { %v5702_v41 = vsub.f32 %v12643_v31, %v14331_v43  ;;  %v5714_v16 = vsub.f32 %v12645_v42, %v14332_v35  ;;  %v5720_v15 = vsub.f32 %v12665_v51, %v14333_v58  ;;  %10002 = vmatprep.subr.bf16.mxu1 %v10001_v59  ;;  %v10009_v8 = vpack.c.bf16 %v5685_v22, %v5673_v49 }
 0x25e   :  { %v10011_v45 = vpack.c.bf16 %v5691_v9, %v5679_v38  ;;  %v12937_v44 = vpack.c.bf16 %v13817_v55, %v14334_v32  ;;  %v14336_v43 = vand.u32 4294901760, %v14327_v13  ;;  %10172 = vmatpush3.bf16.msra.mxu0 %v12841_v39  ;;  %v10013_v35 = vpack.c.bf16 %v5709_v25, %v5697_v12 }
 0x25f   :  { %v14337_v58 = vand.u32 4294901760, %v12885_v17  ;;  %v14338_v59 = vand.u32 4294901760, %v12890_v56  ;;  %10174 = vmatprep.subr.bf16.mxu0 %v12863_v26  ;;  %v14339_v32 = vand.u32 4294901760, %v12692_v5  ;;  %v14340_v25 = vand.u32 4294901760, %v12702_v7 }
 0x260   :  { %14335 = vst [vmem:[#allocation55_spill] sm:$0xff] %v12937_v44  ;;  %v5732_v11 = vsub.f32 %v14327_v13, %v14336_v43  ;;  %10004 = vmatpush1.bf16.msra.mxu1 %v10003_v4  ;;  %v5721_v55 = vand.u32 4294901760, %v5720_v15  ;;  %v13820_v22 = vand.u32 4294901760, %v12700_v46  ;;  %v13821_v9 = vand.u32 4294901760, %v12708_v47 }
 0x261   :  { %v6463_v2 = vsub.f32 %v12885_v17, %v14337_v58  ;;  %v6470_v49 = vsub.f32 %v12890_v56, %v14338_v59  ;;  %v12956_v12 = vsub.f32 %v12692_v5, %v14339_v32  ;;  %v12961_v43 = vsub.f32 %v12702_v7, %v14340_v25  ;;  %10006 = vmatprep.subr.bf16.mxu1 %v10005_v36 }
 0x262   :  { %v5703_v58 = vand.u32 4294901760, %v5702_v41  ;;  %v5715_v59 = vand.u32 4294901760, %v5714_v16  ;;  %v5733_v38 = vand.u32 4294901760, %v5732_v11  ;;  %v14341_v5 = vand.u32 4294901760, %v12725_v48  ;;  %10176 = vmatpush3.bf16.msra.mxu0 %v12863_v26 }
 0x263   :  { %v6464_v7 = vand.u32 4294901760, %v6463_v2  ;;  %v6471_v4 = vand.u32 4294901760, %v6470_v49  ;;  %v14342_v41 = vand.u32 4294901760, %v12698_v18  ;;  %v14343_v36 = vand.u32 4294901760, %v12727_v29  ;;  %10178 = vmatprep.subr.bf16.mxu0 %v12898_v63 }
 0x264   :  { %v12969_v32 = vsub.f32 %v12725_v48, %v14341_v5  ;;  %v14344_v15 = vand.u32 4294901760, %v12915_v23  ;;  %v14345_v25 = vand.u32 4294901760, %v12920_v52  ;;  %10008 = vmatpush1.bf16.msra.mxu1 %v10007_v54  ;;  %v14349_v5 = vand.u32 4294901760, %v12956_v12 }
 0x265   :  { %v5726_v16 = vsub.f32 %v12698_v18, %v14342_v41  ;;  %v12978_v11 = vsub.f32 %v12727_v29, %v14343_v36  ;;  %v10015_v41 = vpack.c.bf16 %v5715_v59, %v5703_v58  ;;  %v5738_v29 = vsub.f32 %v12700_v46, %v13820_v22  ;;  %10010 = vmatprep.subr.bf16.mxu1 %v10009_v8 }
 0x266   :  { %v6477_v48 = vsub.f32 %v12915_v23, %v14344_v15  ;;  %v6484_v2 = vsub.f32 %v12920_v52, %v14345_v25  ;;  %v5744_v15 = vsub.f32 %v12708_v47, %v13821_v9  ;;  %v14346_v25 = vand.u32 4294901760, %v12710_v0  ;;  %10180 = vmatpush3.bf16.msra.mxu0 %v12898_v63 }
 0x267   :  { %v14347_v58 = vand.u32 4294901760, %v12778_v62  ;;  %v10017_v22 = vpack.c.bf16 %v5733_v38, %v5721_v55  ;;  %v10185_v39 = vpack.c.bf16 %v6471_v4, %v6464_v7  ;;  %v14348_v36 = vand.u32 4294901760, %v12780_v19  ;;  %10182 = vmatprep.subr.bf16.mxu0 %v12937_v44 }
 0x268   :  { %v5756_v49 = vsub.f32 %v12710_v0, %v14346_v25  ;;  %v6478_v25 = vand.u32 4294901760, %v6477_v48  ;;  %v6485_v54 = vand.u32 4294901760, %v6484_v2  ;;  %10012 = vmatpush1.bf16.msra.mxu1 %v10011_v45  ;;  %v5727_v38 = vand.u32 4294901760, %v5726_v16 }
 0x269   :  { %v13004_v59 = vsub.f32 %v12778_v62, %v14347_v58  ;;  %v13011_v9 = vsub.f32 %v12780_v19, %v14348_v36  ;;  %v6491_v62 = vsub.f32 %v12956_v12, %v14349_v5  ;;  %v14350_v58 = vand.u32 4294901760, %v12961_v43  ;;  %10014 = vmatprep.subr.bf16.mxu1 %v10013_v35 }
 0x26a   :  { %v5739_v7 = vand.u32 4294901760, %v5738_v29  ;;  %v14351_v4 = vand.u32 4294901760, %v12759_v21  ;;  %v14352_v36 = vand.u32 4294901760, %v12762_v30  ;;  %v5745_v2 = vand.u32 4294901760, %v5744_v15  ;;  %10184 = vmatpush3.bf16.msra.mxu0 %v12937_v44 }
 0x26b   :  { %v6498_v55 = vsub.f32 %v12961_v43, %v14350_v58  ;;  %v5757_v8 = vand.u32 4294901760, %v5756_v49  ;;  %v14353_v5 = vand.u32 4294901760, %v12969_v32  ;;  %v14354_v45 = vand.u32 4294901760, %v12978_v11  ;;  %10186 = vmatprep.subr.bf16.mxu0 %v10185_v39 }
 0x26c   :  { %v5750_v19 = vsub.f32 %v12759_v21, %v14351_v4  ;;  %v5762_v48 = vsub.f32 %v12762_v30, %v14352_v36  ;;  %v14355_v4 = vand.u32 4294901760, %v12804_v1  ;;  %v10189_v49 = vpack.c.bf16 %v6485_v54, %v6478_v25  ;;  %10016 = vmatpush1.bf16.msra.mxu1 %v10015_v41 }
 0x26d   :  { %v6505_v63 = vsub.f32 %v12969_v32, %v14353_v5  ;;  %v6512_v16 = vsub.f32 %v12978_v11, %v14354_v45  ;;  %v6492_v15 = vand.u32 4294901760, %v6491_v62  ;;  %v6499_v36 = vand.u32 4294901760, %v6498_v55  ;;  %10018 = vmatprep.subr.bf16.mxu1 %v10017_v22  ;;  %8986 = vmatmul.mubr.f32.vlgmr.msra.gmra.mrb[18].mxu0 %v14330_v10  ;;  %v14360_v10 = vld [vmem:[#allocation47_spill] sm:$0xff] }
 0x26e   :  { %v13038_v35 = vsub.f32 %v12804_v1, %v14355_v4  ;;  %v14356_v5 = vand.u32 4294901760, %v12813_v40  ;;  %v10019_v44 = vpack.c.bf16 %v5739_v7, %v5727_v38  ;;  %v5751_v26 = vand.u32 4294901760, %v5750_v19  ;;  %10188 = vmatpush3.bf16.msra.mxu0 %v10185_v39  ;;  %9020 = vmatprep.mubr.f32.mxu0 %v14360_v10  ;;  %v14363_v19 = vld [vmem:[#allocation34_spill] sm:$0xff] }
 0x26f   :  { %v5763_v45 = vand.u32 4294901760, %v5762_v48  ;;  %v10021_v29 = vpack.c.bf16 %v5757_v8, %v5745_v2  ;;  %v6506_v53 = vand.u32 4294901760, %v6505_v63  ;;  %v14357_v1 = vand.u32 4294901760, %v13004_v59  ;;  %10190 = vmatprep.subr.bf16.mxu0 %v10189_v49  ;;  %v14364_v48 = vld [vmem:[#allocation49_spill] sm:$0xff] }
 0x270   :  { %v13043_v58 = vsub.f32 %v12813_v40, %v14356_v5  ;;  %v6513_v25 = vand.u32 4294901760, %v6512_v16  ;;  %v14358_v62 = vand.u32 4294901760, %v13011_v9  ;;  %v13835_v41 = vand.u32 4294901760, %v13038_v35  ;;  %10020 = vmatpush1.bf16.msra.mxu1 %v10019_v44  ;;  %v14369_v5 = vld [vmem:[#allocation28_spill] sm:$0xff] }
 0x271   :  { %v6519_v54 = vsub.f32 %v13004_v59, %v14357_v1  ;;  %v14359_v55 = vand.u32 4294901760, %v12825_v27  ;;  %v10193_v63 = vpack.c.bf16 %v6499_v36, %v6492_v15  ;;  %v14361_v39 = vand.u32 4294901760, %v12827_v3  ;;  %10022 = vmatprep.subr.bf16.mxu1 %v10021_v29  ;;  %v14370_v1 = vld [vmem:[#allocation33_spill] sm:$0xff] }
 0x272   :  { %v6526_v40 = vsub.f32 %v13011_v9, %v14358_v62  ;;  %v13833_v8 = vand.u32 4294901760, %v13043_v58  ;;  %v10023_v7 = vpack.c.bf16 %v5763_v45, %v5751_v26  ;;  %v10025_v2 = vpack.c.bf16 %v14364_v48, %v14363_v19  ;;  %10192 = vmatpush3.bf16.msra.mxu0 %v10189_v49 }
 0x273   :  { %v13056_v22 = vsub.f32 %v12825_v27, %v14359_v55  ;;  %v13063_v38 = vsub.f32 %v12827_v3, %v14361_v39  ;;  %v6520_v16 = vand.u32 4294901760, %v6519_v54  ;;  %v10197_v27 = vpack.c.bf16 %v6513_v25, %v6506_v53  ;;  %10194 = vmatprep.subr.bf16.mxu0 %v10193_v63 }
 0x274   :  { %v6527_v4 = vand.u32 4294901760, %v6526_v40  ;;  %v6533_v15 = vsub.f32 %v13038_v35, %v13835_v41  ;;  %v6540_v3 = vsub.f32 %v13043_v58, %v13833_v8  ;;  %v14365_v44 = vand.u32 4294901760, %v12871_v20  ;;  %10024 = vmatpush1.bf16.msra.mxu1 %v10023_v7  ;;  %v14378_v8 = vld [vmem:[#allocation67_spill] sm:$0xff] }
 0x275   :  { %14362 = vst [vmem:[#allocation22_spill] sm:$0xff] %v13063_v38  ;;  %v13831_v36 = vand.u32 4294901760, %v13056_v22  ;;  %v13830_v26 = vand.u32 4294901760, %v13063_v38  ;;  %v14367_v53 = vand.u32 4294901760, %v12880_v24  ;;  %v10027_v45 = vpack.c.bf16 %v12556_v60, %v14369_v5  ;;  %10026 = vmatprep.subr.bf16.mxu1 %v10025_v2  ;;  %v14372_v2 = vld [vmem:[#allocation17_spill] sm:$0xff] }
 0x276   :  { %v13078_v29 = vsub.f32 %v12871_v20, %v14365_v44  ;;  %v10029_v54 = vpack.c.bf16 %v12564_v50, %v14370_v1  ;;  %10196 = vmatpush3.bf16.msra.mxu0 %v10193_v63  ;;  %v10201_v25 = vpack.c.bf16 %v6527_v4, %v6520_v16  ;;  %v6534_v62 = vand.u32 4294901760, %v6533_v15  ;;  %v14371_v63 = vld [vmem:[#allocation65_spill] sm:$0xff] }
 0x277   :  { %v13083_v49 = vsub.f32 %v12880_v24, %v14367_v53  ;;  %v6547_v20 = vsub.f32 %v13056_v22, %v13831_v36  ;;  %5799 = vmatmul.mubr.f32.vlgmr.msra.gmra.mrb[10].mxu1 %v14360_v10  ;;  %10198 = vmatprep.subr.bf16.mxu0 %v10197_v27  ;;  %v6541_v24 = vand.u32 4294901760, %v6540_v3  ;;  %v6554_v40 = vsub.f32 %v13063_v38, %v13830_v26  ;;  %v14375_v26 = vld [vmem:[#allocation43_spill] sm:$0xff] }
 0x278   :  { %14366 = vst [vmem:[#allocation56_spill] sm:$0xff] %v13078_v29  ;;  %v13832_v55 = vand.u32 4294901760, %v13078_v29  ;;  %10028 = vmatpush1.bf16.msra.mxu1 %v10027_v45  ;;  %v10031_v7 = vpack.c.bf16 %v12579_v57, %v14371_v63  ;;  %5804 = vmatprep.mubr.f32.mxu1 %v13895_v61  ;;  %v10033_v16 = vpack.c.bf16 %v12585_v33, %v14372_v2  ;;  %v14373_v45 = vld [vmem:[#allocation51_spill] sm:$0xff] }
 0x279   :  { %14368 = vst [vmem:[#allocation34_spill] sm:$0xff] %v13083_v49  ;;  %v13834_v39 = vand.u32 4294901760, %v13083_v49  ;;  %10030 = vmatprep.subr.bf16.mxu1 %v10029_v54  ;;  %v6548_v4 = vand.u32 4294901760, %v6547_v20  ;;  %v10205_v15 = vpack.c.bf16 %v6541_v24, %v6534_v62  ;;  %v6555_v3 = vand.u32 4294901760, %v6554_v40  ;;  %v14374_v54 = vld [vmem:[#allocation20_spill] sm:$0xff] }
 0x27a   :  { %10200 = vmatpush3.bf16.msra.mxu0 %v10197_v27  ;;  %v6561_v44 = vsub.f32 %v13078_v29, %v13832_v55  ;;  %v10035_v36 = vpack.c.bf16 %v14375_v26, %v14374_v54  ;;  %v14376_v27 = vld [vmem:[#allocation60_spill] sm:$0xff] }
 0x27b   :  { %10202 = vmatprep.subr.bf16.mxu0 %v10201_v25  ;;  %v6568_v53 = vsub.f32 %v13083_v49, %v13834_v39  ;;  %5806 = vmatmul.mubr.f32.gmra.mrb[12].mxu1 %v14373_v45  ;;  %v14377_v62 = vld [vmem:[#allocation32_spill] sm:$0xff]  ;;  %v10209_v24 = vpack.c.bf16 %v6555_v3, %v6548_v4  ;;  %v10047_v4 = vpack.c.bf16 %v12645_v42, %v12643_v31  ;;  %v14381_v3 = vld [vmem:[#allocation50_spill] sm:$0xff] }
 0x27c   :  { %10032 = vmatpush1.bf16.msra.mxu1 %v10031_v7  ;;  %5940 = vmatprep.mubr.f32.mxu1 %v13895_v61  ;;  %v10037_v20 = vpack.c.bf16 %v14377_v62, %v14376_v27  ;;  %v6562_v40 = vand.u32 4294901760, %v6561_v44  ;;  %v14379_v39 = vld [vmem:[#allocation68_spill] sm:$0xff]  ;;  %v14380_v7 = vld [vmem:[#allocation71_spill] sm:$0xff]  ;;  %v10055_v44 = vpack.c.bf16 %v12762_v30, %v12759_v21 }
 0x27d   :  { %10034 = vmatprep.subr.bf16.mxu1 %v10033_v16  ;;  %v6569_v55 = vand.u32 4294901760, %v6568_v53  ;;  %v10039_v41 = vpack.c.bf16 %v14379_v39, %v14378_v8  ;;  %v10041_v10 = vpack.c.bf16 %v12623_v37, %v14380_v7  ;;  %v10043_v16 = vpack.c.bf16 %v12630_v6, %v12628_v34 }
 0x27e   :  { %10204 = vmatpush3.bf16.msra.mxu0 %v10201_v25  ;;  %v10045_v25 = vpack.c.bf16 %v12639_v14, %v12636_v28  ;;  %v10229_v53 = vpack.c.bf16 %v12978_v11, %v12969_v32 }
 0x27f   :  { %10206 = vmatprep.subr.bf16.mxu0 %v10205_v15  ;;  %v10213_v26 = vpack.c.bf16 %v6569_v55, %v6562_v40  ;;  %v10051_v55 = vpack.c.bf16 %v12700_v46, %v12698_v18  ;;  %v14383_v40 = vld [vmem:[#allocation62_spill] sm:$0xff] }
 0x280   :  { %10036 = vmatpush1.bf16.msra.mxu1 %v10035_v36  ;;  %v10217_v36 = vpack.c.bf16 %v12890_v56, %v12885_v17 }
 0x281   :  { %10038 = vmatprep.subr.bf16.mxu1 %v10037_v20  ;;  %v14382_v20 = vld [vmem:[#allocation24_spill] sm:$0xff] }
 0x282   :  { %10208 = vmatpush3.bf16.msra.mxu0 %v10205_v15  ;;  %v10053_v15 = vpack.c.bf16 %v12710_v0, %v12708_v47 }
 0x283   :  { %10210 = vmatprep.subr.bf16.mxu0 %v10209_v24 }
 0x284   :  { %10040 = vmatpush1.bf16.msra.mxu1 %v10039_v41  ;;  %v10049_v41 = vpack.c.bf16 %v14327_v13, %v12665_v51 }
 0x285   :  { %10042 = vmatprep.subr.bf16.mxu1 %v10041_v10  ;;  %v10221_v10 = vpack.c.bf16 %v12920_v52, %v12915_v23 }
 0x286   :  { %10212 = vmatpush3.bf16.msra.mxu0 %v10209_v24  ;;  %v10233_v24 = vpack.c.bf16 %v13011_v9, %v13004_v59 }
 0x287   :  { %10214 = vmatprep.subr.bf16.mxu0 %v10213_v26 }
 0x288   :  { %10044 = vmatpush1.bf16.msra.mxu1 %v10043_v16  ;;  %v14384_v16 = vld [vmem:[#allocation29_spill] sm:$0xff] }
 0x289   :  { %10046 = vmatprep.subr.bf16.mxu1 %v10045_v25  ;;  %v10237_v25 = vpack.c.bf16 %v13043_v58, %v13038_v35 }
 0x28a   :  { %10216 = vmatpush3.bf16.msra.mxu0 %v10213_v26  ;;  %v10225_v26 = vpack.c.bf16 %v12961_v43, %v12956_v12 }
 0x28b   :  { %10218 = vmatprep.subr.bf16.mxu0 %v10217_v36 }
 0x28c   :  { %10048 = vmatpush1.bf16.msra.mxu1 %v10047_v4  ;;  %v14386_v4 = vld [vmem:[#allocation73_spill] sm:$0xff] }
 0x28d   :  { %10050 = vmatprep.subr.bf16.mxu1 %v10049_v41  ;;  %9021 = vmatmul.mubr.f32.vlgmr.msra.gmra.mrb[18].mxu0 %v14373_v45  ;;  %v14387_v41 = vld [vmem:[#allocation15_spill] sm:$0xff] }
 0x28e   :  { %10220 = vmatpush3.bf16.msra.mxu0 %v10217_v36  ;;  %9055 = vmatprep.mubr.f32.mxu0 %v14381_v3  ;;  %v14385_v36 = vld [vmem:[#allocation53_spill] sm:$0xff] }
 0x28f   :  { %10222 = vmatprep.subr.bf16.mxu0 %v10221_v10 }
 0x290   :  { %10052 = vmatpush1.bf16.msra.mxu1 %v10051_v55  ;;  %v14388_v55 = vld [vmem:[#allocation18_spill] sm:$0xff] }
 0x291   :  { %10054 = vmatprep.subr.bf16.mxu1 %v10053_v15  ;;  %v14389_v15 = vld [vmem:[#allocation36_spill] sm:$0xff] }
 0x292   :  { %10224 = vmatpush3.bf16.msra.mxu0 %v10221_v10  ;;  %v10241_v10 = vpack.c.bf16 %v13063_v38, %v13056_v22  ;;  %v14394_v38 = vld [vmem:[#allocation25_spill] sm:$0xff] }
 0x293   :  { %10226 = vmatprep.subr.bf16.mxu0 %v10225_v26 }
 0x294   :  { %10056 = vmatpush1.bf16.msra.mxu1 %v10055_v44  ;;  %v14391_v44 = vld [vmem:[#allocation70_spill] sm:$0xff] }
 0x295   :  { %10058 = vmatprep.subr.bf16.mxu1 %v14382_v20 }
 0x296   :  { %10228 = vmatpush3.bf16.msra.mxu0 %v10225_v26  ;;  %v14390_v26 = vld [vmem:[#allocation66_spill] sm:$0xff] }
 0x297   :  { %5943 = vmatmul.mubr.f32.vlgmr.msra.gmra.mrb[10].mxu1 %v14381_v3  ;;  %10230 = vmatprep.subr.bf16.mxu0 %v10229_v53  ;;  %v10245_v3 = vpack.c.bf16 %v13083_v49, %v13078_v29 }
 0x298   :  { %10060 = vmatpush1.bf16.msra.mxu1 %v14383_v40  ;;  %5948 = vmatprep.mubr.f32.mxu1 %v13895_v61 }
 0x299   :  { %10062 = vmatprep.subr.bf16.mxu1 %v14384_v16 }
 0x29a   :  { %10232 = vmatpush3.bf16.msra.mxu0 %v10229_v53  ;;  %v14392_v53 = vld [vmem:[#allocation72_spill] sm:$0xff] }
 0x29b   :  { %10234 = vmatprep.subr.bf16.mxu0 %v10233_v24  ;;  %5951 = vmatmul.mubr.f32.gmra.mrb[12].mxu1 %v14385_v36 }
 0x29c   :  { %10064 = vmatpush1.bf16.msra.mxu1 %v14386_v4  ;;  %6053 = vmatprep.mubr.f32.mxu1 %v13895_v61 }
 0x29d   :  { %10066 = vmatprep.subr.bf16.mxu1 %v14387_v41 }
 0x29e   :  { %10236 = vmatpush3.bf16.msra.mxu0 %v10233_v24  ;;  %v14393_v24 = vld [vmem:[#allocation42_spill] sm:$0xff] }
 0x29f   :  { %10238 = vmatprep.subr.bf16.mxu0 %v10237_v25 }
 0x2a0   :  { %10068 = vmatpush1.bf16.msra.mxu1 %v14388_v55  ;;  %v14395_v55 = vld [vmem:[#allocation58_spill] sm:$0xff] }
 0x2a1   :  { %10070 = vmatprep.subr.bf16.mxu1 %v14389_v15 }
 0x2a2   :  { %10240 = vmatpush3.bf16.msra.mxu0 %v10237_v25  ;;  %v14396_v25 = vld [vmem:[#allocation21_spill] sm:$0xff] }
 0x2a3   :  { %10242 = vmatprep.subr.bf16.mxu0 %v10241_v10 }
 0x2a4   :  { %10072 = vmatpush1.bf16.msra.mxu1 %v14390_v26  ;;  %v14397_v26 = vld [vmem:[#allocation52_spill] sm:$0xff] }
 0x2a5   :  { %10074 = vmatprep.subr.bf16.mxu1 %v14391_v44  ;;  %v14398_v44 = vld [vmem:[#allocation30_spill] sm:$0xff] }
 0x2a6   :  { %10244 = vmatpush3.bf16.msra.mxu0 %v10241_v10  ;;  %v14399_v10 = vld [vmem:[#allocation26_spill] sm:$0xff] }
 0x2a7   :  { %10246 = vmatprep.subr.bf16.mxu0 %v10245_v3 }
 0x2a8   :  { %10076 = vmatpush1.bf16.msra.mxu1 %v14392_v53  ;;  %v14400_v53 = vld [vmem:[#allocation27_spill] sm:$0xff] }
 0x2a9   :  { %10078 = vmatprep.subr.bf16.mxu1 %v14393_v24  ;;  %v14402_v24 = vand.u32 4294901760, %v14364_v48  ;;  %v14409_v48 = vld [vmem:[#allocation44_spill] sm:$0xff] }
 0x2aa   :  { %10248 = vmatpush3.bf16.msra.mxu0 %v10245_v3  ;;  %v14401_v3 = vand.u32 4294901760, %v14363_v19 }
 0x2ab   :  { %10250 = vmatprep.subr.bf16.mxu0 %v14394_v38 }
 0x2ac   :  { %10080 = vmatpush1.bf16.msra.mxu1 %v14395_v55  ;;  %v10089_v49 = vpack.c.bf16 %v14402_v24, %v14401_v3  ;;  %v14405_v55 = vand.u32 4294901760, %v14369_v5  ;;  %v14410_v24 = vand.u32 4294901760, %v14371_v63  ;;  %v14411_v5 = vand.u32 4294901760, %v12579_v57  ;;  %v14417_v63 = vld [vmem:[#allocation43_spill] sm:$0xff] }
 0x2ad   :  { %10082 = vmatprep.subr.bf16.mxu1 %v14396_v25  ;;  %9056 = vmatmul.mubr.f32.vlgmr.msra.gmra.mrb[18].mxu0 %v14385_v36  ;;  %v14403_v25 = vld [vmem:[#allocation38_spill] sm:$0xff]  ;;  %v14404_v36 = vld [vmem:[#allocation31_spill] sm:$0xff]  ;;  %v14418_v57 = vand.u32 4294901760, %v14417_v63 }
 0x2ae   :  { %10252 = vmatpush3.bf16.msra.mxu0 %v14394_v38  ;;  %9090 = vmatprep.mubr.f32.mxu0 %v14397_v26  ;;  %v14406_v38 = vand.u32 4294901760, %v12556_v60  ;;  %v10095_v3 = vpack.c.bf16 %v14411_v5, %v14410_v24  ;;  %v14412_v60 = vand.u32 4294901760, %v14372_v2  ;;  %v14419_v2 = vand.u32 4294901760, %v14376_v27  ;;  %v14426_v27 = vld [vmem:[#allocation69_spill] sm:$0xff] }
 0x2af   :  { %10254 = vmatprep.subr.bf16.mxu0 %v14398_v44  ;;  %v14424_v24 = vand.u32 4294901760, %v14380_v7  ;;  %v14425_v5 = vand.u32 4294901760, %v12623_v37  ;;  %v14431_v37 = vld [vmem:[#allocation55_spill] sm:$0xff]  ;;  %v14432_v7 = vand.u32 4294901760, %v12885_v17  ;;  %v14438_v17 = vand.u32 4294901760, %v12915_v23 }
 0x2b0   :  { %10084 = vmatpush1.bf16.msra.mxu1 %v14399_v10  ;;  %v10091_v29 = vpack.c.bf16 %v14406_v38, %v14405_v55  ;;  %v14407_v10 = vand.u32 4294901760, %v14370_v1  ;;  %v14415_v1 = vld [vmem:[#allocation54_spill] sm:$0xff]  ;;  %v14445_v23 = vand.u32 4294901760, %v12956_v12 }
 0x2b1   :  { %10086 = vmatprep.subr.bf16.mxu1 %v14400_v53  ;;  %v14408_v53 = vand.u32 4294901760, %v12564_v50  ;;  %v14413_v50 = vand.u32 4294901760, %v12585_v33  ;;  %v14420_v33 = vand.u32 4294901760, %v14377_v62  ;;  %v14427_v62 = vand.u32 4294901760, %v12628_v34 }
 0x2b2   :  { %10256 = vmatpush3.bf16.msra.mxu0 %v14398_v44  ;;  %v14434_v34 = vand.u32 4294901760, %v12643_v31  ;;  %v14440_v31 = vand.u32 4294901760, %v12698_v18 }
 0x2b3   :  { %10258 = vmatprep.subr.bf16.mxu0 %v14403_v25  ;;  %v10093_v19 = vpack.c.bf16 %v14408_v53, %v14407_v10  ;;  %v10097_v38 = vpack.c.bf16 %v14413_v50, %v14412_v60  ;;  %v14421_v53 = vld [vmem:[#allocation63_spill] sm:$0xff]  ;;  %v14422_v10 = vand.u32 4294901760, %v14378_v8  ;;  %v14428_v60 = vand.u32 4294901760, %v12630_v6 }
 0x2b4   :  { %10088 = vmatpush1.bf16.msra.mxu1 %v14404_v36  ;;  %v14429_v8 = vand.u32 4294901760, %v12636_v28  ;;  %v14435_v6 = vand.u32 4294901760, %v12645_v42  ;;  %v14436_v28 = vand.u32 4294901760, %v12665_v51  ;;  %v14441_v42 = vand.u32 4294901760, %v12700_v46 }
 0x2b5   :  { %10090 = vmatprep.subr.bf16.mxu1 %v10089_v49  ;;  %v14414_v49 = vld [vmem:[#allocation57_spill] sm:$0xff]  ;;  %v10107_v50 = vpack.c.bf16 %v14428_v60, %v14427_v62  ;;  %v14442_v51 = vand.u32 4294901760, %v12708_v47  ;;  %v14447_v46 = vand.u32 4294901760, %v12759_v21  ;;  %v14450_v47 = vand.u32 4294901760, %v12978_v11  ;;  %v14461_v62 = vld [vmem:[#allocation34_spill] sm:$0xff] }
 0x2b6   :  { %10260 = vmatpush3.bf16.msra.mxu0 %v14403_v25  ;;  %v14451_v21 = vand.u32 4294901760, %v13004_v59  ;;  %v14462_v60 = vand.u32 4294901760, %v14461_v62 }
 0x2b7   :  { %6057 = vmatmul.mubr.f32.vlgmr.msra.gmra.mrb[10].mxu1 %v14397_v26  ;;  %10262 = vmatprep.subr.bf16.mxu0 %v14409_v48  ;;  %v10101_v26 = vpack.c.bf16 %v14420_v33, %v14419_v2  ;;  %v10115_v33 = vpack.c.bf16 %v14441_v42, %v14440_v31 }
 0x2b8   :  { %10092 = vmatpush1.bf16.msra.mxu1 %v10091_v29  ;;  %6062 = vmatprep.mubr.f32.mxu1 %v13895_v61  ;;  %v14416_v29 = vand.u32 4294901760, %v14374_v54  ;;  %v14423_v54 = vand.u32 4294901760, %v14379_v39  ;;  %v14430_v39 = vand.u32 4294901760, %v12639_v14  ;;  %v14437_v14 = vand.u32 4294901760, %v14327_v13 }
 0x2b9   :  { %10094 = vmatprep.subr.bf16.mxu1 %v10093_v19  ;;  %v14443_v13 = vand.u32 4294901760, %v12710_v0  ;;  %v14449_v0 = vand.u32 4294901760, %v12969_v32  ;;  %v14454_v32 = vand.u32 4294901760, %v13043_v58  ;;  %v14456_v58 = vld [vmem:[#allocation22_spill] sm:$0xff] }
 0x2ba   :  { %10264 = vmatpush3.bf16.msra.mxu0 %v14409_v48  ;;  %v10099_v55 = vpack.c.bf16 %v14418_v57, %v14416_v29  ;;  %v10103_v19 = vpack.c.bf16 %v14423_v54, %v14422_v10  ;;  %v14433_v29 = vand.u32 4294901760, %v12890_v56  ;;  %v10111_v57 = vpack.c.bf16 %v14435_v6, %v14434_v34  ;;  %v14444_v10 = vld [vmem:[#allocation47_spill] sm:$0xff]  ;;  %v14468_v34 = vld [vmem:[#allocation58_spill] sm:$0xff] }
 0x2bb   :  { %10266 = vmatprep.subr.bf16.mxu0 %v14414_v49  ;;  %6066 = vmatmul.mubr.f32.gmra.mrb[12].mxu1 %v14415_v1  ;;  %v14439_v56 = vand.u32 4294901760, %v12920_v52  ;;  %v14446_v52 = vand.u32 4294901760, %v12961_v43  ;;  %v14448_v54 = vand.u32 4294901760, %v12762_v30  ;;  %v14452_v30 = vand.u32 4294901760, %v13011_v9 }
 0x2bc   :  { %10096 = vmatpush1.bf16.msra.mxu1 %v10095_v3  ;;  %6232 = vmatprep.mubr.f32.mxu1 %v13895_v61  ;;  %v10105_v3 = vpack.c.bf16 %v14425_v5, %v14424_v24  ;;  %v10281_v63 = vpack.c.bf16 %v14433_v29, %v14432_v7  ;;  %v14453_v43 = vand.u32 4294901760, %v13038_v35  ;;  %v14455_v35 = vand.u32 4294901760, %v13056_v22  ;;  %v14458_v5 = vld [vmem:[#allocation18_spill] sm:$0xff] }
 0x2bd   :  { %10098 = vmatprep.subr.bf16.mxu1 %v10097_v38  ;;  %v10109_v38 = vpack.c.bf16 %v14430_v39, %v14429_v8  ;;  %v10285_v2 = vpack.c.bf16 %v14439_v56, %v14438_v17  ;;  %v10289_v18 = vpack.c.bf16 %v14446_v52, %v14445_v23  ;;  %v10297_v12 = vpack.c.bf16 %v14452_v30, %v14451_v21  ;;  %v14463_v8 = vld [vmem:[#allocation66_spill] sm:$0xff]  ;;  %v14471_v56 = vld [vmem:[#allocation27_spill] sm:$0xff]  ;;  %v14472_v23 = vld [vmem:[#allocation40_spill] sm:$0xff] }
 0x2be   :  { %10268 = vmatpush3.bf16.msra.mxu0 %v14414_v49  ;;  %v10301_v11 = vpack.c.bf16 %v14454_v32, %v14453_v43  ;;  %v14464_v39 = vld [vmem:[#allocation70_spill] sm:$0xff]  ;;  %v14477_v30 = vld [vmem:[#allocation45_spill] sm:$0xff]  ;;  %v14480_v43 = vld [vmem:[#allocation35_spill] sm:$0xff] }
 0x2bf   :  { %10270 = vmatprep.subr.bf16.mxu0 %v14421_v53  ;;  %v14481_v32 = vld [vmem:[#allocation39_spill] sm:$0xff] }
 0x2c0   :  { %10100 = vmatpush1.bf16.msra.mxu1 %v10099_v55  ;;  %v10113_v55 = vpack.c.bf16 %v14437_v14, %v14436_v28  ;;  %v14470_v14 = vld [vmem:[#allocation26_spill] sm:$0xff] }
 0x2c1   :  { %10102 = vmatprep.subr.bf16.mxu1 %v10101_v26  ;;  %v10117_v26 = vpack.c.bf16 %v14443_v13, %v14442_v51 }
 0x2c2   :  { %10272 = vmatpush3.bf16.msra.mxu0 %v14421_v53 }
 0x2c3   :  { %10274 = vmatprep.subr.bf16.mxu0 %v14426_v27 }
 0x2c4   :  { %10104 = vmatpush1.bf16.msra.mxu1 %v10103_v19  ;;  %v10293_v19 = vpack.c.bf16 %v14450_v47, %v14449_v0 }
 0x2c5   :  { %10106 = vmatprep.subr.bf16.mxu1 %v10105_v3 }
 0x2c6   :  { %10276 = vmatpush3.bf16.msra.mxu0 %v14426_v27 }
 0x2c7   :  { %10278 = vmatprep.subr.bf16.mxu0 %v14431_v37 }
 0x2c8   :  { %10108 = vmatpush1.bf16.msra.mxu1 %v10107_v50 }
 0x2c9   :  { %10110 = vmatprep.subr.bf16.mxu1 %v10109_v38  ;;  %v14465_v38 = vld [vmem:[#allocation72_spill] sm:$0xff] }
 0x2ca   :  { %10280 = vmatpush3.bf16.msra.mxu0 %v14431_v37 }
 0x2cb   :  { %10282 = vmatprep.subr.bf16.mxu0 %v10281_v63 }
 0x2cc   :  { %10112 = vmatpush1.bf16.msra.mxu1 %v10111_v57  ;;  %v14469_v57 = vld [vmem:[#allocation21_spill] sm:$0xff] }
 0x2cd   :  { %10114 = vmatprep.subr.bf16.mxu1 %v10113_v55  ;;  %9091 = vmatmul.mubr.f32.vlgmr.msra.gmra.mrb[18].mxu0 %v14415_v1  ;;  %v10119_v1 = vpack.c.bf16 %v14448_v54, %v14447_v46 }
 0x2ce   :  { %10284 = vmatpush3.bf16.msra.mxu0 %v10281_v63  ;;  %9125 = vmatprep.mubr.f32.mxu0 %v14444_v10  ;;  %v14467_v63 = vld [vmem:[#allocation25_spill] sm:$0xff] }
 0x2cf   :  { %10286 = vmatprep.subr.bf16.mxu0 %v10285_v2 }
 0x2d0   :  { %10116 = vmatpush1.bf16.msra.mxu1 %v10115_v33 }
 0x2d1   :  { %10118 = vmatprep.subr.bf16.mxu1 %v10117_v26  ;;  %v7044_v26 = vld [vmem:[#allocation5 + $0x20] sm:$0xf] }
 0x2d2   :  { %10288 = vmatpush3.bf16.msra.mxu0 %v10285_v2 }
 0x2d3   :  { %10290 = vmatprep.subr.bf16.mxu0 %v10289_v18 }
 0x2d4   :  { %10120 = vmatpush1.bf16.msra.mxu1 %v10119_v1  ;;  %v14475_v1 = vld [vmem:[#allocation19_spill] sm:$0xff] }
 0x2d5   :  { %10122 = vmatprep.subr.bf16.mxu1 %v14382_v20  ;;  %v7043_v20 = vld [vmem:[#allocation5 + $0x18] sm:$0xff] }
 0x2d6   :  { %10292 = vmatpush3.bf16.msra.mxu0 %v10289_v18  ;;  %v7047_v59 = vcombine.high %v7043_v20, %v7043_v20  ;;  %v7048_v7 = vsel %vm1725_vm0, %v7043_v20, 0 }
 0x2d7   :  { %6234 = vmatmul.mubr.f32.vlgmr.msra.gmra.mrb[10].mxu1 %v14444_v10  ;;  %10294 = vmatprep.subr.bf16.mxu0 %v10293_v19  ;;  %v13319_v6 = vand.u32 4294901760, %v7048_v7 }
 0x2d8   :  { %10124 = vmatpush1.bf16.msra.mxu1 %v14383_v40  ;;  %6239 = vmatprep.mubr.f32.mxu1 %v13895_v61 }
 0x2d9   :  { %10126 = vmatprep.subr.bf16.mxu1 %v14384_v16  ;;  %v14457_v16 = vand.u32 4294901760, %v14456_v58  ;;  %v13331_v17 = vsub.f32 %v7048_v7, %v13319_v6  ;;  %v14483_v58 = vld [vmem:[#allocation61_spill] sm:$0xff] }
 0x2da   :  { %10296 = vmatpush3.bf16.msra.mxu0 %v10293_v19  ;;  %v14476_v19 = vld [vmem:[#allocation41_spill] sm:$0xff] }
 0x2db   :  { %10298 = vmatprep.subr.bf16.mxu0 %v10297_v12  ;;  %6241 = vmatmul.mubr.f32.gmra.mrb[12].mxu1 %v14373_v45  ;;  %v10305_v24 = vpack.c.bf16 %v14457_v16, %v14455_v35  ;;  %v7151_v33 = vand.u32 4294901760, %v13331_v17 }
 0x2dc   :  { %10128 = vmatpush1.bf16.msra.mxu1 %v14386_v4  ;;  %6343 = vmatprep.mubr.f32.mxu1 %v13895_v61  ;;  %v7050_v4 = vsel %vm1725_vm0, %v7047_v59, 0 }
 0x2dd   :  { %10130 = vmatprep.subr.bf16.mxu1 %v14387_v41  ;;  %v14459_v41 = vld [vmem:[#allocation56_spill] sm:$0xff]  ;;  %v13309_v22 = vand.u32 4294901760, %v7050_v4 }
 0x2de   :  { %v13292_v9 = vpop.f32.mrb[6].mxu1  ;;  %10300 = vmatpush3.bf16.msra.mxu0 %v10297_v12  ;;  %v14460_v3 = vand.u32 4294901760, %v14459_v41 }
 0x2df   :  { %v13294_v40 = vpop.f32.mrb[7].mxu1  ;;  %10302 = vmatprep.subr.bf16.mxu0 %v10301_v11  ;;  %v13315_v29 = vsub.f32 %v7050_v4, %v13309_v22 }
 0x2e0   :  { %10132 = vmatpush1.bf16.msra.mxu1 %v14458_v5  ;;  %v10309_v50 = vpack.c.bf16 %v14462_v60, %v14460_v3  ;;  %v14484_v3 = vld [vmem:[#allocation64_spill] sm:$0xff]  ;;  %v14485_v60 = vld [vmem:[#allocation23_spill] sm:$0xff] }
 0x2e1   :  { %10134 = vmatprep.subr.bf16.mxu1 %v14389_v15  ;;  %v14466_v15 = vld [vmem:[#allocation42_spill] sm:$0xff]  ;;  %v7145_v28 = vand.u32 4294901760, %v13315_v29 }
 0x2e2   :  { %10304 = vmatpush3.bf16.msra.mxu0 %v10301_v11 }
 0x2e3   :  { %10306 = vmatprep.subr.bf16.mxu0 %v10305_v24  ;;  %v7146_v31 = vsub.f32 %v13315_v29, %v7145_v28 }
 0x2e4   :  { %10136 = vmatpush1.bf16.msra.mxu1 %v14463_v8 }
 0x2e5   :  { %10138 = vmatprep.subr.bf16.mxu1 %v14464_v39  ;;  %v7147_v13 = vand.u32 4294901760, %v7146_v31 }
 0x2e6   :  { %10308 = vmatpush3.bf16.msra.mxu0 %v10305_v24 }
 0x2e7   :  { %10310 = vmatprep.subr.bf16.mxu0 %v10309_v50 }
 0x2e8   :  { %10140 = vmatpush1.bf16.msra.mxu1 %v14465_v38 }
 0x2e9   :  { %10142 = vmatprep.subr.bf16.mxu1 %v14466_v15 }
 0x2ea   :  { %10312 = vmatpush3.bf16.msra.mxu0 %v10309_v50 }
 0x2eb   :  { %10314 = vmatprep.subr.bf16.mxu0 %v14467_v63 }
 0x2ec   :  { %10144 = vmatpush1.bf16.msra.mxu1 %v14468_v34 }
 0x2ed   :  { %10146 = vmatprep.subr.bf16.mxu1 %v14469_v57  ;;  %9126 = vmatmul.mubr.f32.vlgmr.msra.gmra.mrb[18].mxu0 %v14373_v45 }
 0x2ee   :  { %10316 = vmatpush3.bf16.msra.mxu0 %v14467_v63  ;;  %9160 = vmatprep.mubr.f32.mxu0 %v14444_v10 }
 0x2ef   :  { %10318 = vmatprep.subr.bf16.mxu0 %v14398_v44 }
 0x2f0   :  { %10148 = vmatpush1.bf16.msra.mxu1 %v14470_v14  ;;  %v13328_v55 = vpop.f32.mrb[10].mxu0 }
 0x2f1   :  { %10150 = vmatprep.subr.bf16.mxu1 %v14471_v56  ;;  %v13334_v2 = vpop.f32.mrb[11].mxu0 }
 0x2f2   :  { %10320 = vmatpush3.bf16.msra.mxu0 %v14398_v44  ;;  %v7152_v44 = vsub.f32 %v13331_v17, %v7151_v33 }
 0x2f3   :  { %10322 = vmatprep.subr.bf16.mxu0 %v14403_v25 }
 0x2f4   :  { %10152 = vmatpush1.bf16.msra.mxu1 %v14404_v36  ;;  %v13342_v42 = vpop.f32.mrb[12].mxu0  ;;  %v7052_v36 = vsel %vm1725_vm0, %v7044_v26, 0 }
 0x2f5   :  { %v13345_v51 = vpop.f32.mrb[13].mxu0  ;;  %7055 = vmatprep.subr.mxu1 %v13309_v22 }
 0x2f6   :  { %10324 = vmatpush3.bf16.msra.mxu0 %v14403_v25  ;;  %v13360_v25 = vand.u32 4294901760, %v7052_v36 }
 0x2f7   :  { %6345 = vmatmul.mubr.f32.vlgmr.msra.gmra.mrb[10].mxu1 %v14444_v10  ;;  %10326 = vmatprep.subr.bf16.mxu0 %v14409_v48  ;;  %v7153_v10 = vand.u32 4294901760, %v7152_v44 }
 0x2f8   :  { %6350 = vmatprep.mubr.f32.mxu1 %v13895_v61  ;;  %7057 = vmatpush1.msra.mxu1 %v13319_v6  ;;  %v7656_v52 = vsub.f32 %v7052_v36, %v13360_v25 }
 0x2f9   :  { %7148 = vmatprep.subr.mxu1 %v7147_v13 }
 0x2fa   :  { %10328 = vmatpush3.bf16.msra.mxu0 %v14409_v48  ;;  %v14473_v48 = vld [vmem:[#allocation46_spill] sm:$0xff]  ;;  %v13372_v18 = vand.u32 4294901760, %v7656_v52 }
 0x2fb   :  { %6352 = vmatmul.mubr.f32.gmra.mrb[12].mxu1 %v14373_v45  ;;  %10330 = vmatprep.subr.bf16.mxu0 %v14414_v49 }
 0x2fc   :  { %7120 = vmatprep.mubr.f32.mxu1 %v13895_v61  ;;  %v7658_v46 = vsub.f32 %v7656_v52, %v13372_v18 }
 0x2fe   :  { %10332 = vmatpush3.bf16.msra.mxu0 %v14414_v49  ;;  %v14474_v49 = vld [vmem:[#allocation16_spill] sm:$0xff]  ;;  %v7659_v0 = vand.u32 4294901760, %v7658_v46 }
 0x2ff   :  { %7126 = vmatmul.mubr.f32.vlgmr.msra.gmra.mrb[14].mxu1 %v14472_v23  ;;  %10334 = vmatprep.subr.bf16.mxu0 %v14421_v53 }
 0x300   :  { %7131 = vmatprep.mubr.f32.mxu1 %v13895_v61  ;;  %7154 = vmatpush1.msra.mxu1 %v7153_v10 }
 0x301   :  { %7234 = vmatprep.subr.mxu1 %v13315_v29 }
 0x302   :  { %10336 = vmatpush3.bf16.msra.mxu0 %v14421_v53 }
 0x303   :  { %7137 = vmatmul.mubr.f32.gmra.mrb[16].mxu1 %v14473_v48  ;;  %10338 = vmatprep.subr.bf16.mxu0 %v14426_v27 }
 0x304   :  { %7217 = vmatprep.mubr.f32.mxu1 %v13895_v61 }
 0x306   :  { %10340 = vmatpush3.bf16.msra.mxu0 %v14426_v27 }
 0x307   :  { %7219 = vmatmul.mubr.f32.vlgmr.msra.gmra.mrb[14].mxu1 %v14474_v49  ;;  %10342 = vmatprep.subr.bf16.mxu0 %v14431_v37 }
 0x308   :  { %7224 = vmatprep.mubr.f32.mxu1 %v13895_v61  ;;  %7237 = vmatpush1.msra.mxu1 %v13331_v17 }
 0x309   :  { %7318 = vmatprep.subr.mxu1 %v13309_v22 }
 0x30a   :  { %v8952_v53 = vpop.f32.mrb[8].mxu1  ;;  %10344 = vmatpush3.bf16.msra.mxu0 %v14431_v37  ;;  %v14478_v37 = vld [vmem:[#allocation48_spill] sm:$0xff] }
 0x30b   :  { %v5398_v54 = vmul.f32 %v8952_v53, %v13292_v9  ;;  %7226 = vmatmul.mubr.f32.gmra.mrb[16].mxu1 %v14475_v1  ;;  %v5383_v27 = vpop.f32.mrb[9].mxu1  ;;  %9163 = vmatprep.subr.mxu0 %v13360_v25 }
 0x30c   :  { %v5395_v47 = vmul.f32 %v5383_v27, %v13294_v40  ;;  %7300 = vmatprep.mubr.f32.mxu1 %v13895_v61  ;;  %v14482_v40 = vld [vmem:[#allocation59_spill] sm:$0xff] }
 0x30d   :  { %v13389_v21 = vadd.f32 %v5398_v54, %v14476_v19  ;;  %9161 = vmatmul.mubr.f32.vlgmr.msra.gmra.mrb[18].mxu0 %v14373_v45  ;;  %v14479_v45 = vld [vmem:[#allocation37_spill] sm:$0xff] }
 0x30e   :  { %v13393_v12 = vadd.f32 %v5395_v47, %v14477_v30  ;;  %9164 = vmatpush3.msra.mxu0 %v13360_v25  ;;  %9165 = vmatprep.mubr.f32.mxu0 %v14472_v23 }
 0x30f   :  { %7303 = vmatmul.mubr.f32.vlgmr.msra.gmra.mrb[14].mxu1 %v14478_v37  ;;  %9168 = vmatprep.subr.mxu0 %v7659_v0 }
 0x310   :  { %7308 = vmatprep.mubr.f32.mxu1 %v13895_v61  ;;  %7320 = vmatpush1.msra.mxu1 %v13319_v6 }
 0x311   :  { %9166 = vmatmul.mubr.f32.vlgmr.msra.gmra.mrb[20].mxu0 %v14473_v48  ;;  %7405 = vmatprep.subr.mxu1 %v7145_v28 }
 0x312   :  { %9169 = vmatpush3.msra.mxu0 %v7659_v0  ;;  %9170 = vmatprep.mubr.f32.mxu0 %v14474_v49 }
 0x313   :  { %7311 = vmatmul.mubr.f32.gmra.mrb[16].mxu1 %v14479_v45  ;;  %9173 = vmatprep.subr.mxu0 %v7656_v52 }
 0x314   :  { %7383 = vmatprep.mubr.f32.mxu1 %v13895_v61 }
 0x317   :  { %7387 = vmatmul.mubr.f32.vlgmr.msra.gmra.mrb[14].mxu1 %v14480_v43 }
 0x318   :  { %7392 = vmatprep.mubr.f32.mxu1 %v13895_v61  ;;  %7409 = vmatpush1.msra.mxu1 %v7151_v33 }
 0x319   :  { %9171 = vmatmul.mubr.f32.vlgmr.msra.gmra.mrb[20].mxu0 %v14475_v1  ;;  %7488 = vmatprep.subr.mxu1 %v13309_v22 }
 0x31a   :  { %9174 = vmatpush3.msra.mxu0 %v7656_v52  ;;  %9175 = vmatprep.mubr.f32.mxu0 %v14478_v37 }
 0x31b   :  { %7396 = vmatmul.mubr.f32.gmra.mrb[16].mxu1 %v14481_v32  ;;  %9178 = vmatprep.subr.mxu0 %v13360_v25 }
 0x31c   :  { %7472 = vmatprep.mubr.f32.mxu1 %v13895_v61 }
 0x31f   :  { %7474 = vmatmul.mubr.f32.vlgmr.msra.gmra.mrb[14].mxu1 %v14474_v49 }
 0x320   :  { %7479 = vmatprep.mubr.f32.mxu1 %v13895_v61  ;;  %v4892_v11 = vpop.f32.mrb[14].mxu0  ;;  %7490 = vmatpush1.msra.mxu1 %v13319_v6 }
 0x321   :  { %v5393_v20 = vmul.f32 %v4892_v11, %v13328_v55  ;;  %9176 = vmatmul.mubr.f32.vlgmr.msra.gmra.mrb[20].mxu0 %v14479_v45  ;;  %v4894_v9 = vpop.f32.mrb[15].mxu0 }
 0x322   :  { %v5394_v59 = vmul.f32 %v4894_v9, %v13334_v2  ;;  %9179 = vmatpush3.msra.mxu0 %v13360_v25  ;;  %9180 = vmatprep.mubr.f32.mxu0 %v14480_v43 }
 0x323   :  { %v5399_v35 = vadd.f32 %v5393_v20, %v14482_v40  ;;  %7481 = vmatmul.mubr.f32.gmra.mrb[16].mxu1 %v14475_v1  ;;  %9183 = vmatprep.subr.mxu0 %v13372_v18 }
 0x324   :  { %v5400_v16 = vadd.f32 %v5394_v59, %v14483_v58  ;;  %7553 = vmatprep.mubr.f32.mxu1 %v13895_v61  ;;  %v4899_v24 = vpop.f32.mrb[16].mxu0 }
 0x325   :  { %v5396_v5 = vmul.f32 %v4899_v24, %v13342_v42  ;;  %v4901_v4 = vpop.f32.mrb[17].mxu0 }
 0x326   :  { %v5397_v41 = vmul.f32 %v4901_v4, %v13345_v51 }
 0x327   :  { %v5402_v62 = vadd.f32 %v5396_v5, %v14484_v3  ;;  %7555 = vmatmul.mubr.f32.vlgmr.msra.gmra.mrb[14].mxu1 %v14474_v49 }
 0x328   :  { %v5403_v50 = vadd.f32 %v5397_v41, %v14485_v60  ;;  %7560 = vmatprep.mubr.f32.mxu1 %v13895_v61 }
 0x329   :  { %9181 = vmatmul.mubr.f32.vlgmr.msra.gmra.mrb[20].mxu0 %v14481_v32 }
 0x32a   :  { %9184 = vmatpush3.msra.mxu0 %v13372_v18  ;;  %9185 = vmatprep.mubr.f32.mxu0 %v14474_v49 }
 0x32b   :  { %7562 = vmatmul.mubr.f32.gmra.mrb[16].mxu1 %v14475_v1  ;;  %9188 = vmatprep.subr.mxu0 %v13360_v25 }
 0x331   :  { %9186 = vmatmul.mubr.f32.vlgmr.msra.gmra.mrb[20].mxu0 %v14475_v1 }
 0x332   :  { %9189 = vmatpush3.msra.mxu0 %v13360_v25  ;;  %9190 = vmatprep.mubr.f32.mxu0 %v14474_v49 }
 0x339   :  { %9191 = vmatmul.mubr.f32.vlgmr.msra.gmra.mrb[20].mxu0 %v14475_v1 }
 0x3ca   :  { %v6346_v8 = vpop.f32.mrb[10].mxu1 }
 0x3cb   :  { %v6348_v61 = vpop.f32.mrb[11].mxu1 }
 0x3ce   :  { %v6353_v39 = vpop.f32.mrb[12].mxu1 }
 0x3cf   :  { %v6355_v22 = vpop.f32.mrb[13].mxu1 }
 0x3e0   :  { %v9162_v38 = vpop.f32.mrb[18].mxu0 }
 0x3e1   :  { %v7032_v15 = vpop.f32.mrb[19].mxu0 }
 0x3fa   :  { %v7556_v7 = vpop.f32.mrb[14].mxu1 }
 0x3fb   :  { %v8057_v29 = vmul.f32 %v7556_v7, %v6346_v8  ;;  %v7558_v63 = vpop.f32.mrb[15].mxu1 }
 0x3fc   :  { %v8058_v34 = vmul.f32 %v7558_v63, %v6348_v61 }
 0x3fd   :  { %v8063_v6 = vadd.f32 %v8057_v29, %v5399_v35 }
 0x3fe   :  { %v8064_v57 = vadd.f32 %v8058_v34, %v5400_v16  ;;  %v7563_v28 = vpop.f32.mrb[16].mxu1 }
 0x3ff   :  { %8069 = vst [vmem:[#allocation10] sm:$0xff] %v8063_v6  ;;  %v8060_v14 = vmul.f32 %v7563_v28, %v6353_v39  ;;  %v7565_v55 = vpop.f32.mrb[17].mxu1 }
 0x400   :  { %8070 = vst [vmem:[#allocation10 + $0x8] sm:$0xff] %v8064_v57  ;;  %v8061_v17 = vmul.f32 %v7565_v55, %v6355_v22 }
 0x401   :  { %v8066_v56 = vadd.f32 %v8060_v14, %v5402_v62 }
 0x402   :  { %v8067_v2 = vadd.f32 %v8061_v17, %v5403_v50 }
 0x403   :  { %8073 = vst [vmem:[#allocation10 + $0x18] sm:$0xff] %v8066_v56 }
 0x404   :  { %8074 = vst [vmem:[#allocation10 + $0x20] sm:$0xff] %v8067_v2 }
 0x40c   :  { %v9192_v31 = vpop.f32.mrb[20].mxu0 }
 0x40d   :  { %v8062_v42 = vmul.f32 %v9192_v31, %v9162_v38  ;;  %v8047_v33 = vpop.f32.mrb[21].mxu0 }
 0x40e   :  { %v8059_v51 = vmul.f32 %v8047_v33, %v7032_v15 }
 0x40f   :  { %v8068_v13 = vadd.f32 %v8062_v42, %v13389_v21 }
 0x410   :  { %v8065_v26 = vadd.f32 %v8059_v51, %v13393_v12 }
 0x411   :  { %8075 = vst.msk [vmem:[#allocation10 + $0x28] sm:$0xff] %vm8071_vm2, %v8068_v13 }
 0x412   :  { %8072 = vst.msk [vmem:[#allocation10 + $0x10] sm:$0xff] %vm8071_vm2, %v8065_v26 }
 0x413   :  { %10639 = shalt.err (!%p10636_p8)
}
 0x414   :  { %s10640_s19 = scalar_lea.hbm %s13465_s4, 768 }
 0x415   :  { %p10641_p9 = scmp.ne.s32.totalorder %s13465_s4, %s10640_s19  ;;  %p10644_p10 = scmp.lt.u32.totalorder %s10640_s19, %s13465_s4 }
 0x417   :  { %p10646_p11 = pnand %p10644_p10, %p10641_p9 }
 0x419   :  { %10649 = shalt.err (!%p10646_p11)
}
 0x41a   :  { %8087 = dma.vmem_to_hbm [thread:$0]  %s8082_s15, 768, %s13465_s4, [#allocation4], %s10662_s1, %s10662_s1, %s10663_s13  }
 0x41b   :  { %10656 = dma.done.wait [#allocation4], 768  }
 0x41c   :  { %10657 = vsyncadd [#allocation4], 4294966528 }
 0x41d   :  { %8091 = vsyncpa [#allocation3], 1 }
 0x41e   :  { %8092 = vsyncpa [#allocation6], 1 }
 0x41f   :  { %8093 = vsyncpa [#allocation9], 1 }
 0x420   :  { %8094 = vsyncpa [#allocation4], 1 }

</bundles_post_ra>
